<compile_context>
chip_gen: v7x
topology: tpu7x:2x2x1
jax: 0.10.0
libtpu: 0.0.40
codegen_flags: <defaults>
</compile_context>

<pallas_src>
import functools
import math

import jax
import jax.numpy as jnp
from jax import lax
from jax.experimental import pallas as pl
from jax.experimental.pallas import tpu as pltpu


# ----------------------------------------------------------------------------
# Fused kernel: per (batch, query-row-tile) grid step.
#   step (b, t=0) : LayerNorm + QKV projection for the whole batch element,
#                   stored in a bf16 VMEM scratch (reused by remaining tiles).
#   every step    : banded neighborhood attention for TQ query rows, all heads,
#                   followed by the output projection of those rows.
# ----------------------------------------------------------------------------
def _fused_na2d_kernel(x_ref, g_ref, beta_ref, wqkv_ref, bqkv_ref, bias_ref,
                       wp_ref, bp_ref, o_ref, qkv_s, y_s,
                       *, H, W, nh, hd, K, TQ, BAND, eps):
    C = nh * hd
    M = TQ * W          # query pixels per step
    N = BAND * W        # key-band pixels per step (lane-aligned when possible)
    nb = K // 2
    t = pl.program_id(1)

    # --- once per batch element: fused LayerNorm + (scale-folded) QKV --------
    @pl.when(t == 0)
    def _():
        x = x_ref[0].astype(jnp.float32)                          # (HW, C)
        mu = jnp.mean(x, axis=-1, keepdims=True)
        var = jnp.mean((x - mu) ** 2, axis=-1, keepdims=True)
        xn = (x - mu) * lax.rsqrt(var + eps)
        xn = xn * g_ref[...] + beta_ref[...]
        qkv = jnp.dot(xn.astype(jnp.bfloat16), wqkv_ref[...],
                      preferred_element_type=jnp.float32) + bqkv_ref[...]
        qkv_s[...] = qkv.astype(jnp.bfloat16)

    # --- banded neighborhood attention for query rows [t*TQ, (t+1)*TQ) -------
    # NATTEN (dilation=1) window-start semantics; the union of the TQ query
    # rows' key rows always fits in BAND >= TQ + K - 1 consecutive rows.
    q0 = t * TQ
    rs_first = jnp.minimum(jnp.maximum(q0 - nb, 0), H - K)
    band_start = jnp.minimum(rs_first, H - BAND)                  # >= 0 (BAND <= H)

    q_tile = qkv_s[pl.ds(pl.multiple_of(t * M, M), M), :]             # (M, 3C) bf16
    band = qkv_s[pl.ds(pl.multiple_of(band_start * W, W), N), :]      # (N, 3C) bf16

    for h in range(nh):  # static unroll over heads
        q = q_tile[:, h * hd:(h + 1) * hd]                 # scale folded into w_qkv
        k = band[:, C + h * hd:C + (h + 1) * hd]
        v = band[:, 2 * C + h * hd:2 * C + (h + 1) * hd]

        # q @ k^T, contracting the last dim of both operands (no transpose).
        s = lax.dot_general(q, k, (((1,), (1,)), ((), ())),
                            preferred_element_type=jnp.float32)   # (M, N)
        s = s + bias_ref[0, h].astype(jnp.float32)                # f32 softmax math
        m = jnp.max(s, axis=-1, keepdims=True)
        p = jnp.exp(s - m)
        l = jnp.sum(p, axis=-1, keepdims=True)
        o = jnp.dot(p.astype(jnp.bfloat16), v,
                    preferred_element_type=jnp.float32)           # (M, hd)
        # Write each head's normalized output into the y-scratch (no concat,
        # no nh live f32 accumulators).
        y_s[:, h * hd:(h + 1) * hd] = (
            o * pl.reciprocal(l, approx=True)).astype(y_s.dtype)

    o_ref[0] = (jnp.dot(y_s[...], wp_ref[...],
                        preferred_element_type=jnp.float32)
                + bp_ref[...]).astype(o_ref.dtype)


# ----------------------------------------------------------------------------
# Tiling choices
# ----------------------------------------------------------------------------
def _choose_tq(H, W, target_m=128):
    """Smallest divisor of H with TQ*W >= target_m (MXU M fill); else H."""
    for tq in range(1, H + 1):
        if H % tq == 0 and tq * W >= target_m:
            return tq
    return H


def _choose_band(H, W, K, tq):
    """Key-band rows: >= tq+K-1, padded so band*W % 128 == 0 if that fits in H."""
    raw = min(tq + K - 1, H)
    quant = 128 // math.gcd(W, 128)          # band % quant == 0  <=>  band*W % 128 == 0
    band = -(-raw // quant) * quant
    return band if band <= H else H


# ----------------------------------------------------------------------------
# Banded bias precompute (NATTEN window-start semantics, dilation = 1).
# Computed ONCE and cached across forward calls (depends only on rpb + shapes).
#   bias[t, h, r*W + qj, b*W + kj] = rpb bias of query pixel (t*TQ + r, qj) vs
#   key pixel (band_start(t) + b, kj); -1e30 outside the K x K window.
# ----------------------------------------------------------------------------
def precompute_banded_bias(rpb, H, W, K, tq, band, neg=-1e30):
    nh = rpb.shape[0]
    nb = K // 2
    n_tiles = H // tq

    qi_all = jnp.arange(H)
    row_start = jnp.clip(qi_all - nb, 0, H - K)                   # (H,)

    tt = jnp.arange(n_tiles)
    q0 = tt * tq
    rs_first = jnp.clip(q0 - nb, 0, H - K)
    band_start = jnp.minimum(rs_first, H - band)                  # (n_tiles,)

    ki = band_start[:, None] + jnp.arange(band)[None, :]          # (nt, band)
    qi = q0[:, None] + jnp.arange(tq)[None, :]                    # (nt, tq)
    rs_q = row_start[qi]                                          # (nt, tq)

    in_h = ((ki[:, None, :] >= rs_q[:, :, None]) &
            (ki[:, None, :] < rs_q[:, :, None] + K))              # (nt, tq, band)
    rel_h = jnp.clip(ki[:, None, :] - qi[:, :, None] + (K - 1), 0, 2 * K - 2)

    qj = jnp.arange(W)
    kj = jnp.arange(W)
    col_start = jnp.clip(qj - nb, 0, W - K)
    in_w = ((kj[None, :] >= col_start[:, None]) &
            (kj[None, :] < col_start[:, None] + K))               # (W, W)
    rel_w = jnp.clip(kj[None, :] - qj[:, None] + (K - 1), 0, 2 * K - 2)

    # vals[h, t, r, b, qj, kj] = rpb[h, rel_h[t,r,b], rel_w[qj,kj]]
    vals = rpb[:, rel_h[:, :, :, None, None], rel_w[None, None, None, :, :]]
    mask = in_h[:, :, :, None, None] & in_w[None, None, None, :, :]
    bias = jnp.where(mask[None], vals, neg)                       # (nh,nt,tq,band,W,W)
    bias = bias.transpose(1, 0, 2, 4, 3, 5).reshape(n_tiles, nh, tq * W, band * W)
    return bias.astype(jnp.bfloat16)                              # bf16 streamed input


# ----------------------------------------------------------------------------
# Parameter init (deterministic, synthetic) + one-time kernel-param prep
# ----------------------------------------------------------------------------
def init_params(key, dim, num_heads, kernel_size):
    k1, k2, k3, k4, k5 = jax.random.split(key, 5)
    return {
        "ln_g": jnp.ones((1, dim), jnp.float32),
        "ln_b": jnp.zeros((1, dim), jnp.float32),
        "w_qkv": 0.02 * jax.random.normal(k1, (dim, 3 * dim), jnp.float32),
        "b_qkv": 0.02 * jax.random.normal(k2, (1, 3 * dim), jnp.float32),
        "rpb": 0.02
        * jax.random.truncated_normal(
            k3, -2.0, 2.0, (num_heads, 2 * kernel_size - 1, 2 * kernel_size - 1)
        ).astype(jnp.float32),
        "w_proj": 0.02 * jax.random.normal(k4, (dim, dim), jnp.float32),
        "b_proj": 0.02 * jax.random.normal(k5, (1, dim), jnp.float32),
    }


def prepare_kernel_params(params, H, W, *, num_heads, kernel_size, target_m=128):
    """One-time transform of module parameters into kernel-ready arrays."""
    C = params["w_qkv"].shape[0]
    hd = C // num_heads
    scale = hd ** (-0.5)
    tq = _choose_tq(H, W, target_m)
    band = _choose_band(H, W, kernel_size, tq)

    # Fold the qk scale into the q-columns of w_qkv / b_qkv (one-time).
    wq = params["w_qkv"]
    wq = jnp.concatenate([wq[:, :C] * scale, wq[:, C:]], axis=1)
    bq = params["b_qkv"]
    bq = jnp.concatenate([bq[:, :C] * scale, bq[:, C:]], axis=1)

    arrays = {
        "ln_g": params["ln_g"].astype(jnp.float32),
        "ln_b": params["ln_b"].astype(jnp.float32),
        "w_qkv": wq.astype(jnp.bfloat16),
        "b_qkv": bq.astype(jnp.float32),
        "bias": precompute_banded_bias(params["rpb"], H, W, kernel_size, tq, band),
        "w_proj": params["w_proj"].astype(jnp.bfloat16),
        "b_proj": params["b_proj"].astype(jnp.float32),
    }
    return arrays, tq, band


# ----------------------------------------------------------------------------
# Forward
# ----------------------------------------------------------------------------
def neighborhood_attention_2d(prep, x, *, num_heads, kernel_size, tq, band,
                              dilation=1):
    B, H, W, C = x.shape
    hd = C // num_heads
    K = kernel_size
    HW = H * W
    M = tq * W
    N = band * W
    n_tiles = H // tq

    assert dilation == 1, "only dilation=1 implemented"
    # TODO(synk): padding path (H or W < window_size) and dilation > 1 not implemented.
    assert H >= K and W >= K
    assert H % tq == 0 and band <= H
    assert W % 8 == 0, "sublane-aligned row slices require W % 8 == 0"

    x2 = x.reshape(B, HW, C).astype(jnp.bfloat16)   # bf16 input; LN stats in f32

    kern = functools.partial(
        _fused_na2d_kernel, H=H, W=W, nh=num_heads, hd=hd, K=K,
        TQ=tq, BAND=band, eps=1e-5)

    # TODO(synk): mark the grid-invariant weight specs pipeline_mode=pl.Buffered(1)
    # (single-buffered) to save one weight copy of VMEM on v7x.
    out = pl.pallas_call(
        kern,
        out_shape=jax.ShapeDtypeStruct((B, HW, C), jnp.float32),
        grid=(B, n_tiles),
        in_specs=[
            pl.BlockSpec((1, HW, C), lambda b, t: (b, 0, 0)),              # x (bf16)
            pl.BlockSpec((1, C), lambda b, t: (0, 0)),                     # ln gamma
            pl.BlockSpec((1, C), lambda b, t: (0, 0)),                     # ln beta
            pl.BlockSpec((C, 3 * C), lambda b, t: (0, 0)),                 # w_qkv bf16 (q scaled)
            pl.BlockSpec((1, 3 * C), lambda b, t: (0, 0)),                 # b_qkv f32
            pl.BlockSpec((1, num_heads, M, N), lambda b, t: (t, 0, 0, 0)), # banded bias bf16
            pl.BlockSpec((C, C), lambda b, t: (0, 0)),                     # w_proj bf16
            pl.BlockSpec((1, C), lambda b, t: (0, 0)),                     # b_proj f32
        ],
        out_specs=pl.BlockSpec((1, M, C), lambda b, t: (b, t, 0)),
        scratch_shapes=[pltpu.VMEM((HW, 3 * C), jnp.bfloat16),   # QKV, per batch elem
                        pltpu.VMEM((M, C), jnp.bfloat16)],       # per-step attn output
        compiler_params=pltpu.CompilerParams(
            # Row-tile axis must stay "arbitrary": step t==0 populates the QKV
            # scratch used by the remaining tiles of the same batch element.
            dimension_semantics=("parallel", "arbitrary"),
            # Raise to 64-96 MiB for production shapes on 128-MiB parts; keep
            # below ~56 MiB on v7x.
            vmem_limit_bytes=48 * 1024 * 1024,
        ),
    )(x2, prep["ln_g"], prep["ln_b"], prep["w_qkv"], prep["b_qkv"],
      prep["bias"], prep["w_proj"], prep["b_proj"])
    return out.reshape(B, H, W, C)


# ----------------------------------------------------------------------------
# Pure-JAX f32 reference (dense masked attention) for correctness checking.
# ----------------------------------------------------------------------------
def _dense_neighborhood_bias(rpb, H, W, kernel_size, neg=-1e30):
    K = kernel_size
    nb = K // 2

    def axis(L):
        i = jnp.arange(L)
        start = jnp.minimum(jnp.maximum(i - nb, 0), L - K)
        j = jnp.arange(L)
        in_win = (j[None, :] >= start[:, None]) & (j[None, :] < start[:, None] + K)
        rel = jnp.clip(j[None, :] - i[:, None] + (K - 1), 0, 2 * K - 2)
        return in_win, rel

    in_h, rel_h = axis(H)
    in_w, rel_w = axis(W)
    mask = in_h[:, None, :, None] & in_w[None, :, None, :]
    rh = jnp.broadcast_to(rel_h[:, None, :, None], (H, W, H, W))
    rw = jnp.broadcast_to(rel_w[None, :, None, :], (H, W, H, W))
    vals = rpb[:, rh, rw]
    bias = jnp.where(mask[None], vals, neg)
    return bias.reshape(rpb.shape[0], H * W, H * W)


def reference_forward(params, x, *, num_heads, kernel_size):
    B, H, W, C = x.shape
    HW = H * W
    hd = C // num_heads
    scale = hd ** (-0.5)
    xf = x.reshape(B, HW, C).astype(jnp.float32)
    mean = xf.mean(-1, keepdims=True)
    var = ((xf - mean) ** 2).mean(-1, keepdims=True)
    xn = (xf - mean) / jnp.sqrt(var + 1e-5) * params["ln_g"] + params["ln_b"]
    qkv = xn @ params["w_qkv"] + params["b_qkv"]
    qkv = qkv.reshape(B, HW, 3, num_heads, hd).transpose(2, 0, 3, 1, 4)
    q, k, v = qkv[0], qkv[1], qkv[2]
    bias = _dense_neighborhood_bias(params["rpb"], H, W, kernel_size)
    s = jnp.einsum("bhqd,bhkd->bhqk", q, k) * scale + bias[None]
    p = jax.nn.softmax(s, axis=-1)
    o = jnp.einsum("bhqk,bhkd->bhqd", p, v)
    o = o.transpose(0, 2, 1, 3).reshape(B, HW, C)
    out = o @ params["w_proj"] + params["b_proj"]
    return out.reshape(B, H, W, C)


if __name__ == "__main__":
    def run_case(B, H, W, dim, num_heads, kernel_size, seed):
        key = jax.random.PRNGKey(seed)
        kx, kp = jax.random.split(key)
        x = jax.random.normal(kx, (B, H, W, dim), jnp.float32)
        params = init_params(kp, dim, num_heads, kernel_size)

        # Built once and cached across forward calls.
        prep, tq, band = prepare_kernel_params(
            params, H, W, num_heads=num_heads, kernel_size=kernel_size)

        fwd = jax.jit(functools.partial(
            neighborhood_attention_2d, num_heads=num_heads,
            kernel_size=kernel_size, tq=tq, band=band))
        out = jax.block_until_ready(fwd(prep, x))

        ref = reference_forward(params, x, num_heads=num_heads,
                                kernel_size=kernel_size)
        assert out.shape == (B, H, W, dim)
        # bf16 MXU operands / bf16 QKV + bias + approx reciprocal vs f32 reference.
        err = float(jnp.max(jnp.abs(out - ref)))
        assert jnp.allclose(out, ref, atol=1e-2, rtol=5e-2), err

    run_case(2, 16, 16, 32, 4, 5, seed=0)   # band == H (single full-height band)
    run_case(1, 24, 16, 32, 4, 5, seed=1)   # band < H  (true banded path, clamped starts)
    print("KERNEL_OK")
</pallas_src>

<mosaic_0001>
module attributes {stable_mosaic.version = 11 : i64} {
  func.func @_fused_na2d_kernel(%arg0: i32, %arg1: i32, %arg2: memref<1x256x32xbf16, #tpu.memory_space<vmem>>, %arg3: memref<1x32xf32, #tpu.memory_space<vmem>>, %arg4: memref<1x32xf32, #tpu.memory_space<vmem>>, %arg5: memref<32x96xbf16, #tpu.memory_space<vmem>>, %arg6: memref<1x96xf32, #tpu.memory_space<vmem>>, %arg7: memref<1x4x128x256xbf16, #tpu.memory_space<vmem>>, %arg8: memref<32x32xbf16, #tpu.memory_space<vmem>>, %arg9: memref<1x32xf32, #tpu.memory_space<vmem>>, %arg10: memref<1x128x32xf32, #tpu.memory_space<vmem>>, %arg11: memref<256x96xbf16, #tpu.memory_space<vmem>>, %arg12: memref<128x32xbf16, #tpu.memory_space<vmem>>) attributes {dimension_semantics = [#tpu.dimension_semantics<parallel>, #tpu.dimension_semantics<arbitrary>], iteration_bounds = array<i64: 2, 2>, scalar_prefetch = 0 : i64, scratch_operands = 2 : i64, tpu.core_type = #tpu.core_type<tc>, window_params = [{transform_indices = @transform_0, window_bounds = array<i64: 1, 256, 32>}, {pipeline_mode = #tpu.pipeline_mode<synchronous>, transform_indices = @transform_1, window_bounds = array<i64: 1, 32>}, {pipeline_mode = #tpu.pipeline_mode<synchronous>, transform_indices = @transform_2, window_bounds = array<i64: 1, 32>}, {pipeline_mode = #tpu.pipeline_mode<synchronous>, transform_indices = @transform_3, window_bounds = array<i64: 32, 96>}, {pipeline_mode = #tpu.pipeline_mode<synchronous>, transform_indices = @transform_4, window_bounds = array<i64: 1, 96>}, {transform_indices = @transform_5, window_bounds = array<i64: 1, 4, 128, 256>}, {pipeline_mode = #tpu.pipeline_mode<synchronous>, transform_indices = @transform_6, window_bounds = array<i64: 32, 32>}, {pipeline_mode = #tpu.pipeline_mode<synchronous>, transform_indices = @transform_7, window_bounds = array<i64: 1, 32>}, {transform_indices = @transform_8, window_bounds = array<i64: 1, 128, 32>}]} {
    %c0_i32 = arith.constant 0 : i32
    %0 = arith.cmpi eq, %arg1, %c0_i32 : i32
    %1 = arith.extui %0 : i1 to i32
    %c0_i32_0 = arith.constant 0 : i32
    %2 = arith.cmpi ne, %1, %c0_i32_0 : i32
    scf.if %2 {
      %c0_47 = arith.constant 0 : index
      %c0_48 = arith.constant 0 : index
      %c0_49 = arith.constant 0 : index
      %113 = vector.load %arg2[%c0_47, %c0_48, %c0_49] : memref<1x256x32xbf16, #tpu.memory_space<vmem>>, vector<1x256x32xbf16>
      %114 = vector.shape_cast %113 : vector<1x256x32xbf16> to vector<256x32xbf16>
      %115 = arith.extf %114 : vector<256x32xbf16> to vector<256x32xf32>
      %cst_50 = arith.constant dense<0.000000e+00> : vector<256xf32>
      %116 = vector.multi_reduction <add>, %115, %cst_50 [1] : vector<256x32xf32> to vector<256xf32>
      %117 = vector.shape_cast %116 : vector<256xf32> to vector<256x1xf32>
      %cst_51 = arith.constant 3.200000e+01 : f32
      %118 = vector.broadcast %cst_51 : f32 to vector<256x1xf32>
      %119 = arith.divf %117, %118 : vector<256x1xf32>
      %120 = vector.broadcast %119 : vector<256x1xf32> to vector<256x32xf32>
      %121 = arith.subf %115, %120 : vector<256x32xf32>
      %122 = arith.mulf %121, %121 : vector<256x32xf32>
      %cst_52 = arith.constant dense<0.000000e+00> : vector<256xf32>
      %123 = vector.multi_reduction <add>, %122, %cst_52 [1] : vector<256x32xf32> to vector<256xf32>
      %124 = vector.shape_cast %123 : vector<256xf32> to vector<256x1xf32>
      %cst_53 = arith.constant 3.200000e+01 : f32
      %125 = vector.broadcast %cst_53 : f32 to vector<256x1xf32>
      %126 = arith.divf %124, %125 : vector<256x1xf32>
      %127 = vector.broadcast %119 : vector<256x1xf32> to vector<256x32xf32>
      %128 = arith.subf %115, %127 : vector<256x32xf32>
      %cst_54 = arith.constant 9.99999974E-6 : f32
      %129 = vector.broadcast %cst_54 : f32 to vector<256x1xf32>
      %130 = arith.addf %126, %129 : vector<256x1xf32>
      %131 = math.rsqrt %130 : vector<256x1xf32>
      %132 = vector.broadcast %131 : vector<256x1xf32> to vector<256x32xf32>
      %133 = arith.mulf %128, %132 : vector<256x32xf32>
      %c0_55 = arith.constant 0 : index
      %c0_56 = arith.constant 0 : index
      %134 = vector.load %arg3[%c0_55, %c0_56] : memref<1x32xf32, #tpu.memory_space<vmem>>, vector<1x32xf32>
      %135 = vector.broadcast %134 : vector<1x32xf32> to vector<256x32xf32>
      %136 = arith.mulf %133, %135 : vector<256x32xf32>
      %c0_57 = arith.constant 0 : index
      %c0_58 = arith.constant 0 : index
      %137 = vector.load %arg4[%c0_57, %c0_58] : memref<1x32xf32, #tpu.memory_space<vmem>>, vector<1x32xf32>
      %138 = vector.broadcast %137 : vector<1x32xf32> to vector<256x32xf32>
      %139 = arith.addf %136, %138 : vector<256x32xf32>
      %140 = arith.truncf %139 : vector<256x32xf32> to vector<256x32xbf16>
      %c0_59 = arith.constant 0 : index
      %c0_60 = arith.constant 0 : index
      %141 = vector.load %arg5[%c0_59, %c0_60] : memref<32x96xbf16, #tpu.memory_space<vmem>>, vector<32x96xbf16>
      %cst_61 = arith.constant dense<0.000000e+00> : vector<256x96xf32>
      %142 = tpu.matmul %140, %141, %cst_61 {dimension_numbers = #tpu.dot_dimension_numbers<[1], [0], [0], [1], [0, 0, 1, 1], [], []>} : vector<256x32xbf16>, vector<32x96xbf16>, vector<256x96xf32> -> vector<256x96xf32>
      %c0_62 = arith.constant 0 : index
      %c0_63 = arith.constant 0 : index
      %143 = vector.load %arg6[%c0_62, %c0_63] : memref<1x96xf32, #tpu.memory_space<vmem>>, vector<1x96xf32>
      %144 = vector.broadcast %143 : vector<1x96xf32> to vector<256x96xf32>
      %145 = arith.addf %142, %144 : vector<256x96xf32>
      %146 = arith.truncf %145 : vector<256x96xf32> to vector<256x96xbf16>
      %c0_64 = arith.constant 0 : index
      %c0_65 = arith.constant 0 : index
      %147 = vector.load %arg11[%c0_64, %c0_65] : memref<256x96xbf16, #tpu.memory_space<vmem>>, vector<256x96xbf16>
      tpu.vector_store %arg11[%c0_64, %c0_65], %146 {strides = array<i32>} : memref<256x96xbf16, #tpu.memory_space<vmem>>, vector<256x96xbf16>,
    } else {
    }
    %c8_i32 = arith.constant 8 : i32
    %3 = arith.muli %arg1, %c8_i32 : i32
    %c2_i32 = arith.constant 2 : i32
    %4 = arith.subi %3, %c2_i32 : i32
    %c0_i32_1 = arith.constant 0 : i32
    %5 = arith.maxsi %4, %c0_i32_1 : i32
    %c11_i32 = arith.constant 11 : i32
    %6 = arith.minsi %5, %c11_i32 : i32
    %c0_i32_2 = arith.constant 0 : i32
    %7 = arith.minsi %6, %c0_i32_2 : i32
    %c128_i32 = arith.constant 128 : i32
    %8 = arith.muli %arg1, %c128_i32 : i32
    %9 = tpu.assume_multiple %8, 128 : i32
    %10 = arith.index_cast %9 : i32 to index
    %c0 = arith.constant 0 : index
    %11 = vector.load %arg11[%10, %c0] : memref<256x96xbf16, #tpu.memory_space<vmem>>, vector<128x96xbf16>
    %c16_i32 = arith.constant 16 : i32
    %12 = arith.muli %7, %c16_i32 : i32
    %13 = tpu.assume_multiple %12, 16 : i32
    %14 = arith.index_cast %13 : i32 to index
    %c0_3 = arith.constant 0 : index
    %15 = vector.load %arg11[%14, %c0_3] : memref<256x96xbf16, #tpu.memory_space<vmem>>, vector<256x96xbf16>
    %16 = vector.extract_strided_slice %11 {offsets = [0, 0], sizes = [128, 8], strides = [1, 1]} : vector<128x96xbf16> to vector<128x8xbf16>
    %17 = vector.extract_strided_slice %15 {offsets = [0, 32], sizes = [256, 8], strides = [1, 1]} : vector<256x96xbf16> to vector<256x8xbf16>
    %18 = vector.extract_strided_slice %15 {offsets = [0, 64], sizes = [256, 8], strides = [1, 1]} : vector<256x96xbf16> to vector<256x8xbf16>
    %cst = arith.constant dense<0.000000e+00> : vector<128x256xf32>
    %19 = tpu.matmul %16, %17, %cst {dimension_numbers = #tpu.dot_dimension_numbers<[1], [1], [0], [0], [0, 0, 1, 0], [], []>} : vector<128x8xbf16>, vector<256x8xbf16>, vector<128x256xf32> -> vector<128x256xf32>
    %c0_4 = arith.constant 0 : index
    %c0_5 = arith.constant 0 : index
    %c0_6 = arith.constant 0 : index
    %c0_7 = arith.constant 0 : index
    %20 = vector.load %arg7[%c0_4, %c0_5, %c0_6, %c0_7] : memref<1x4x128x256xbf16, #tpu.memory_space<vmem>>, vector<1x1x128x256xbf16>
    %21 = vector.shape_cast %20 : vector<1x1x128x256xbf16> to vector<128x256xbf16>
    %22 = arith.extf %21 : vector<128x256xbf16> to vector<128x256xf32>
    %23 = arith.addf %19, %22 : vector<128x256xf32>
    %cst_8 = arith.constant dense<0xFF800000> : vector<128xf32>
    %24 = vector.multi_reduction <maximumf>, %23, %cst_8 [1] : vector<128x256xf32> to vector<128xf32>
    %25 = vector.shape_cast %24 : vector<128xf32> to vector<128x1xf32>
    %26 = vector.broadcast %25 : vector<128x1xf32> to vector<128x256xf32>
    %27 = arith.subf %23, %26 : vector<128x256xf32>
    %28 = math.exp %27 : vector<128x256xf32>
    %cst_9 = arith.constant dense<0.000000e+00> : vector<128xf32>
    %29 = vector.multi_reduction <add>, %28, %cst_9 [1] : vector<128x256xf32> to vector<128xf32>
    %30 = vector.shape_cast %29 : vector<128xf32> to vector<128x1xf32>
    %31 = arith.truncf %28 : vector<128x256xf32> to vector<128x256xbf16>
    %cst_10 = arith.constant dense<0.000000e+00> : vector<128x8xf32>
    %32 = tpu.matmul %31, %18, %cst_10 {dimension_numbers = #tpu.dot_dimension_numbers<[1], [0], [0], [1], [0, 0, 1, 1], [], []>} : vector<128x256xbf16>, vector<256x8xbf16>, vector<128x8xf32> -> vector<128x8xf32>
    %33 = tpu.reciprocal %30 {approx = true} : vector<128x1xf32> -> vector<128x1xf32>
    %34 = vector.broadcast %33 : vector<128x1xf32> to vector<128x8xf32>
    %35 = arith.mulf %32, %34 : vector<128x8xf32>
    %36 = arith.truncf %35 : vector<128x8xf32> to vector<128x8xbf16>
    %c0_11 = arith.constant 0 : index
    %c0_12 = arith.constant 0 : index
    %37 = vector.load %arg12[%c0_11, %c0_12] : memref<128x32xbf16, #tpu.memory_space<vmem>>, vector<128x8xbf16>
    tpu.vector_store %arg12[%c0_11, %c0_12], %36 {strides = array<i32>} : memref<128x32xbf16, #tpu.memory_space<vmem>>, vector<128x8xbf16>,
    %38 = vector.extract_strided_slice %11 {offsets = [0, 8], sizes = [128, 8], strides = [1, 1]} : vector<128x96xbf16> to vector<128x8xbf16>
    %39 = vector.extract_strided_slice %15 {offsets = [0, 40], sizes = [256, 8], strides = [1, 1]} : vector<256x96xbf16> to vector<256x8xbf16>
    %40 = vector.extract_strided_slice %15 {offsets = [0, 72], sizes = [256, 8], strides = [1, 1]} : vector<256x96xbf16> to vector<256x8xbf16>
    %cst_13 = arith.constant dense<0.000000e+00> : vector<128x256xf32>
    %41 = tpu.matmul %38, %39, %cst_13 {dimension_numbers = #tpu.dot_dimension_numbers<[1], [1], [0], [0], [0, 0, 1, 0], [], []>} : vector<128x8xbf16>, vector<256x8xbf16>, vector<128x256xf32> -> vector<128x256xf32>
    %c0_14 = arith.constant 0 : index
    %c1 = arith.constant 1 : index
    %c0_15 = arith.constant 0 : index
    %c0_16 = arith.constant 0 : index
    %42 = vector.load %arg7[%c0_14, %c1, %c0_15, %c0_16] : memref<1x4x128x256xbf16, #tpu.memory_space<vmem>>, vector<1x1x128x256xbf16>
    %43 = vector.shape_cast %42 : vector<1x1x128x256xbf16> to vector<128x256xbf16>
    %44 = arith.extf %43 : vector<128x256xbf16> to vector<128x256xf32>
    %45 = arith.addf %41, %44 : vector<128x256xf32>
    %cst_17 = arith.constant dense<0xFF800000> : vector<128xf32>
    %46 = vector.multi_reduction <maximumf>, %45, %cst_17 [1] : vector<128x256xf32> to vector<128xf32>
    %47 = vector.shape_cast %46 : vector<128xf32> to vector<128x1xf32>
    %48 = vector.broadcast %47 : vector<128x1xf32> to vector<128x256xf32>
    %49 = arith.subf %45, %48 : vector<128x256xf32>
    %50 = math.exp %49 : vector<128x256xf32>
    %cst_18 = arith.constant dense<0.000000e+00> : vector<128xf32>
    %51 = vector.multi_reduction <add>, %50, %cst_18 [1] : vector<128x256xf32> to vector<128xf32>
    %52 = vector.shape_cast %51 : vector<128xf32> to vector<128x1xf32>
    %53 = arith.truncf %50 : vector<128x256xf32> to vector<128x256xbf16>
    %cst_19 = arith.constant dense<0.000000e+00> : vector<128x8xf32>
    %54 = tpu.matmul %53, %40, %cst_19 {dimension_numbers = #tpu.dot_dimension_numbers<[1], [0], [0], [1], [0, 0, 1, 1], [], []>} : vector<128x256xbf16>, vector<256x8xbf16>, vector<128x8xf32> -> vector<128x8xf32>
    %55 = tpu.reciprocal %52 {approx = true} : vector<128x1xf32> -> vector<128x1xf32>
    %56 = vector.broadcast %55 : vector<128x1xf32> to vector<128x8xf32>
    %57 = arith.mulf %54, %56 : vector<128x8xf32>
    %58 = arith.truncf %57 : vector<128x8xf32> to vector<128x8xbf16>
    %c0_20 = arith.constant 0 : index
    %c8 = arith.constant 8 : index
    %59 = vector.load %arg12[%c0_20, %c8] : memref<128x32xbf16, #tpu.memory_space<vmem>>, vector<128x8xbf16>
    tpu.vector_store %arg12[%c0_20, %c8], %58 {strides = array<i32>} : memref<128x32xbf16, #tpu.memory_space<vmem>>, vector<128x8xbf16>,
    %60 = vector.extract_strided_slice %11 {offsets = [0, 16], sizes = [128, 8], strides = [1, 1]} : vector<128x96xbf16> to vector<128x8xbf16>
    %61 = vector.extract_strided_slice %15 {offsets = [0, 48], sizes = [256, 8], strides = [1, 1]} : vector<256x96xbf16> to vector<256x8xbf16>
    %62 = vector.extract_strided_slice %15 {offsets = [0, 80], sizes = [256, 8], strides = [1, 1]} : vector<256x96xbf16> to vector<256x8xbf16>
    %cst_21 = arith.constant dense<0.000000e+00> : vector<128x256xf32>
    %63 = tpu.matmul %60, %61, %cst_21 {dimension_numbers = #tpu.dot_dimension_numbers<[1], [1], [0], [0], [0, 0, 1, 0], [], []>} : vector<128x8xbf16>, vector<256x8xbf16>, vector<128x256xf32> -> vector<128x256xf32>
    %c0_22 = arith.constant 0 : index
    %c2 = arith.constant 2 : index
    %c0_23 = arith.constant 0 : index
    %c0_24 = arith.constant 0 : index
    %64 = vector.load %arg7[%c0_22, %c2, %c0_23, %c0_24] : memref<1x4x128x256xbf16, #tpu.memory_space<vmem>>, vector<1x1x128x256xbf16>
    %65 = vector.shape_cast %64 : vector<1x1x128x256xbf16> to vector<128x256xbf16>
    %66 = arith.extf %65 : vector<128x256xbf16> to vector<128x256xf32>
    %67 = arith.addf %63, %66 : vector<128x256xf32>
    %cst_25 = arith.constant dense<0xFF800000> : vector<128xf32>
    %68 = vector.multi_reduction <maximumf>, %67, %cst_25 [1] : vector<128x256xf32> to vector<128xf32>
    %69 = vector.shape_cast %68 : vector<128xf32> to vector<128x1xf32>
    %70 = vector.broadcast %69 : vector<128x1xf32> to vector<128x256xf32>
    %71 = arith.subf %67, %70 : vector<128x256xf32>
    %72 = math.exp %71 : vector<128x256xf32>
    %cst_26 = arith.constant dense<0.000000e+00> : vector<128xf32>
    %73 = vector.multi_reduction <add>, %72, %cst_26 [1] : vector<128x256xf32> to vector<128xf32>
    %74 = vector.shape_cast %73 : vector<128xf32> to vector<128x1xf32>
    %75 = arith.truncf %72 : vector<128x256xf32> to vector<128x256xbf16>
    %cst_27 = arith.constant dense<0.000000e+00> : vector<128x8xf32>
    %76 = tpu.matmul %75, %62, %cst_27 {dimension_numbers = #tpu.dot_dimension_numbers<[1], [0], [0], [1], [0, 0, 1, 1], [], []>} : vector<128x256xbf16>, vector<256x8xbf16>, vector<128x8xf32> -> vector<128x8xf32>
    %77 = tpu.reciprocal %74 {approx = true} : vector<128x1xf32> -> vector<128x1xf32>
    %78 = vector.broadcast %77 : vector<128x1xf32> to vector<128x8xf32>
    %79 = arith.mulf %76, %78 : vector<128x8xf32>
    %80 = arith.truncf %79 : vector<128x8xf32> to vector<128x8xbf16>
    %c0_28 = arith.constant 0 : index
    %c16 = arith.constant 16 : index
    %81 = vector.load %arg12[%c0_28, %c16] : memref<128x32xbf16, #tpu.memory_space<vmem>>, vector<128x8xbf16>
    tpu.vector_store %arg12[%c0_28, %c16], %80 {strides = array<i32>} : memref<128x32xbf16, #tpu.memory_space<vmem>>, vector<128x8xbf16>,
    %82 = vector.extract_strided_slice %11 {offsets = [0, 24], sizes = [128, 8], strides = [1, 1]} : vector<128x96xbf16> to vector<128x8xbf16>
    %83 = vector.extract_strided_slice %15 {offsets = [0, 56], sizes = [256, 8], strides = [1, 1]} : vector<256x96xbf16> to vector<256x8xbf16>
    %84 = vector.extract_strided_slice %15 {offsets = [0, 88], sizes = [256, 8], strides = [1, 1]} : vector<256x96xbf16> to vector<256x8xbf16>
    %cst_29 = arith.constant dense<0.000000e+00> : vector<128x256xf32>
    %85 = tpu.matmul %82, %83, %cst_29 {dimension_numbers = #tpu.dot_dimension_numbers<[1], [1], [0], [0], [0, 0, 1, 0], [], []>} : vector<128x8xbf16>, vector<256x8xbf16>, vector<128x256xf32> -> vector<128x256xf32>
    %c0_30 = arith.constant 0 : index
    %c3 = arith.constant 3 : index
    %c0_31 = arith.constant 0 : index
    %c0_32 = arith.constant 0 : index
    %86 = vector.load %arg7[%c0_30, %c3, %c0_31, %c0_32] : memref<1x4x128x256xbf16, #tpu.memory_space<vmem>>, vector<1x1x128x256xbf16>
    %87 = vector.shape_cast %86 : vector<1x1x128x256xbf16> to vector<128x256xbf16>
    %88 = arith.extf %87 : vector<128x256xbf16> to vector<128x256xf32>
    %89 = arith.addf %85, %88 : vector<128x256xf32>
    %cst_33 = arith.constant dense<0xFF800000> : vector<128xf32>
    %90 = vector.multi_reduction <maximumf>, %89, %cst_33 [1] : vector<128x256xf32> to vector<128xf32>
    %91 = vector.shape_cast %90 : vector<128xf32> to vector<128x1xf32>
    %92 = vector.broadcast %91 : vector<128x1xf32> to vector<128x256xf32>
    %93 = arith.subf %89, %92 : vector<128x256xf32>
    %94 = math.exp %93 : vector<128x256xf32>
    %cst_34 = arith.constant dense<0.000000e+00> : vector<128xf32>
    %95 = vector.multi_reduction <add>, %94, %cst_34 [1] : vector<128x256xf32> to vector<128xf32>
    %96 = vector.shape_cast %95 : vector<128xf32> to vector<128x1xf32>
    %97 = arith.truncf %94 : vector<128x256xf32> to vector<128x256xbf16>
    %cst_35 = arith.constant dense<0.000000e+00> : vector<128x8xf32>
    %98 = tpu.matmul %97, %84, %cst_35 {dimension_numbers = #tpu.dot_dimension_numbers<[1], [0], [0], [1], [0, 0, 1, 1], [], []>} : vector<128x256xbf16>, vector<256x8xbf16>, vector<128x8xf32> -> vector<128x8xf32>
    %99 = tpu.reciprocal %96 {approx = true} : vector<128x1xf32> -> vector<128x1xf32>
    %100 = vector.broadcast %99 : vector<128x1xf32> to vector<128x8xf32>
    %101 = arith.mulf %98, %100 : vector<128x8xf32>
    %102 = arith.truncf %101 : vector<128x8xf32> to vector<128x8xbf16>
    %c0_36 = arith.constant 0 : index
    %c24 = arith.constant 24 : index
    %103 = vector.load %arg12[%c0_36, %c24] : memref<128x32xbf16, #tpu.memory_space<vmem>>, vector<128x8xbf16>
    tpu.vector_store %arg12[%c0_36, %c24], %102 {strides = array<i32>} : memref<128x32xbf16, #tpu.memory_space<vmem>>, vector<128x8xbf16>,
    %c0_37 = arith.constant 0 : index
    %c0_38 = arith.constant 0 : index
    %104 = vector.load %arg12[%c0_37, %c0_38] : memref<128x32xbf16, #tpu.memory_space<vmem>>, vector<128x32xbf16>
    %c0_39 = arith.constant 0 : index
    %c0_40 = arith.constant 0 : index
    %105 = vector.load %arg8[%c0_39, %c0_40] : memref<32x32xbf16, #tpu.memory_space<vmem>>, vector<32x32xbf16>
    %cst_41 = arith.constant dense<0.000000e+00> : vector<128x32xf32>
    %106 = tpu.matmul %104, %105, %cst_41 {dimension_numbers = #tpu.dot_dimension_numbers<[1], [0], [0], [1], [0, 0, 1, 1], [], []>} : vector<128x32xbf16>, vector<32x32xbf16>, vector<128x32xf32> -> vector<128x32xf32>
    %c0_42 = arith.constant 0 : index
    %c0_43 = arith.constant 0 : index
    %107 = vector.load %arg9[%c0_42, %c0_43] : memref<1x32xf32, #tpu.memory_space<vmem>>, vector<1x32xf32>
    %108 = vector.broadcast %107 : vector<1x32xf32> to vector<128x32xf32>
    %109 = arith.addf %106, %108 : vector<128x32xf32>
    %c0_44 = arith.constant 0 : index
    %c0_45 = arith.constant 0 : index
    %c0_46 = arith.constant 0 : index
    %110 = vector.load %arg10[%c0_44, %c0_45, %c0_46] : memref<1x128x32xf32, #tpu.memory_space<vmem>>, vector<1x128x32xf32>
    %111 = vector.shape_cast %110 : vector<1x128x32xf32> to vector<128x32xf32>
    %112 = vector.shape_cast %109 : vector<128x32xf32> to vector<1x128x32xf32>
    tpu.vector_store %arg10[%c0_44, %c0_45, %c0_46], %112 {strides = array<i32>} : memref<1x128x32xf32, #tpu.memory_space<vmem>>, vector<1x128x32xf32>,
    return
  }
  func.func @transform_0(%arg0: i32, %arg1: i32) -> (i32, i32, i32) {
    %c0_i32 = arith.constant 0 : i32
    %c0_i32_0 = arith.constant 0 : i32
    %c0_i32_1 = arith.constant 0 : i32
    return %arg0, %c0_i32, %c0_i32_0 : i32, i32, i32
  }
  func.func @transform_1(%arg0: i32, %arg1: i32) -> (i32, i32) {
    %c0_i32 = arith.constant 0 : i32
    %c0_i32_0 = arith.constant 0 : i32
    %c0_i32_1 = arith.constant 0 : i32
    return %c0_i32, %c0_i32_0 : i32, i32
  }
  func.func @transform_2(%arg0: i32, %arg1: i32) -> (i32, i32) {
    %c0_i32 = arith.constant 0 : i32
    %c0_i32_0 = arith.constant 0 : i32
    %c0_i32_1 = arith.constant 0 : i32
    return %c0_i32, %c0_i32_0 : i32, i32
  }
  func.func @transform_3(%arg0: i32, %arg1: i32) -> (i32, i32) {
    %c0_i32 = arith.constant 0 : i32
    %c0_i32_0 = arith.constant 0 : i32
    %c0_i32_1 = arith.constant 0 : i32
    return %c0_i32, %c0_i32_0 : i32, i32
  }
  func.func @transform_4(%arg0: i32, %arg1: i32) -> (i32, i32) {
    %c0_i32 = arith.constant 0 : i32
    %c0_i32_0 = arith.constant 0 : i32
    %c0_i32_1 = arith.constant 0 : i32
    return %c0_i32, %c0_i32_0 : i32, i32
  }
  func.func @transform_5(%arg0: i32, %arg1: i32) -> (i32, i32, i32, i32) {
    %c0_i32 = arith.constant 0 : i32
    %c0_i32_0 = arith.constant 0 : i32
    %c0_i32_1 = arith.constant 0 : i32
    %c0_i32_2 = arith.constant 0 : i32
    return %arg1, %c0_i32, %c0_i32_0, %c0_i32_1 : i32, i32, i32, i32
  }
  func.func @transform_6(%arg0: i32, %arg1: i32) -> (i32, i32) {
    %c0_i32 = arith.constant 0 : i32
    %c0_i32_0 = arith.constant 0 : i32
    %c0_i32_1 = arith.constant 0 : i32
    return %c0_i32, %c0_i32_0 : i32, i32
  }
  func.func @transform_7(%arg0: i32, %arg1: i32) -> (i32, i32) {
    %c0_i32 = arith.constant 0 : i32
    %c0_i32_0 = arith.constant 0 : i32
    %c0_i32_1 = arith.constant 0 : i32
    return %c0_i32, %c0_i32_0 : i32, i32
  }
  func.func @transform_8(%arg0: i32, %arg1: i32) -> (i32, i32, i32) {
    %c0_i32 = arith.constant 0 : i32
    %c0_i32_0 = arith.constant 0 : i32
    return %arg0, %arg1, %c0_i32 : i32, i32, i32
  }
}

</mosaic_0001>

<bundles_post_ra>
// kernel: neighborhood_attention_2d.1
= control target key start
LH: loop header
LB: loop body
LE: loop exit
PB: predicated region body
PF: predicated region fallthrough
CT: control target
= control target key end

     0   :  { %s8777_s0 = inlined_call_operand.vmem [shape: bf16[2,256,32], index: 0, kind: input, shape index: {}]   ;;  %s8778_s1 = inlined_call_operand.vmem [shape: f32[1,32], index: 1, kind: input, shape index: {}]   ;;  %s8779_s2 = inlined_call_operand.vmem [shape: f32[1,32], index: 2, kind: input, shape index: {}]   ;;  %s8780_s3 = inlined_call_operand.vmem [shape: bf16[32,96], index: 3, kind: input, shape index: {}]   ;;  %s8781_s4 = inlined_call_operand.vmem [shape: f32[1,96], index: 4, kind: input, shape index: {}]   ;;  %s8782_s5 = inlined_call_operand.hbm [shape: bf16[2,4,128,256], index: 5, kind: input, shape index: {}]   ;;  %s8783_s6 = inlined_call_operand.vmem [shape: bf16[32,32], index: 6, kind: input, shape index: {}]   ;;  %s8784_s7 = inlined_call_operand.vmem [shape: f32[1,32], index: 7, kind: input, shape index: {}]   ;;  %s8785_s8 = inlined_call_operand.hbm [shape: f32[2,256,32], index: 8, kind: output, shape index: {}]  }
   0x1   :  { %8819 = sst [smem:[#allocation97_spill]] %s8785_s8 }
   0x2   :  { %13 = vsyncpa [#allocation5], 0 }
   0x3   :  { %15 = vsyncpa [#allocation5 + $0x1], 0 }
   0x4   :  { %16 = vsyncpa [#allocation6], 0 }
   0x5   :  { %18 = vsyncpa [#allocation6 + $0x1], 0  ;;  %s5928_s27 = smov 0   ;;  %s5930_s28 = smov 0  }
   0x6   :  { %s5932_s29 = smov 0   ;;  %s5934_s30 = smov 0  }
   0x7   :  { %s5936_s9 = smov 0   ;;  %s5938_s10 = smov 0  }
   0x8   :  { %s5940_s11 = smov 0   ;;  %s5942_s12 = smov 0  }
   0x9   :  { %s5944_s13 = smov 0   ;;  %s5946_s14 = smov 0  }
   0xa   :  { %s5948_s15 = smov 0  }
   0xb LB: > { %8820 = sst [smem:[#allocation10_spill]] %s5854_s13  ;;  %s4374_s16 = sadd.s32 4294967295, %s5862_s15   ;;  %s5862_s15 = sphi %s5948_s15, %s24_s15   ;;  %s5858_s14 = sphi %s5946_s14, %s9086_s14   ;;  %s5854_s13 = sphi %s5944_s13, %s9085_s13   ;;  %s5850_s12 = sphi %s5942_s12, %s9084_s12   ;;  %s5846_s11 = sphi %s5940_s11, %s9083_s11   ;;  %s5842_s10 = sphi %s5938_s10, %s9092_s10   ;;  %s5838_s9 = sphi %s5936_s9, %s9091_s9   ;;  %s5834_s30 = sphi %s5934_s30, %s9090_s30   ;;  %s5830_s29 = sphi %s5932_s29, %s9089_s29   ;;  %s5826_s28 = sphi %s5930_s28, %s9088_s28   ;;  %s5822_s27 = sphi %s5928_s27, %s9087_s27  }
   0xc   : > { %8821 = sst [smem:[#allocation11_spill]] %s5858_s14  ;;  %s4375_s17 = sadd.s32 4294967294, %s5862_s15  }
   0xd   : > { %s33_s18 = sadd.s32 1, %s5854_s13  ;;  %s36_s19 = sadd.s32 1, %s5858_s14 }
   0xe   : > { %p34_p0 = scmp.ge.s32.totalorder %s33_s18, 2  ;;  %s153_s20 = sadd.s32 1, %s5842_s10 }
   0xf   : > { %p160_p1 = scmp.ne.s32.totalorder %s5842_s10, %s5838_s9  ;;  %p161_p2 = scmp.eq.s32.totalorder %s5862_s15, 0 }
  0x10   : > { %s9094_s18 = smov (%p34_p0, %s33_s18), 0  ;;  %s9096_s19 = smov (!%p34_p0, %s36_s19), %s5858_s14 }
  0x11   : > { %8822 = sst [smem:[#allocation12_spill]] %s9094_s18  ;;  %s150_s21 = ssub.s32 %s5854_s13, %s9094_s18 }
  0x12   : > { %p5994_p3 = por %p161_p2, %p160_p1  ;;  %p38_p4 = scmp.ge.s32.totalorder %s9096_s19, 2 }
  0x13   : > { %p151_p5 = scmp.eq.s32.totalorder %s150_s21, 0  ;;  %p166_p6 = scmp.ne.s32.totalorder %s5838_s9, %s5834_s30 }
  0x14   : > { %p167_p7 = scmp.eq.s32.totalorder %s4374_s16, 0  ;;  %s9098_s19 = smov (%p38_p4, %s9096_s19), 0 }
  0x15   : > { %8824 = sst [smem:[#allocation13_spill]] %s9098_s19  ;;  %s218_s25 = ssub.s32 %s5858_s14, %s9098_s19 }
  0x16   : > { %s6002_s23 = scalar_select %p151_p5, %s5842_s10, %s153_s20  }
  0x17   : > { %p6004_p8 = por %p167_p7, %p166_p6  ;;  %s220_s26 = sor.u32 %s218_s25, %s150_s21 }
  0x18   : > { %8825 = sst [smem:[#allocation14_spill]] %s6002_s23  ;;  %s223_s18 = sadd.s32 1, %s5830_s29 }
  0x19   : > { %p221_p9 = scmp.eq.s32.totalorder %s220_s26, 0  ;;  %p233_p10 = scmp.ne.s32.totalorder %s5830_s29, %s5826_s28 }
  0x1a   : > { %p234_p11 = scmp.eq.s32.totalorder %s4374_s16, 3  ;;  %p239_p12 = scmp.ne.s32.totalorder %s5826_s28, %s5822_s27 }
  0x1b   : > { %s6016_s30 = scalar_select %p221_p9, %s5830_s29, %s223_s18  }
  0x1c   : > { %p6018_p13 = por %p234_p11, %p233_p10  ;;  %p240_p0 = scmp.eq.s32.totalorder %s4375_s17, 3 }
  0x1d   : > { %p5115_p1 = scmp.lt.s32.totalorder %s5862_s15, 4  ;;  %s286_s21 = sand.u32 1, %s5842_s10  }
  0x1e   : > { %s8827_s8 = scalar_select %p6018_p13, 1, 0 }
  0x1f   : > { %p6023_p2 = por %p240_p0, %p239_p12  ;;  %s4378_s25 = sshll.u32 %s286_s21, 9 }
  0x20   : > { %s4516_s26 = sshll.u32 %s5854_s13, 13  ;;  %s290_s18 = scalar_lea.vmem [#allocation4], %s4378_s25 }
  0x21   : > { %s8828_s20 = scalar_select %p6023_p2, 1, 0 }
  0x22   : > { %s6032_s16 = scalar_lea.hbm %s8782_s5, %s4516_s26  ;;  %s297_s23 = sshll.u32 %s290_s18, 4  ;;  %s6034_s23 = int_to_ptr.vmem [resolvable:$true] %s297_s23 }
  0x23   : > { %p6038_p4 = pnand %p5115_p1, %p5994_p3  ;;  %s6043_s13 = scalar_lea.sflag [#allocation5], %s286_s21 }
  0x24   : > { %s5710_s14 = scalar_lea.hbm %s6032_s16, 8192  ;;  %s5715_s22 = scalar_lea.hbm %s8782_s5, 16384 }
  0x25   : > { %p5711_p6 = scmp.ne.s32.totalorder %s6032_s16, %s5710_s14  ;;  %p5712_p7 = pneg %p6038_p4 }
  0x26   : > { %p5716_p3 = scmp.lt.u32.totalorder %s6032_s16, %s8782_s5  ;;  %p5717_p11 = scmp.lt.u32.totalorder %s5715_s22, %s5710_s14 }
  0x27   : > { %p5713_p9 = pnand %p5712_p7, %p5711_p6  ;;  %p5719_p0 = scmp.lt.u32.totalorder %s5710_s14, %s6032_s16 }
  0x28   : > { %p5718_p12 = por %p5717_p11, %p5716_p3 }
  0x29   : > { %p5714_p10 = pneg %p5713_p9 }
  0x2a   : > { %p5720_p1 = por %p5719_p0, %p5718_p12 }
  0x2c   : > { %p5721_p5 = pnand %p5720_p1, %p5714_p10 }
  0x2e   : > { %5724 = shalt.err (!%p5721_p5)
}
  0x2f   : > { %s5725_s21 = scalar_lea.vmem %s6034_s23, 8192  ;;  %s5864_s19 = smov [#allocation4]  }
  0x30   : > { %p5726_p6 = scmp.ne.s32.totalorder %s6034_s23, %s5725_s21  ;;  %s5730_s25 = sshll.u32 %s5864_s19, 4  ;;  %s5731_s25 = int_to_ptr.vmem [resolvable:$false] %s5730_s25 }
  0x31   : > { %s5732_s26 = scalar_lea.vmem %s5731_s25, 16384  ;;  %p5733_p13 = scmp.lt.s32.totalorder %s6034_s23, %s5731_s25 }
  0x32   : > { %p5728_p9 = pnand %p5726_p6, %p5712_p7  ;;  %p5734_p3 = scmp.lt.s32.totalorder %s5732_s26, %s5725_s21 }
  0x34   : > { %p5729_p2 = pneg %p5728_p9  ;;  %p5735_p11 = por %p5734_p3, %p5733_p13 }
  0x36   : > { %p5736_p12 = pnand %p5735_p11, %p5729_p2 }
  0x38   : > { %5739 = shalt.err (!%p5736_p12)
}
  0x39   : > { %s5865_s14 = smov 128   ;;  %s5866_s22 = smov 8  }
  0x3a   : > { %5110 = dma.hbm_to_vmem [thread:$0]  (!%p6038_p4), %s6032_s16, 8192, %s6034_s23, %s6043_s13, %s5865_s14, %s5865_s14, %s5866_s22  }
  0x3b   : > { %p305_p5 = scmp.lt.s32.totalorder %s5862_s15, 5  ;;  %p8830_p7 = scmp.ge.s32.totalorder %s5862_s15, 1 }
  0x3d   : > { %p306_p10 = pnand %p8830_p7, %p305_p5 }
  0x3f   : > { %309 = sbr.rel (%p306_p10) target bundleno = 2731 (0xaab), region = 52 }
  0x46   : > { %s311_s18 = sand.u32 1, %s5838_s9  }
  0x47   : > { %s4382_s21 = sshll.u32 %s311_s18, 9  ;;  %s312_s19 = scalar_lea.sflag [#allocation5], %s311_s18 }
  0x48   : > { %s6075_s25 = scalar_lea.vmem [#allocation4], %s4382_s21 }
  0x49   : > { %5813 = dma.done.wait (%p6004_p8), %s312_s19, 8192  }
  0x4a   : > { %5815 = vsyncadd (%p6004_p8), %s312_s19, 4294959104  ;;  %s350_s13 = sand.u32 1, %s5826_s28   ;;  %p353_p13 = scmp.lt.s32.totalorder %s5850_s12, 1 }
  0x4b   : > { %s4383_s23 = sshll.u32 %s350_s13, 7  ;;  %p4386_p2 = scmp.ne.s32.totalorder %s5846_s11, 0 }
  0x4c   : > { %s354_s16 = scalar_select %p353_p13, %s5850_s12, 1 }
  0x4d   : > { %s6091_s18 = scalar_lea.vmem [#allocation7], %s4383_s23  ;;  %363 = sbr.rel (%p4386_p2) target bundleno = 682 (0x2aa), region = 60  ;;  %vm428_vm0 = vcmask (!%p4386_p2), 261120   ;;  %vm1188_vm1 = vcmask (!%p4386_p2), 785408  }
  0x4e   : > { %s4517_s17 = sshll.u32 %s354_s16, 7 }
  0x4f   : > { %s6089_s22 = scalar_lea.vmem %s8777_s0, %s4517_s17 }
  0x50   : > { %v6095_v0 = vld [vmem:[%s6089_s22] sm:$0xff] (!%p4386_p2)   ;;  %v6105_v6 = vld [vmem:[%s6089_s22 + $0x8] sm:$0xff] (!%p4386_p2)   ;;  %v6133_v18 = vld [vmem:[%s6089_s22 + $0x10] sm:$0xff] (!%p4386_p2)  }
  0x51   : > { %v6098_v1 = vld [vmem:[%s6089_s22 + $0x40] sm:$0xff] (!%p4386_p2)   ;;  %v4522_v2 = vunpack.c.l.bf16 (!%p4386_p2), %v6095_v0  ;;  %v4523_v4 = vunpack.c.h.bf16 (!%p4386_p2), %v6095_v0  ;;  %v4526_v11 = vunpack.c.l.bf16 (!%p4386_p2), %v6105_v6  ;;  %v4527_v12 = vunpack.c.h.bf16 (!%p4386_p2), %v6105_v6  ;;  %v6122_v13 = vld [vmem:[%s6089_s22 + $0x48] sm:$0xff] (!%p4386_p2)   ;;  %v6144_v23 = vld [vmem:[%s6089_s22 + $0x50] sm:$0xff] (!%p4386_p2)  }
  0x52   : > { %v4554_v3 = vunpack.c.l.bf16 (!%p4386_p2), %v6098_v1  ;;  %v4555_v5 = vunpack.c.h.bf16 (!%p4386_p2), %v6098_v1  ;;  %v4558_v16 = vunpack.c.l.bf16 (!%p4386_p2), %v6122_v13  ;;  %v4559_v17 = vunpack.c.h.bf16 (!%p4386_p2), %v6122_v13  ;;  %v6155_v28 = vld [vmem:[%s6089_s22 + $0x18] sm:$0xff] (!%p4386_p2)   ;;  %v6177_v38 = vld [vmem:[%s6089_s22 + $0x20] sm:$0xff] (!%p4386_p2)   ;;  %v6199_v48 = vld [vmem:[%s6089_s22 + $0x28] sm:$0xff] (!%p4386_p2)  }
  0x53   : > { %v429_v7 = vsel (!%p4386_p2), %vm428_vm0, %v4522_v2, 0.0  ;;  %v432_v9 = vsel (!%p4386_p2), %vm428_vm0, %v4523_v4, 0.0  ;;  %v435_v14 = vsel (!%p4386_p2), %vm428_vm0, %v4526_v11, 0.0  ;;  %v438_v15 = vsel (!%p4386_p2), %vm428_vm0, %v4527_v12, 0.0  ;;  %v6166_v33 = vld [vmem:[%s6089_s22 + $0x58] sm:$0xff] (!%p4386_p2)   ;;  %v6188_v43 = vld [vmem:[%s6089_s22 + $0x60] sm:$0xff] (!%p4386_p2)  }
  0x54   : > { %v477_v8 = vsel %vm428_vm0, %v4554_v3, 0.0  ;;  %430 = vadd.xlane.f32.xlu0 %v429_v7  ;;  %v480_v10 = vsel %vm428_vm0, %v4555_v5, 0.0  ;;  %v483_v19 = vsel %vm428_vm0, %v4558_v16, 0.0  ;;  %v486_v20 = vsel %vm428_vm0, %v4559_v17, 0.0  ;;  %v6210_v53 = vld [vmem:[%s6089_s22 + $0x68] sm:$0xff]   ;;  %v6221_v58 = vld [vmem:[%s6089_s22 + $0x30] sm:$0xff]  }
  0x55   : > { %478 = vadd.xlane.f32.xlu1 %v477_v8  ;;  %v4530_v21 = vunpack.c.l.bf16 %v6133_v18  ;;  %v4531_v22 = vunpack.c.h.bf16 %v6133_v18  ;;  %v4562_v26 = vunpack.c.l.bf16 %v6144_v23  ;;  %v4563_v27 = vunpack.c.h.bf16 %v6144_v23  ;;  %v6232_v63 = vld [vmem:[%s6089_s22 + $0x70] sm:$0xff]  }
  0x56   : > { %v4534_v31 = vunpack.c.l.bf16 %v6155_v28  ;;  %v4535_v32 = vunpack.c.h.bf16 %v6155_v28  ;;  %v4566_v36 = vunpack.c.l.bf16 %v6166_v33  ;;  %v4567_v37 = vunpack.c.h.bf16 %v6166_v33 }
  0x57   : > { %v441_v24 = vsel %vm428_vm0, %v4530_v21, 0.0  ;;  %v444_v25 = vsel %vm428_vm0, %v4531_v22, 0.0  ;;  %v489_v29 = vsel %vm428_vm0, %v4562_v26, 0.0  ;;  %v492_v30 = vsel %vm428_vm0, %v4563_v27, 0.0 }
  0x58   : > { %433 = vadd.xlane.f32.xlu0 %v432_v9  ;;  %v447_v34 = vsel %vm428_vm0, %v4534_v31, 0.0  ;;  %v450_v35 = vsel %vm428_vm0, %v4535_v32, 0.0  ;;  %v495_v39 = vsel %vm428_vm0, %v4566_v36, 0.0  ;;  %v498_v40 = vsel %vm428_vm0, %v4567_v37, 0.0 }
  0x59   : > { %481 = vadd.xlane.f32.xlu1 %v480_v10  ;;  %v4538_v41 = vunpack.c.l.bf16 %v6177_v38  ;;  %v4539_v42 = vunpack.c.h.bf16 %v6177_v38  ;;  %v4570_v46 = vunpack.c.l.bf16 %v6188_v43  ;;  %v4571_v47 = vunpack.c.h.bf16 %v6188_v43 }
  0x5a   : > { %v4542_v51 = vunpack.c.l.bf16 %v6199_v48  ;;  %v4543_v52 = vunpack.c.h.bf16 %v6199_v48  ;;  %v4574_v56 = vunpack.c.l.bf16 %v6210_v53  ;;  %v4575_v57 = vunpack.c.h.bf16 %v6210_v53 }
  0x5b   : > { %v453_v44 = vsel %vm428_vm0, %v4538_v41, 0.0  ;;  %v456_v45 = vsel %vm428_vm0, %v4539_v42, 0.0  ;;  %v501_v49 = vsel %vm428_vm0, %v4570_v46, 0.0  ;;  %v504_v50 = vsel %vm428_vm0, %v4571_v47, 0.0 }
  0x5c   : > { %436 = vadd.xlane.f32.xlu0 %v435_v14  ;;  %v459_v54 = vsel %vm428_vm0, %v4542_v51, 0.0  ;;  %v462_v55 = vsel %vm428_vm0, %v4543_v52, 0.0  ;;  %v507_v59 = vsel %vm428_vm0, %v4574_v56, 0.0  ;;  %v510_v60 = vsel %vm428_vm0, %v4575_v57, 0.0  ;;  %v6243_v14 = vld [vmem:[%s6089_s22 + $0x38] sm:$0xff]  }
  0x5d   : > { %439 = vadd.xlane.f32.xlu1 %v438_v15  ;;  %v4546_v61 = vunpack.c.l.bf16 %v6221_v58  ;;  %v4547_v62 = vunpack.c.h.bf16 %v6221_v58  ;;  %v4578_v9 = vunpack.c.l.bf16 %v6232_v63  ;;  %v4579_v10 = vunpack.c.h.bf16 %v6232_v63 }
  0x5f   : > { %v465_v7 = vsel %vm428_vm0, %v4546_v61, 0.0  ;;  %v468_v8 = vsel %vm428_vm0, %v4547_v62, 0.0  ;;  %v513_v15 = vsel %vm428_vm0, %v4578_v9, 0.0 }
  0x60   : > { %484 = vadd.xlane.f32.xlu0 %v483_v19  ;;  %v516_v19 = vsel %vm428_vm0, %v4579_v10, 0.0 }
  0x61   : > { %487 = vadd.xlane.f32.xlu1 %v486_v20  ;;  %v4550_v20 = vunpack.c.l.bf16 %v6243_v14 }
  0x64   : > { %442 = vadd.xlane.f32.xlu0 %v441_v24  ;;  %v4551_v24 = vunpack.c.h.bf16 %v6243_v14 }
  0x65   : > { %445 = vadd.xlane.f32.xlu1 %v444_v25  ;;  %v6254_v25 = vld [vmem:[%s6089_s22 + $0x78] sm:$0xff]  }
  0x68   : > { %490 = vadd.xlane.f32.xlu0 %v489_v29  ;;  %v471_v29 = vsel %vm428_vm0, %v4550_v20, 0.0 }
  0x69   : > { %493 = vadd.xlane.f32.xlu1 %v492_v30  ;;  %v474_v30 = vsel %vm428_vm0, %v4551_v24, 0.0 }
  0x6c   : > { %448 = vadd.xlane.f32.xlu0 %v447_v34  ;;  %v4582_v34 = vunpack.c.l.bf16 %v6254_v25 }
  0x6d   : > { %451 = vadd.xlane.f32.xlu1 %v450_v35  ;;  %v4583_v35 = vunpack.c.h.bf16 %v6254_v25 }
  0x70   : > { %496 = vadd.xlane.f32.xlu0 %v495_v39  ;;  %v519_v39 = vsel %vm428_vm0, %v4582_v34, 0.0 }
  0x71   : > { %499 = vadd.xlane.f32.xlu1 %v498_v40  ;;  %v522_v40 = vsel %vm428_vm0, %v4583_v35, 0.0 }
  0x74   : > { %454 = vadd.xlane.f32.xlu0 %v453_v44 }
  0x75   : > { %457 = vadd.xlane.f32.xlu1 %v456_v45 }
  0x78   : > { %502 = vadd.xlane.f32.xlu0 %v501_v49 }
  0x79   : > { %505 = vadd.xlane.f32.xlu1 %v504_v50 }
  0x7c   : > { %460 = vadd.xlane.f32.xlu0 %v459_v54 }
  0x7d   : > { %463 = vadd.xlane.f32.xlu1 %v462_v55 }
  0x80   : > { %508 = vadd.xlane.f32.xlu0 %v507_v59 }
  0x81   : > { %511 = vadd.xlane.f32.xlu1 %v510_v60 }
  0x84   : > { %466 = vadd.xlane.f32.xlu0 %v465_v7 }
  0x85   : > { %469 = vadd.xlane.f32.xlu1 %v468_v8 }
  0x88   : > { %514 = vadd.xlane.f32.xlu0 %v513_v15 }
  0x89   : > { %517 = vadd.xlane.f32.xlu1 %v516_v19 }
  0x8c   : > { %472 = vadd.xlane.f32.xlu0 %v471_v29 }
  0x8d   : > { %475 = vadd.xlane.f32.xlu1 %v474_v30 }
  0x90   : > { %520 = vadd.xlane.f32.xlu0 %v519_v39 }
  0x91   : > { %523 = vadd.xlane.f32.xlu1 %v522_v40 }
  0xe1   : > { %v431_v44 = vpop.xlane.xlu0 %430 }
  0xe2   : > { %v479_v45 = vpop.xlane.xlu1 %478  ;;  %v526_v49 = vmul.f32 0.03125, %v431_v44 }
  0xe3   : > { %v542_v50 = vmul.f32 0.03125, %v479_v45 }
  0xe4   : > { %v6272_v54 = vsub.f32 %v4522_v2, %v526_v49 }
  0xe5   : > { %v6276_v55 = vsub.f32 %v4554_v3, %v542_v50  ;;  %v434_v59 = vpop.xlane.xlu0 %433 }
  0xe6   : > { %v482_v60 = vpop.xlane.xlu1 %481  ;;  %v527_v7 = vmul.f32 0.03125, %v434_v59  ;;  %v590_v15 = vmul.f32 %v6272_v54, %v6272_v54 }
  0xe7   : > { %v543_v8 = vmul.f32 0.03125, %v482_v60  ;;  %v606_v19 = vmul.f32 %v6276_v55, %v6276_v55 }
  0xe8   : > { %v6284_v29 = vsub.f32 %v4523_v4, %v527_v7  ;;  %v622_v3 = vsel %vm428_vm0, %v590_v15, 0.0 }
  0xe9   : > { %v6288_v2 = vsub.f32 %v4555_v5, %v543_v8  ;;  %623 = vadd.xlane.f32.xlu0 %v622_v3  ;;  %v437_v30 = vpop.xlane.xlu0 %436  ;;  %v670_v40 = vsel %vm428_vm0, %v606_v19, 0.0 }
  0xea   : > { %v440_v39 = vpop.xlane.xlu1 %439  ;;  %v528_v44 = vmul.f32 0.03125, %v437_v30  ;;  %v591_v49 = vmul.f32 %v6284_v29, %v6284_v29 }
  0xeb   : > { %v529_v45 = vmul.f32 0.03125, %v440_v39  ;;  %v607_v0 = vmul.f32 %v6288_v2, %v6288_v2 }
  0xec   : > { %v6298_v1 = vsub.f32 %v4526_v11, %v528_v44  ;;  %v625_v5 = vsel %vm428_vm0, %v591_v49, 0.0 }
  0xed   : > { %v6302_v4 = vsub.f32 %v4527_v12, %v529_v45  ;;  %671 = vadd.xlane.f32.xlu0 %v670_v40  ;;  %626 = vadd.xlane.f32.xlu1 %v625_v5  ;;  %v485_v50 = vpop.xlane.xlu0 %484  ;;  %v673_v60 = vsel %vm428_vm0, %v607_v0, 0.0 }
  0xee   : > { %v488_v59 = vpop.xlane.xlu1 %487  ;;  %v544_v7 = vmul.f32 0.03125, %v485_v50  ;;  %v592_v15 = vmul.f32 %v6298_v1, %v6298_v1 }
  0xef   : > { %v545_v8 = vmul.f32 0.03125, %v488_v59  ;;  %v593_v11 = vmul.f32 %v6302_v4, %v6302_v4 }
  0xf0   : > { %v6312_v6 = vsub.f32 %v4558_v16, %v544_v7  ;;  %v628_v19 = vsel %vm428_vm0, %v592_v15, 0.0 }
  0xf1   : > { %v6316_v12 = vsub.f32 %v4559_v17, %v545_v8  ;;  %674 = vadd.xlane.f32.xlu1 %v673_v60  ;;  %629 = vadd.xlane.f32.xlu0 %v628_v19  ;;  %v443_v3 = vpop.xlane.xlu0 %442  ;;  %v631_v39 = vsel %vm428_vm0, %v593_v11, 0.0 }
  0xf2   : > { %v446_v30 = vpop.xlane.xlu1 %445  ;;  %v530_v40 = vmul.f32 0.03125, %v443_v3  ;;  %v608_v45 = vmul.f32 %v6312_v6, %v6312_v6 }
  0xf3   : > { %v531_v44 = vmul.f32 0.03125, %v446_v30  ;;  %v609_v16 = vmul.f32 %v6316_v12, %v6316_v12 }
  0xf4   : > { %v6326_v13 = vsub.f32 %v4530_v21, %v530_v40  ;;  %v676_v49 = vsel %vm428_vm0, %v608_v45, 0.0 }
  0xf5   : > { %v6330_v17 = vsub.f32 %v4531_v22, %v531_v44  ;;  %632 = vadd.xlane.f32.xlu1 %v631_v39  ;;  %677 = vadd.xlane.f32.xlu0 %v676_v49  ;;  %v491_v0 = vpop.xlane.xlu0 %490  ;;  %v679_v50 = vsel %vm428_vm0, %v609_v16, 0.0 }
  0xf6   : > { %v494_v5 = vpop.xlane.xlu1 %493  ;;  %v546_v59 = vmul.f32 0.03125, %v491_v0  ;;  %v594_v7 = vmul.f32 %v6326_v13, %v6326_v13 }
  0xf7   : > { %v547_v60 = vmul.f32 0.03125, %v494_v5  ;;  %v595_v21 = vmul.f32 %v6330_v17, %v6330_v17 }
  0xf8   : > { %v6340_v18 = vsub.f32 %v4562_v26, %v546_v59  ;;  %v634_v8 = vsel %vm428_vm0, %v594_v7, 0.0 }
  0xf9   : > { %v6344_v22 = vsub.f32 %v4563_v27, %v547_v60  ;;  %680 = vadd.xlane.f32.xlu1 %v679_v50  ;;  %635 = vadd.xlane.f32.xlu0 %v634_v8  ;;  %v449_v15 = vpop.xlane.xlu0 %448  ;;  %v637_v19 = vsel %vm428_vm0, %v595_v21, 0.0 }
  0xfa   : > { %v452_v11 = vpop.xlane.xlu1 %451  ;;  %v532_v3 = vmul.f32 0.03125, %v449_v15  ;;  %v610_v39 = vmul.f32 %v6340_v18, %v6340_v18 }
  0xfb   : > { %v533_v30 = vmul.f32 0.03125, %v452_v11  ;;  %v611_v26 = vmul.f32 %v6344_v22, %v6344_v22 }
  0xfc   : > { %v6354_v23 = vsub.f32 %v4534_v31, %v532_v3  ;;  %v682_v40 = vsel %vm428_vm0, %v610_v39, 0.0 }
  0xfd   : > { %v6358_v27 = vsub.f32 %v4535_v32, %v533_v30  ;;  %638 = vadd.xlane.f32.xlu1 %v637_v19  ;;  %683 = vadd.xlane.f32.xlu0 %v682_v40  ;;  %v497_v44 = vpop.xlane.xlu0 %496  ;;  %v685_v16 = vsel %vm428_vm0, %v611_v26, 0.0 }
  0xfe   : > { %v500_v45 = vpop.xlane.xlu1 %499  ;;  %v548_v49 = vmul.f32 0.03125, %v497_v44  ;;  %v596_v5 = vmul.f32 %v6354_v23, %v6354_v23 }
  0xff   : > { %v549_v0 = vmul.f32 0.03125, %v500_v45  ;;  %v597_v31 = vmul.f32 %v6358_v27, %v6358_v27 }
 0x100   : > { %v6368_v28 = vsub.f32 %v4566_v36, %v548_v49  ;;  %v640_v50 = vsel %vm428_vm0, %v596_v5, 0.0 }
 0x101   : > { %v6372_v32 = vsub.f32 %v4567_v37, %v549_v0  ;;  %686 = vadd.xlane.f32.xlu1 %v685_v16  ;;  %641 = vadd.xlane.f32.xlu0 %v640_v50  ;;  %v455_v59 = vpop.xlane.xlu0 %454  ;;  %v643_v7 = vsel %vm428_vm0, %v597_v31, 0.0 }
 0x102   : > { %v458_v60 = vpop.xlane.xlu1 %457  ;;  %v534_v21 = vmul.f32 0.03125, %v455_v59  ;;  %v612_v15 = vmul.f32 %v6368_v28, %v6368_v28 }
 0x103   : > { %v535_v8 = vmul.f32 0.03125, %v458_v60  ;;  %v613_v36 = vmul.f32 %v6372_v32, %v6372_v32 }
 0x104   : > { %v6382_v33 = vsub.f32 %v4538_v41, %v534_v21  ;;  %v688_v11 = vsel %vm428_vm0, %v612_v15, 0.0 }
 0x105   : > { %v6386_v37 = vsub.f32 %v4539_v42, %v535_v8  ;;  %644 = vadd.xlane.f32.xlu1 %v643_v7  ;;  %689 = vadd.xlane.f32.xlu0 %v688_v11  ;;  %v503_v19 = vpop.xlane.xlu0 %502  ;;  %v691_v30 = vsel %vm428_vm0, %v613_v36, 0.0 }
 0x106   : > { %v506_v3 = vpop.xlane.xlu1 %505  ;;  %v550_v39 = vmul.f32 0.03125, %v503_v19  ;;  %v598_v40 = vmul.f32 %v6382_v33, %v6382_v33 }
 0x107   : > { %v551_v26 = vmul.f32 0.03125, %v506_v3  ;;  %v599_v41 = vmul.f32 %v6386_v37, %v6386_v37 }
 0x108   : > { %v6396_v38 = vsub.f32 %v4570_v46, %v550_v39  ;;  %v646_v44 = vsel %vm428_vm0, %v598_v40, 0.0 }
 0x109   : > { %v6400_v42 = vsub.f32 %v4571_v47, %v551_v26  ;;  %692 = vadd.xlane.f32.xlu1 %v691_v30  ;;  %647 = vadd.xlane.f32.xlu0 %v646_v44  ;;  %v461_v45 = vpop.xlane.xlu0 %460  ;;  %v649_v49 = vsel %vm428_vm0, %v599_v41, 0.0  ;;  %v5222_v30 = vld [vmem:[%s8780_s3] sm:$0xff]  }
 0x10a   : > { %v464_v16 = vpop.xlane.xlu1 %463  ;;  %v536_v0 = vmul.f32 0.03125, %v461_v45  ;;  %v614_v31 = vmul.f32 %v6396_v38, %v6396_v38  ;;  %5011 = vmatprep.subr.bf16.mxu0 %v5222_v30  ;;  %5067 = vmatprep.subr.bf16.mxu1 %v5222_v30 }
 0x10b   : > { %v537_v5 = vmul.f32 0.03125, %v464_v16  ;;  %v615_v46 = vmul.f32 %v6400_v42, %v6400_v42  ;;  %5012 = vmatpush3.bf16.msra.mxu0 %v5222_v30  ;;  %5069 = vmatpush3.bf16.msra.mxu1 %v5222_v30 }
 0x10c   : > { %v6410_v43 = vsub.f32 %v4542_v51, %v536_v0  ;;  %v694_v50 = vsel %vm428_vm0, %v614_v31, 0.0 }
 0x10d   : > { %v6414_v47 = vsub.f32 %v4543_v52, %v537_v5  ;;  %650 = vadd.xlane.f32.xlu1 %v649_v49  ;;  %695 = vadd.xlane.f32.xlu0 %v694_v50  ;;  %v509_v59 = vpop.xlane.xlu0 %508  ;;  %v697_v7 = vsel %vm428_vm0, %v615_v46, 0.0  ;;  %v5223_v49 = vld [vmem:[%s8780_s3 + $0x8] sm:$0xff]  }
 0x10e   : > { %v512_v60 = vpop.xlane.xlu1 %511  ;;  %v552_v21 = vmul.f32 0.03125, %v509_v59  ;;  %v600_v15 = vmul.f32 %v6410_v43, %v6410_v43  ;;  %5013 = vmatprep.subr.bf16.mxu0 %v5223_v49  ;;  %5068 = vmatprep.subr.bf16.mxu1 %v5223_v49 }
 0x10f   : > { %v553_v8 = vmul.f32 0.03125, %v512_v60  ;;  %v601_v51 = vmul.f32 %v6414_v47, %v6414_v47  ;;  %5014 = vmatpush3.bf16.msra.mxu0 %v5223_v49  ;;  %5070 = vmatpush3.bf16.msra.mxu1 %v5223_v49 }
 0x110   : > { %v6424_v48 = vsub.f32 %v4574_v56, %v552_v21  ;;  %v652_v36 = vsel %vm428_vm0, %v600_v15, 0.0 }
 0x111   : > { %v6428_v52 = vsub.f32 %v4575_v57, %v553_v8  ;;  %698 = vadd.xlane.f32.xlu1 %v697_v7  ;;  %653 = vadd.xlane.f32.xlu0 %v652_v36  ;;  %v467_v11 = vpop.xlane.xlu0 %466  ;;  %v655_v3 = vsel %vm428_vm0, %v601_v51, 0.0 }
 0x112   : > { %v470_v19 = vpop.xlane.xlu1 %469  ;;  %v538_v39 = vmul.f32 0.03125, %v467_v11  ;;  %v616_v56 = vmul.f32 %v6424_v48, %v6424_v48 }
 0x113   : > { %v539_v26 = vmul.f32 0.03125, %v470_v19  ;;  %v617_v53 = vmul.f32 %v6428_v52, %v6428_v52 }
 0x114   : > { %v6441_v57 = vsub.f32 %v4546_v61, %v538_v39  ;;  %v700_v41 = vsel %vm428_vm0, %v616_v56, 0.0 }
 0x115   : > { %v6445_v40 = vsub.f32 %v4547_v62, %v539_v26  ;;  %656 = vadd.xlane.f32.xlu1 %v655_v3  ;;  %701 = vadd.xlane.f32.xlu0 %v700_v41  ;;  %v515_v44 = vpop.xlane.xlu0 %514  ;;  %v703_v16 = vsel %vm428_vm0, %v617_v53, 0.0 }
 0x116   : > { %v518_v45 = vpop.xlane.xlu1 %517  ;;  %v554_v61 = vmul.f32 0.03125, %v515_v44  ;;  %v602_v58 = vmul.f32 %v6441_v57, %v6441_v57 }
 0x117   : > { %v555_v0 = vmul.f32 0.03125, %v518_v45  ;;  %v603_v62 = vmul.f32 %v6445_v40, %v6445_v40 }
 0x118   : > { %v6458_v5 = vsub.f32 %v4578_v9, %v554_v61  ;;  %v658_v46 = vsel %vm428_vm0, %v602_v58, 0.0 }
 0x119   : > { %v6462_v31 = vsub.f32 %v4579_v10, %v555_v0  ;;  %704 = vadd.xlane.f32.xlu1 %v703_v16  ;;  %659 = vadd.xlane.f32.xlu0 %v658_v46  ;;  %v473_v50 = vpop.xlane.xlu0 %472  ;;  %v661_v60 = vsel %vm428_vm0, %v603_v62, 0.0 }
 0x11a   : > { %v476_v59 = vpop.xlane.xlu1 %475  ;;  %v540_v7 = vmul.f32 0.03125, %v473_v50  ;;  %v618_v9 = vmul.f32 %v6458_v5, %v6458_v5 }
 0x11b   : > { %v541_v21 = vmul.f32 0.03125, %v476_v59  ;;  %v619_v63 = vmul.f32 %v6462_v31, %v6462_v31 }
 0x11c   : > { %v6472_v10 = vsub.f32 %v4550_v20, %v540_v7  ;;  %v706_v15 = vsel %vm428_vm0, %v618_v9, 0.0 }
 0x11d   : > { %v6476_v8 = vsub.f32 %v4551_v24, %v541_v21  ;;  %662 = vadd.xlane.f32.xlu1 %v661_v60  ;;  %707 = vadd.xlane.f32.xlu0 %v706_v15  ;;  %v521_v51 = vpop.xlane.xlu0 %520  ;;  %v709_v11 = vsel %vm428_vm0, %v619_v63, 0.0 }
 0x11e   : > { %v524_v36 = vpop.xlane.xlu1 %523  ;;  %v556_v19 = vmul.f32 0.03125, %v521_v51  ;;  %v604_v30 = vmul.f32 %v6472_v10, %v6472_v10 }
 0x11f   : > { %v557_v3 = vmul.f32 0.03125, %v524_v36  ;;  %v605_v20 = vmul.f32 %v6476_v8, %v6476_v8 }
 0x120   : > { %v6486_v14 = vsub.f32 %v4582_v34, %v556_v19  ;;  %v664_v39 = vsel %vm428_vm0, %v604_v30, 0.0 }
 0x121   : > { %v6490_v24 = vsub.f32 %v4583_v35, %v557_v3  ;;  %710 = vadd.xlane.f32.xlu1 %v709_v11  ;;  %665 = vadd.xlane.f32.xlu0 %v664_v39  ;;  %v667_v26 = vsel %vm428_vm0, %v605_v20, 0.0 }
 0x122   : > { %v620_v56 = vmul.f32 %v6486_v14, %v6486_v14 }
 0x123   : > { %v621_v53 = vmul.f32 %v6490_v24, %v6490_v24 }
 0x124   : > { %v712_v41 = vsel %vm428_vm0, %v620_v56, 0.0 }
 0x125   : > { %668 = vadd.xlane.f32.xlu1 %v667_v26  ;;  %713 = vadd.xlane.f32.xlu0 %v712_v41  ;;  %v715_v25 = vsel %vm428_vm0, %v621_v53, 0.0  ;;  %v6504_v26 = vld [vmem:[%s8778_s1] ss:$0 sm:$0xff] }
 0x129   : > { %716 = vadd.xlane.f32.xlu1 %v715_v25 }
 0x176   : > { %v624_v34 = vpop.xlane.xlu0 %623 }
 0x177   : > { %v718_v35 = vmul.f32 0.03125, %v624_v34 }
 0x179   : > { %v750_v44 = vadd.f32 1e-05, %v718_v35 }
 0x17a   : > { %v627_v45 = vpop.xlane.xlu1 %626  ;;  %v672_v16 = vpop.xlane.xlu0 %671 }
 0x17b   : > { %5224 = vrsqrt.f32 %v750_v44  ;;  %v719_v49 = vmul.f32 0.03125, %v627_v45  ;;  %v734_v61 = vmul.f32 0.03125, %v672_v16 }
 0x17d   : > { %v751_v0 = vadd.f32 1e-05, %v719_v49  ;;  %v766_v58 = vadd.f32 1e-05, %v734_v61  ;;  %v6511_v49 = vld [vmem:[%s8779_s2] ss:$0 sm:$0xff] }
 0x17e   : > { %v675_v62 = vpop.xlane.xlu1 %674  ;;  %v630_v46 = vpop.xlane.xlu0 %629 }
 0x17f   : > { %5226 = vrsqrt.f32 %v751_v0  ;;  %v735_v50 = vmul.f32 0.03125, %v675_v62  ;;  %v720_v59 = vmul.f32 0.03125, %v630_v46 }
 0x180   : > { %5228 = vrsqrt.f32 %v766_v58 }
 0x181   : > { %v767_v60 = vadd.f32 1e-05, %v735_v50  ;;  %v752_v7 = vadd.f32 1e-05, %v720_v59 }
 0x182   : > { %v633_v21 = vpop.xlane.xlu1 %632  ;;  %v678_v9 = vpop.xlane.xlu0 %677 }
 0x183   : > { %5230 = vrsqrt.f32 %v767_v60  ;;  %v721_v63 = vmul.f32 0.03125, %v633_v21  ;;  %v736_v15 = vmul.f32 0.03125, %v678_v9 }
 0x184   : > { %5232 = vrsqrt.f32 %v752_v7 }
 0x185   : > { %v5225_v51 = vpop.eup %5224  ;;  %v753_v36 = vadd.f32 1e-05, %v721_v63  ;;  %v768_v11 = vadd.f32 1e-05, %v736_v15 }
 0x186   : > { %v681_v19 = vpop.xlane.xlu1 %680  ;;  %v636_v3 = vpop.xlane.xlu0 %635  ;;  %v814_v30 = vmul.f32 %v5225_v51, %v6272_v54 }
 0x187   : > { %5234 = vrsqrt.f32 %v753_v36  ;;  %v737_v20 = vmul.f32 0.03125, %v681_v19  ;;  %v722_v39 = vmul.f32 0.03125, %v636_v3 }
 0x188   : > { %5236 = vrsqrt.f32 %v768_v11  ;;  %v853_v45 = vmul.f32 %v6504_v26, %v814_v30 }
 0x189   : > { %v5227_v56 = vpop.eup %5226  ;;  %v769_v53 = vadd.f32 1e-05, %v737_v20  ;;  %v754_v41 = vadd.f32 1e-05, %v722_v39 }
 0x18a   : > { %v5229_v25 = vpop.eup %5228  ;;  %v639_v34 = vpop.xlane.xlu1 %638  ;;  %v815_v44 = vmul.f32 %v5227_v56, %v6284_v29  ;;  %v892_v60 = vadd.f32 %v6511_v49, %v853_v45 }
 0x18b   : > { %v684_v35 = vpop.xlane.xlu0 %683  ;;  %5238 = vrsqrt.f32 %v769_v53  ;;  %v723_v54 = vmul.f32 0.03125, %v639_v34  ;;  %v830_v61 = vmul.f32 %v5229_v25, %v6276_v55 }
 0x18c   : > { %v738_v16 = vmul.f32 0.03125, %v684_v35  ;;  %5240 = vrsqrt.f32 %v754_v41  ;;  %v854_v0 = vmul.f32 %v6504_v26, %v815_v44 }
 0x18d   : > { %v5231_v58 = vpop.eup %5230  ;;  %v755_v62 = vadd.f32 1e-05, %v723_v54  ;;  %v869_v9 = vmul.f32 %v6504_v26, %v830_v61 }
 0x18e   : > { %v770_v46 = vadd.f32 1e-05, %v738_v16  ;;  %v5233_v50 = vpop.eup %5232  ;;  %v687_v29 = vpop.xlane.xlu1 %686  ;;  %v893_v7 = vadd.f32 %v6511_v49, %v854_v0  ;;  %v831_v21 = vmul.f32 %v5231_v58, %v6288_v2 }
 0x18f   : > { %v642_v59 = vpop.xlane.xlu0 %641  ;;  %v816_v63 = vmul.f32 %v5233_v50, %v6298_v1  ;;  %5242 = vrsqrt.f32 %v755_v62  ;;  %v739_v55 = vmul.f32 0.03125, %v687_v29  ;;  %v908_v56 = vadd.f32 %v6511_v49, %v869_v9 }
 0x190   : > { %v724_v15 = vmul.f32 0.03125, %v642_v59  ;;  %5244 = vrsqrt.f32 %v770_v46  ;;  %v924_v51 = vpack.c.bf16 %v893_v7, %v892_v60  ;;  %v870_v36 = vmul.f32 %v6504_v26, %v831_v21 }
 0x191   : > { %v5235_v11 = vpop.eup %5234  ;;  %v771_v19 = vadd.f32 1e-05, %v739_v55  ;;  %v855_v53 = vmul.f32 %v6504_v26, %v816_v63 }
 0x192   : > { %v756_v3 = vadd.f32 1e-05, %v724_v15  ;;  %v5237_v30 = vpop.eup %5236  ;;  %v817_v20 = vmul.f32 %v5235_v11, %v6302_v4  ;;  %v645_v39 = vpop.xlane.xlu1 %644  ;;  %5015 = vmatprep.mubr.msk.bf16.mxu0 %vm428_vm0, %v924_v51  ;;  %v909_v1 = vadd.f32 %v6511_v49, %v870_v36 }
 0x193   : > { %v690_v2 = vpop.xlane.xlu0 %689  ;;  %v832_v41 = vmul.f32 %v5237_v30, %v6312_v6  ;;  %5246 = vrsqrt.f32 %v771_v19  ;;  %v725_v25 = vmul.f32 0.03125, %v645_v39  ;;  %v894_v62 = vadd.f32 %v6511_v49, %v855_v53 }
 0x194   : > { %v740_v34 = vmul.f32 0.03125, %v690_v2  ;;  %5248 = vrsqrt.f32 %v756_v3  ;;  %v932_v35 = vpack.c.bf16 %v909_v1, %v908_v56  ;;  %v856_v44 = vmul.f32 %v6504_v26, %v817_v20 }
 0x195   : > { %v5239_v4 = vpop.eup %5238  ;;  %v757_v45 = vadd.f32 1e-05, %v725_v25  ;;  %v871_v46 = vmul.f32 %v6504_v26, %v832_v41 }
 0x196   : > { %v772_v54 = vadd.f32 1e-05, %v740_v34  ;;  %v5241_v16 = vpop.eup %5240  ;;  %v833_v61 = vmul.f32 %v5239_v4, %v6316_v12  ;;  %v693_v0 = vpop.xlane.xlu1 %692  ;;  %5031 = vmatprep.mubr.msk.bf16.mxu1 %vm428_vm0, %v932_v35  ;;  %v895_v6 = vadd.f32 %v6511_v49, %v856_v44 }
 0x197   : > { %v648_v58 = vpop.xlane.xlu0 %647  ;;  %v818_v50 = vmul.f32 %v5241_v16, %v6326_v13  ;;  %5250 = vrsqrt.f32 %v757_v45  ;;  %v741_v29 = vmul.f32 0.03125, %v693_v0  ;;  %v910_v36 = vadd.f32 %v6511_v49, %v871_v46 }
 0x198   : > { %v726_v59 = vmul.f32 0.03125, %v648_v58  ;;  %5252 = vrsqrt.f32 %v772_v54  ;;  %v925_v60 = vpack.c.bf16 %v895_v6, %v894_v62  ;;  %v872_v7 = vmul.f32 %v6504_v26, %v833_v61 }
 0x199   : > { %v5243_v12 = vpop.eup %5242  ;;  %v773_v21 = vadd.f32 1e-05, %v741_v29  ;;  %v857_v11 = vmul.f32 %v6504_v26, %v818_v50 }
 0x19a   : > { %v758_v9 = vadd.f32 1e-05, %v726_v59  ;;  %v5245_v63 = vpop.eup %5244  ;;  %v819_v55 = vmul.f32 %v5243_v12, %v6330_v17  ;;  %v651_v15 = vpop.xlane.xlu1 %650  ;;  %5016 = vmatmul.mubr.msk.bf16.vlgmr.msra.gmra.mrb[0].mxu0 %vm428_vm0, %v925_v60  ;;  %v911_v13 = vadd.f32 %v6511_v49, %v872_v7 }
 0x19b   : > { %v696_v51 = vpop.xlane.xlu0 %695  ;;  %v834_v19 = vmul.f32 %v5245_v63, %v6340_v18  ;;  %5254 = vrsqrt.f32 %v773_v21  ;;  %v727_v3 = vmul.f32 0.03125, %v651_v15  ;;  %v896_v34 = vadd.f32 %v6511_v49, %v857_v11 }
 0x19c   : > { %v742_v30 = vmul.f32 0.03125, %v696_v51  ;;  %5256 = vrsqrt.f32 %v758_v9  ;;  %v933_v20 = vpack.c.bf16 %v911_v13, %v910_v36  ;;  %v858_v39 = vmul.f32 %v6504_v26, %v819_v55 }
 0x19d   : > { %v5247_v17 = vpop.eup %5246  ;;  %v759_v2 = vadd.f32 1e-05, %v727_v3  ;;  %v873_v35 = vmul.f32 %v6504_v26, %v834_v19 }
 0x19e   : > { %v774_v56 = vadd.f32 1e-05, %v742_v30  ;;  %v5249_v1 = vpop.eup %5248  ;;  %v835_v53 = vmul.f32 %v5247_v17, %v6344_v22  ;;  %v699_v41 = vpop.xlane.xlu1 %698  ;;  %5032 = vmatmul.mubr.msk.bf16.vlgmr.msra.gmra.mrb[0].mxu1 %vm428_vm0, %v933_v20  ;;  %v897_v18 = vadd.f32 %v6511_v49, %v858_v39 }
 0x19f   : > { %v654_v25 = vpop.xlane.xlu0 %653  ;;  %v820_v44 = vmul.f32 %v5249_v1, %v6354_v23  ;;  %5258 = vrsqrt.f32 %v759_v2  ;;  %v743_v4 = vmul.f32 0.03125, %v699_v41  ;;  %v912_v50 = vadd.f32 %v6511_v49, %v873_v35 }
 0x1a0   : > { %v728_v45 = vmul.f32 0.03125, %v654_v25  ;;  %5260 = vrsqrt.f32 %v774_v56  ;;  %v926_v54 = vpack.c.bf16 %v897_v18, %v896_v34  ;;  %v874_v16 = vmul.f32 %v6504_v26, %v835_v53 }
 0x1a1   : > { %v5251_v22 = vpop.eup %5250  ;;  %v775_v61 = vadd.f32 1e-05, %v743_v4  ;;  %v859_v29 = vmul.f32 %v6504_v26, %v820_v44 }
 0x1a2   : > { %v760_v0 = vadd.f32 1e-05, %v728_v45  ;;  %v5253_v58 = vpop.eup %5252  ;;  %v821_v62 = vmul.f32 %v5251_v22, %v6358_v27  ;;  %v657_v6 = vpop.xlane.xlu1 %656  ;;  %5019 = vmatprep.mubr.msk.bf16.mxu0 %vm428_vm0, %v926_v54  ;;  %v913_v23 = vadd.f32 %v6511_v49, %v874_v16 }
 0x1a3   : > { %v702_v46 = vpop.xlane.xlu0 %701  ;;  %v836_v59 = vmul.f32 %v5253_v58, %v6368_v28  ;;  %5262 = vrsqrt.f32 %v775_v61  ;;  %v729_v60 = vmul.f32 0.03125, %v657_v6  ;;  %v898_v13 = vadd.f32 %v6511_v49, %v859_v29 }
 0x1a4   : > { %v744_v7 = vmul.f32 0.03125, %v702_v46  ;;  %5264 = vrsqrt.f32 %v760_v0  ;;  %v934_v12 = vpack.c.bf16 %v913_v23, %v912_v50  ;;  %v860_v21 = vmul.f32 %v6504_v26, %v821_v62 }
 0x1a5   : > { %v5255_v27 = vpop.eup %5254  ;;  %v761_v9 = vadd.f32 1e-05, %v729_v60  ;;  %v875_v11 = vmul.f32 %v6504_v26, %v836_v59 }
 0x1a6   : > { %v776_v63 = vadd.f32 1e-05, %v744_v7  ;;  %v5257_v55 = vpop.eup %5256  ;;  %v837_v15 = vmul.f32 %v5255_v27, %v6372_v32  ;;  %v705_v51 = vpop.xlane.xlu1 %704  ;;  %5035 = vmatprep.mubr.msk.bf16.mxu1 %vm428_vm0, %v934_v12  ;;  %v899_v28 = vadd.f32 %v6511_v49, %v860_v21 }
 0x1a7   : > { %v660_v36 = vpop.xlane.xlu0 %659  ;;  %v822_v19 = vmul.f32 %v5257_v55, %v6382_v33  ;;  %5266 = vrsqrt.f32 %v761_v9  ;;  %v745_v3 = vmul.f32 0.03125, %v705_v51  ;;  %v914_v25 = vadd.f32 %v6511_v49, %v875_v11 }
 0x1a8   : > { %v730_v30 = vmul.f32 0.03125, %v660_v36  ;;  %5268 = vrsqrt.f32 %v776_v63  ;;  %v927_v20 = vpack.c.bf16 %v899_v28, %v898_v13  ;;  %v876_v39 = vmul.f32 %v6504_v26, %v837_v15 }
 0x1a9   : > { %v5259_v32 = vpop.eup %5258  ;;  %v777_v17 = vadd.f32 1e-05, %v745_v3  ;;  %v861_v34 = vmul.f32 %v6504_v26, %v822_v19 }
 0x1aa   : > { %v762_v2 = vadd.f32 1e-05, %v730_v30  ;;  %v5261_v56 = vpop.eup %5260  ;;  %v823_v1 = vmul.f32 %v5259_v32, %v6386_v37  ;;  %v663_v53 = vpop.xlane.xlu1 %662  ;;  %5020 = vmatmul.mubr.msk.bf16.gmra.mrb[4].mxu0 %vm428_vm0, %v927_v20  ;;  %v915_v33 = vadd.f32 %v6511_v49, %v876_v39 }
 0x1ab   : > { %v708_v41 = vpop.xlane.xlu0 %707  ;;  %v838_v18 = vmul.f32 %v5261_v56, %v6396_v38  ;;  %5270 = vrsqrt.f32 %v777_v17  ;;  %v731_v35 = vmul.f32 0.03125, %v663_v53  ;;  %v900_v62 = vadd.f32 %v6511_v49, %v861_v34 }
 0x1ac   : > { %v746_v44 = vmul.f32 0.03125, %v708_v41  ;;  %5272 = vrsqrt.f32 %v762_v2  ;;  %v935_v4 = vpack.c.bf16 %v915_v33, %v914_v25  ;;  %v862_v45 = vmul.f32 %v6504_v26, %v823_v1 }
 0x1ad   : > { %v5263_v37 = vpop.eup %5262  ;;  %v763_v54 = vadd.f32 1e-05, %v731_v35  ;;  %v877_v6 = vmul.f32 %v6504_v26, %v838_v18 }
 0x1ae   : > { %v778_v16 = vadd.f32 1e-05, %v746_v44  ;;  %v5265_v22 = vpop.eup %5264  ;;  %v839_v61 = vmul.f32 %v5263_v37, %v6400_v42  ;;  %v711_v0 = vpop.xlane.xlu1 %710  ;;  %5036 = vmatmul.mubr.msk.bf16.gmra.mrb[4].mxu1 %vm428_vm0, %v935_v4  ;;  %v901_v38 = vadd.f32 %v6511_v49, %v862_v45 }
 0x1af   : > { %v666_v58 = vpop.xlane.xlu0 %665  ;;  %v824_v46 = vmul.f32 %v5265_v22, %v6410_v43  ;;  %5274 = vrsqrt.f32 %v763_v54  ;;  %v747_v50 = vmul.f32 0.03125, %v711_v0  ;;  %v916_v63 = vadd.f32 %v6511_v49, %v877_v6 }
 0x1b0   : > { %v732_v23 = vmul.f32 0.03125, %v666_v58  ;;  %5276 = vrsqrt.f32 %v778_v16  ;;  %v928_v29 = vpack.c.bf16 %v901_v38, %v900_v62  ;;  %v878_v59 = vmul.f32 %v6504_v26, %v839_v61 }
 0x1b1   : > { %v5267_v42 = vpop.eup %5266  ;;  %v779_v60 = vadd.f32 1e-05, %v747_v50  ;;  %v863_v55 = vmul.f32 %v6504_v26, %v824_v46 }
 0x1b2   : > { %v764_v7 = vadd.f32 1e-05, %v732_v23  ;;  %v5269_v12 = vpop.eup %5268  ;;  %v825_v21 = vmul.f32 %v5267_v42, %v6414_v47  ;;  %v669_v27 = vpop.xlane.xlu1 %668  ;;  %5023 = vmatprep.mubr.msk.bf16.mxu0 %vm428_vm0, %v928_v29  ;;  %v917_v43 = vadd.f32 %v6511_v49, %v878_v59 }
 0x1b3   : > { %v714_v9 = vpop.xlane.xlu0 %713  ;;  %v840_v15 = vmul.f32 %v5269_v12, %v6424_v48  ;;  %5278 = vrsqrt.f32 %v779_v60  ;;  %v733_v51 = vmul.f32 0.03125, %v669_v27  ;;  %v902_v39 = vadd.f32 %v6511_v49, %v863_v55  ;;  %v6625_v27 = vld [vmem:[%s8781_s4] ss:$0 sm:$0xff] }
 0x1b4   : > { %v748_v36 = vmul.f32 0.03125, %v714_v9  ;;  %5280 = vrsqrt.f32 %v764_v7  ;;  %v936_v13 = vpack.c.bf16 %v917_v43, %v916_v63  ;;  %v864_v28 = vmul.f32 %v6504_v26, %v825_v21 }
 0x1b5   : > { %v5271_v47 = vpop.eup %5270  ;;  %v765_v11 = vadd.f32 1e-05, %v733_v51  ;;  %v879_v32 = vmul.f32 %v6504_v26, %v840_v15 }
 0x1b6   : > { %v780_v19 = vadd.f32 1e-05, %v748_v36  ;;  %v5273_v3 = vpop.eup %5272  ;;  %v841_v30 = vmul.f32 %v5271_v47, %v6428_v52  ;;  %v717_v20 = vpop.xlane.xlu1 %716  ;;  %5039 = vmatprep.mubr.msk.bf16.mxu1 %vm428_vm0, %v936_v13  ;;  %v903_v48 = vadd.f32 %v6511_v49, %v864_v28 }
 0x1b7   : > { %v826_v17 = vmul.f32 %v5273_v3, %v6441_v57  ;;  %5282 = vrsqrt.f32 %v765_v11  ;;  %v749_v2 = vmul.f32 0.03125, %v717_v20  ;;  %v918_v33 = vadd.f32 %v6511_v49, %v879_v32 }
 0x1b8   : > { %5284 = vrsqrt.f32 %v780_v19  ;;  %v929_v56 = vpack.c.bf16 %v903_v48, %v902_v39  ;;  %v880_v1 = vmul.f32 %v6504_v26, %v841_v30 }
 0x1b9   : > { %v5275_v53 = vpop.eup %5274  ;;  %v781_v41 = vadd.f32 1e-05, %v749_v2  ;;  %v865_v18 = vmul.f32 %v6504_v26, %v826_v17 }
 0x1ba   : > { %v5277_v52 = vpop.eup %5276  ;;  %v827_v25 = vmul.f32 %v5275_v53, %v6445_v40  ;;  %5024 = vmatmul.mubr.msk.bf16.gmra.mrb[8].mxu0 %vm428_vm0, %v929_v56  ;;  %v919_v34 = vadd.f32 %v6511_v49, %v880_v1 }
 0x1bb   : > { %v842_v57 = vmul.f32 %v5277_v52, %v6458_v5  ;;  %5286 = vrsqrt.f32 %v781_v41  ;;  %v904_v40 = vadd.f32 %v6511_v49, %v865_v18 }
 0x1bc   : > { %v937_v35 = vpack.c.bf16 %v919_v34, %v918_v33  ;;  %v866_v44 = vmul.f32 %v6504_v26, %v827_v25 }
 0x1bd   : > { %v5279_v4 = vpop.eup %5278  ;;  %v881_v16 = vmul.f32 %v6504_v26, %v842_v57 }
 0x1be   : > { %v5281_v45 = vpop.eup %5280  ;;  %v843_v37 = vmul.f32 %v5279_v4, %v6462_v31  ;;  %5040 = vmatmul.mubr.msk.bf16.gmra.mrb[8].mxu1 %vm428_vm0, %v937_v35  ;;  %v905_v54 = vadd.f32 %v6511_v49, %v866_v44 }
 0x1bf   : > { %v828_v22 = vmul.f32 %v5281_v45, %v6472_v10  ;;  %v920_v31 = vadd.f32 %v6511_v49, %v881_v16 }
 0x1c0   : > { %v930_v61 = vpack.c.bf16 %v905_v54, %v904_v40  ;;  %v882_v5 = vmul.f32 %v6504_v26, %v843_v37 }
 0x1c1   : > { %v5283_v0 = vpop.eup %5282  ;;  %v867_v6 = vmul.f32 %v6504_v26, %v828_v22 }
 0x1c2   : > { %v5285_v58 = vpop.eup %5284  ;;  %v829_v62 = vmul.f32 %v5283_v0, %v6476_v8  ;;  %5027 = vmatprep.mubr.msk.bf16.mxu0 %vm428_vm0, %v930_v61  ;;  %v921_v38 = vadd.f32 %v6511_v49, %v882_v5 }
 0x1c3   : > { %v844_v46 = vmul.f32 %v5285_v58, %v6486_v14  ;;  %v906_v8 = vadd.f32 %v6511_v49, %v867_v6 }
 0x1c4   : > { %v938_v50 = vpack.c.bf16 %v921_v38, %v920_v31  ;;  %v868_v10 = vmul.f32 %v6504_v26, %v829_v62 }
 0x1c5   : > { %v5287_v23 = vpop.eup %5286  ;;  %v883_v42 = vmul.f32 %v6504_v26, %v844_v46 }
 0x1c6   : > { %v845_v29 = vmul.f32 %v5287_v23, %v6490_v24  ;;  %5043 = vmatprep.mubr.msk.bf16.mxu1 %vm428_vm0, %v938_v50  ;;  %v907_v59 = vadd.f32 %v6511_v49, %v868_v10 }
 0x1c7   : > { %v922_v14 = vadd.f32 %v6511_v49, %v883_v42 }
 0x1c8   : > { %v931_v60 = vpack.c.bf16 %v907_v59, %v906_v8  ;;  %v884_v7 = vmul.f32 %v6504_v26, %v845_v29 }
 0x1ca   : > { %5028 = vmatmul.mubr.msk.bf16.gmra.mrb[12].mxu0 %vm428_vm0, %v931_v60  ;;  %v923_v12 = vadd.f32 %v6511_v49, %v884_v7 }
 0x1cc   : > { %v939_v21 = vpack.c.bf16 %v923_v12, %v922_v14 }
 0x1ce   : > { %5044 = vmatmul.mubr.msk.bf16.gmra.mrb[12].mxu1 %vm428_vm0, %v939_v21 }
 0x26d   : > { %v5017_v24 = vpop.f32.mrb[0].mxu0 }
 0x26e   : > { %v1045_v9 = vpop.f32.mrb[1].mxu0  ;;  %v1054_v43 = vadd.f32 %v5017_v24, %v6625_v27 }
 0x26f   : > { %v5018_v63 = vpop.f32.mrb[2].mxu0  ;;  %v1046_v15 = vadd.f32 %v6625_v27, %v1045_v9 }
 0x270   : > { %v1057_v26 = vadd.f32 %v5018_v63, %v6625_v27  ;;  %v1048_v55 = vpop.f32.mrb[3].mxu0 }
 0x271   : > { %v1049_v49 = vadd.f32 %v6625_v27, %v1048_v55  ;;  %v5033_v51 = vpop.f32.mrb[0].mxu1 }
 0x272   : > { %v1173_v36 = vpack.c.bf16 %v1057_v26, %v1054_v43  ;;  %v1109_v13 = vpop.f32.mrb[1].mxu1  ;;  %v1118_v11 = vadd.f32 %v5033_v51, %v6625_v27 }
 0x273   : > { %v1172_v28 = vpack.c.bf16 %v1049_v49, %v1046_v15  ;;  %v5034_v47 = vpop.f32.mrb[2].mxu1  ;;  %v1110_v30 = vadd.f32 %v6625_v27, %v1109_v13 }
 0x274   : > { %1190 = vst.msk [vmem:[#allocation2 + $0x8] sm:$0xff] %vm1188_vm1, %v1173_v36  ;;  %v1121_v19 = vadd.f32 %v5034_v47, %v6625_v27  ;;  %v1112_v3 = vpop.f32.mrb[3].mxu1 }
 0x275   : > { %1189 = vst.msk [vmem:[#allocation2] sm:$0xff] %vm1188_vm1, %v1172_v28  ;;  %v1113_v20 = vadd.f32 %v6625_v27, %v1112_v3 }
 0x276   : > { %v1181_v39 = vpack.c.bf16 %v1121_v19, %v1118_v11 }
 0x277   : > { %v1180_v48 = vpack.c.bf16 %v1113_v20, %v1110_v30 }
 0x278   : > { %1198 = vst.msk [vmem:[#allocation2 + $0x48] sm:$0xff] %vm1188_vm1, %v1181_v39 }
 0x279   : > { %1197 = vst.msk [vmem:[#allocation2 + $0x40] sm:$0xff] %vm1188_vm1, %v1180_v48 }
 0x27d   : > { %v5021_v32 = vpop.f32.mrb[4].mxu0 }
 0x27e   : > { %v1061_v17 = vpop.f32.mrb[5].mxu0  ;;  %v1070_v56 = vadd.f32 %v5021_v32, %v6625_v27 }
 0x27f   : > { %v5022_v2 = vpop.f32.mrb[6].mxu0  ;;  %v1062_v41 = vadd.f32 %v6625_v27, %v1061_v17 }
 0x280   : > { %v1073_v1 = vadd.f32 %v5022_v2, %v6625_v27  ;;  %v1064_v53 = vpop.f32.mrb[7].mxu0 }
 0x281   : > { %v1065_v52 = vadd.f32 %v6625_v27, %v1064_v53  ;;  %v5037_v25 = vpop.f32.mrb[4].mxu1 }
 0x282   : > { %v1175_v33 = vpack.c.bf16 %v1073_v1, %v1070_v56  ;;  %v1125_v34 = vpop.f32.mrb[5].mxu1  ;;  %v1134_v35 = vadd.f32 %v5037_v25, %v6625_v27 }
 0x283   : > { %v1174_v18 = vpack.c.bf16 %v1065_v52, %v1062_v41  ;;  %v5038_v57 = vpop.f32.mrb[6].mxu1  ;;  %v1126_v45 = vadd.f32 %v6625_v27, %v1125_v34 }
 0x284   : > { %1192 = vst.msk [vmem:[#allocation2 + $0x18] sm:$0xff] %vm1188_vm1, %v1175_v33  ;;  %v1137_v44 = vadd.f32 %v5038_v57, %v6625_v27  ;;  %v1128_v4 = vpop.f32.mrb[7].mxu1 }
 0x285   : > { %1191 = vst.msk [vmem:[#allocation2 + $0x10] sm:$0xff] %vm1188_vm1, %v1174_v18  ;;  %v1129_v37 = vadd.f32 %v6625_v27, %v1128_v4 }
 0x286   : > { %v1183_v40 = vpack.c.bf16 %v1137_v44, %v1134_v35 }
 0x287   : > { %v1182_v54 = vpack.c.bf16 %v1129_v37, %v1126_v45 }
 0x288   : > { %1200 = vst.msk [vmem:[#allocation2 + $0x58] sm:$0xff] %vm1188_vm1, %v1183_v40 }
 0x289   : > { %1199 = vst.msk [vmem:[#allocation2 + $0x50] sm:$0xff] %vm1188_vm1, %v1182_v54 }
 0x28d   : > { %v5025_v16 = vpop.f32.mrb[8].mxu0 }
 0x28e   : > { %v1077_v22 = vpop.f32.mrb[9].mxu0  ;;  %v1086_v5 = vadd.f32 %v5025_v16, %v6625_v27 }
 0x28f   : > { %v5026_v61 = vpop.f32.mrb[10].mxu0  ;;  %v1078_v62 = vadd.f32 %v6625_v27, %v1077_v22 }
 0x290   : > { %v1089_v0 = vadd.f32 %v5026_v61, %v6625_v27  ;;  %v1080_v58 = vpop.f32.mrb[11].mxu0 }
 0x291   : > { %v1081_v31 = vadd.f32 %v6625_v27, %v1080_v58  ;;  %v5041_v38 = vpop.f32.mrb[8].mxu1 }
 0x292   : > { %v1177_v6 = vpack.c.bf16 %v1089_v0, %v1086_v5  ;;  %v1141_v46 = vpop.f32.mrb[9].mxu1  ;;  %v1150_v23 = vadd.f32 %v5041_v38, %v6625_v27 }
 0x293   : > { %v1176_v50 = vpack.c.bf16 %v1081_v31, %v1078_v62  ;;  %v5042_v10 = vpop.f32.mrb[10].mxu1  ;;  %v1142_v59 = vadd.f32 %v6625_v27, %v1141_v46 }
 0x294   : > { %1194 = vst.msk [vmem:[#allocation2 + $0x28] sm:$0xff] %vm1188_vm1, %v1177_v6  ;;  %v1153_v29 = vadd.f32 %v5042_v10, %v6625_v27  ;;  %v1144_v8 = vpop.f32.mrb[11].mxu1 }
 0x295   : > { %1193 = vst.msk [vmem:[#allocation2 + $0x20] sm:$0xff] %vm1188_vm1, %v1176_v50  ;;  %v1145_v42 = vadd.f32 %v6625_v27, %v1144_v8 }
 0x296   : > { %v1185_v60 = vpack.c.bf16 %v1153_v29, %v1150_v23 }
 0x297   : > { %v1184_v7 = vpack.c.bf16 %v1145_v42, %v1142_v59 }
 0x298   : > { %1202 = vst.msk [vmem:[#allocation2 + $0x68] sm:$0xff] %vm1188_vm1, %v1185_v60 }
 0x299   : > { %1201 = vst.msk [vmem:[#allocation2 + $0x60] sm:$0xff] %vm1188_vm1, %v1184_v7 }
 0x29d   : > { %v5029_v14 = vpop.f32.mrb[12].mxu0 }
 0x29e   : > { %v1093_v12 = vpop.f32.mrb[13].mxu0  ;;  %v1102_v24 = vadd.f32 %v5029_v14, %v6625_v27 }
 0x29f   : > { %v5030_v21 = vpop.f32.mrb[14].mxu0  ;;  %v1094_v43 = vadd.f32 %v6625_v27, %v1093_v12 }
 0x2a0   : > { %v1105_v9 = vadd.f32 %v5030_v21, %v6625_v27  ;;  %v1096_v63 = vpop.f32.mrb[15].mxu0 }
 0x2a1   : > { %v1097_v26 = vadd.f32 %v6625_v27, %v1096_v63  ;;  %v5045_v55 = vpop.f32.mrb[12].mxu1 }
 0x2a2   : > { %v1179_v15 = vpack.c.bf16 %v1105_v9, %v1102_v24  ;;  %v1157_v49 = vpop.f32.mrb[13].mxu1  ;;  %v1166_v13 = vadd.f32 %v5045_v55, %v6625_v27 }
 0x2a3   : > { %v1178_v51 = vpack.c.bf16 %v1097_v26, %v1094_v43  ;;  %v5046_v36 = vpop.f32.mrb[14].mxu1  ;;  %v1158_v11 = vadd.f32 %v6625_v27, %v1157_v49 }
 0x2a4   : > { %1196 = vst.msk [vmem:[#allocation2 + $0x38] sm:$0xff] %vm1188_vm1, %v1179_v15  ;;  %v1169_v28 = vadd.f32 %v5046_v36, %v6625_v27  ;;  %v1160_v47 = vpop.f32.mrb[15].mxu1 }
 0x2a5   : > { %1195 = vst.msk [vmem:[#allocation2 + $0x30] sm:$0xff] %vm1188_vm1, %v1178_v51  ;;  %v1161_v19 = vadd.f32 %v6625_v27, %v1160_v47 }
 0x2a6   : > { %v1187_v3 = vpack.c.bf16 %v1169_v28, %v1166_v13 }
 0x2a7   : > { %v1186_v30 = vpack.c.bf16 %v1161_v19, %v1158_v11 }
 0x2a8   : > { %1204 = vst.msk [vmem:[#allocation2 + $0x78] sm:$0xff] %vm1188_vm1, %v1187_v3 }
 0x2a9   : > { %1203 = vst.msk [vmem:[#allocation2 + $0x70] sm:$0xff] %vm1188_vm1, %v1186_v30 }
 0x2aa PF: > { %v6675_v20 = vld [vmem:[#allocation2] sm:$0xff]  ;;  %v6677_v39 = vld [vmem:[#allocation2 + $0x8] sm:$0xff]  ;;  %s5867_s21 = smov 96   ;;  %v6687_v27 = vld [vmem:[#allocation2 + $0x50] sm:$0xff]  ;;  %s4415_s19 = sshll.u32 %s5846_s11, 7  ;;  %vm1343_vm2 = vcmask 64512  }
 0x2ab   : > { %1311 = vrot.lane.b32.xlu0 %v6675_v20, %s5867_s21  ;;  %1313 = vrot.lane.b32.xlu1 %v6677_v39, %s5867_s21  ;;  %v6681_v48 = vld [vmem:[#allocation2 + $0x40] sm:$0xff]  ;;  %v6683_v32 = vld [vmem:[#allocation2 + $0x48] sm:$0xff]  ;;  %v6689_v17 = vld [vmem:[#allocation2 + $0x10] sm:$0xff]  ;;  %s1214_s23 = sshra.s32 %s4415_s19, 4  ;;  %s5868_s26 = smov 64   ;;  %vm2645_vm3 = vcmask 130112  }
 0x2ac   : > { %v6693_v2 = vld [vmem:[#allocation2 + $0x58] sm:$0xff]  ;;  %v6699_v1 = vld [vmem:[#allocation2 + $0x60] sm:$0xff]  ;;  %v6705_v41 = vld [vmem:[#allocation2 + $0x68] sm:$0xff]  ;;  %s4416_s16 = sshll.u32 %s1214_s23, 3  ;;  %s5869_s14 = smov 88   ;;  %vm3361_vm4 = vcmask 195712  }
 0x2ad   : > { %v6695_v56 = vld [vmem:[#allocation2 + $0x18] sm:$0xff]  ;;  %v6701_v53 = vld [vmem:[#allocation2 + $0x20] sm:$0xff]  ;;  %v6707_v52 = vld [vmem:[#allocation2 + $0x28] sm:$0xff]  ;;  %s6724_s17 = scalar_lea.vmem [#allocation2], %s4416_s16  ;;  %s5870_s22 = smov 80   ;;  %vm4077_vm5 = vcmask 261312  }
 0x2ae   : > { %v6713_v33 = vld [vmem:[#allocation2 + $0x30] sm:$0xff]  ;;  %v6719_v18 = vld [vmem:[#allocation2 + $0x38] sm:$0xff]  ;;  %s5871_s24 = smov 120   ;;  %s5873_s19 = smov 112   ;;  %vm4117_vm6 = vcmask 261120  }
 0x2af   : > { %1327 = vrot.lane.b32.xlu0 %v6681_v48, %s5867_s21  ;;  %1329 = vrot.lane.b32.xlu1 %v6683_v32, %s5867_s21  ;;  %v6717_v34 = vld [vmem:[#allocation2 + $0x78] sm:$0xff]  ;;  %s5874_s23 = smov 104   ;;  %s5875_s16 = smov 56  }
 0x2b0   : > { %v6711_v25 = vld [vmem:[#allocation2 + $0x70] sm:$0xff]  ;;  %v6727_v57 = vld [vmem:[%s6724_s17] sm:$0xff]  ;;  %v6812_v42 = vld [vmem:[%s6724_s17 + $0x8] sm:$0xff]  ;;  %p9080_p4 = scmp.ne.s32.totalorder %s8827_s8, 0 }
 0x2b1   : > { %4633 = vmatprep.mubr.msk.bf16.mxu0 %vm1343_vm2, %v6727_v57  ;;  %v6831_v60 = vld [vmem:[%s6724_s17 + $0x18] sm:$0xff]  ;;  %v6836_v7 = vld [vmem:[%s6724_s17 + $0x10] sm:$0xff]  ;;  %v6859_v14 = vld [vmem:[%s6724_s17 + $0x20] sm:$0xff] }
 0x2b2   : > { %v6868_v12 = vld [vmem:[%s6724_s17 + $0x28] sm:$0xff]  ;;  %v6875_v21 = vld [vmem:[%s6724_s17 + $0x30] sm:$0xff]  ;;  %v6882_v9 = vld [vmem:[%s6724_s17 + $0x38] sm:$0xff]  ;;  %s5876_s17 = smov 48  }
 0x2b3   : > { %1331 = vrot.lane.b32.xlu1 %v6687_v27, %s5867_s21  ;;  %1315 = vrot.lane.b32.xlu0 %v6689_v17, %s5867_s21 }
 0x2b7   : > { %1333 = vrot.lane.b32.xlu1 %v6693_v2, %s5867_s21  ;;  %1317 = vrot.lane.b32.xlu0 %v6695_v56, %s5867_s21 }
 0x2bb   : > { %1335 = vrot.lane.b32.xlu1 %v6699_v1, %s5867_s21  ;;  %1319 = vrot.lane.b32.xlu0 %v6701_v53, %s5867_s21 }
 0x2bf   : > { %1337 = vrot.lane.b32.xlu1 %v6705_v41, %s5867_s21  ;;  %1321 = vrot.lane.b32.xlu0 %v6707_v52, %s5867_s21 }
 0x2c3   : > { %1339 = vrot.lane.b32.xlu1 %v6711_v25, %s5867_s21  ;;  %1323 = vrot.lane.b32.xlu0 %v6713_v33, %s5867_s21 }
 0x2c7   : > { %1341 = vrot.lane.b32.xlu1 %v6717_v34, %s5867_s21  ;;  %1325 = vrot.lane.b32.xlu0 %v6719_v18, %s5867_s21  ;;  %s5872_s21 = smov 72  }
 0x2cb   : > { %1753 = vrot.lane.b32.xlu0 %v6681_v48, %s5868_s26  ;;  %1737 = vrot.lane.b32.xlu1 %v6675_v20, %s5868_s26 }
 0x2cf   : > { %1755 = vrot.lane.b32.xlu0 %v6683_v32, %s5868_s26  ;;  %1757 = vrot.lane.b32.xlu1 %v6687_v27, %s5868_s26 }
 0x2d3   : > { %1739 = vrot.lane.b32.xlu0 %v6677_v39, %s5868_s26  ;;  %1741 = vrot.lane.b32.xlu1 %v6689_v17, %s5868_s26 }
 0x2d7   : > { %1759 = vrot.lane.b32.xlu0 %v6693_v2, %s5868_s26  ;;  %1761 = vrot.lane.b32.xlu1 %v6699_v1, %s5868_s26 }
 0x2db   : > { %1743 = vrot.lane.b32.xlu0 %v6695_v56, %s5868_s26  ;;  %1745 = vrot.lane.b32.xlu1 %v6701_v53, %s5868_s26 }
 0x2df   : > { %1763 = vrot.lane.b32.xlu0 %v6705_v41, %s5868_s26  ;;  %1765 = vrot.lane.b32.xlu1 %v6711_v25, %s5868_s26 }
 0x2e3   : > { %1747 = vrot.lane.b32.xlu0 %v6707_v52, %s5868_s26  ;;  %1749 = vrot.lane.b32.xlu1 %v6713_v33, %s5868_s26 }
 0x2e7   : > { %1767 = vrot.lane.b32.xlu0 %v6717_v34, %s5868_s26  ;;  %2003 = vrot.lane.b32.xlu1 %v6675_v20, %s5869_s14 }
 0x2eb   : > { %1751 = vrot.lane.b32.xlu0 %v6719_v18, %s5868_s26  ;;  %2021 = vrot.lane.b32.xlu1 %v6683_v32, %s5869_s14  ;;  %s5877_s26 = smov 40  }
 0x2ef   : > { %2019 = vrot.lane.b32.xlu0 %v6681_v48, %s5869_s14  ;;  %2023 = vrot.lane.b32.xlu1 %v6687_v27, %s5869_s14 }
 0x2f3   : > { %2005 = vrot.lane.b32.xlu0 %v6677_v39, %s5869_s14  ;;  %2025 = vrot.lane.b32.xlu1 %v6693_v2, %s5869_s14 }
 0x2f7   : > { %2007 = vrot.lane.b32.xlu0 %v6689_v17, %s5869_s14  ;;  %2027 = vrot.lane.b32.xlu1 %v6699_v1, %s5869_s14 }
 0x2fb   : > { %2009 = vrot.lane.b32.xlu0 %v6695_v56, %s5869_s14  ;;  %2029 = vrot.lane.b32.xlu1 %v6705_v41, %s5869_s14 }
 0x2ff   : > { %2011 = vrot.lane.b32.xlu0 %v6701_v53, %s5869_s14  ;;  %2031 = vrot.lane.b32.xlu1 %v6711_v25, %s5869_s14 }
 0x303   : > { %2013 = vrot.lane.b32.xlu0 %v6707_v52, %s5869_s14  ;;  %2033 = vrot.lane.b32.xlu1 %v6717_v34, %s5869_s14 }
 0x307   : > { %2015 = vrot.lane.b32.xlu0 %v6713_v33, %s5869_s14  ;;  %2719 = vrot.lane.b32.xlu1 %v6675_v20, %s5870_s22 }
 0x30b   : > { %2017 = vrot.lane.b32.xlu0 %v6719_v18, %s5869_s14  ;;  %1989 = vrot.lane.b32.xlu1 %v6812_v42, %s5871_s24  ;;  %s5879_s14 = smov 16  }
 0x30f   : > { %1987 = vrot.lane.b32.xlu0 %v6727_v57, %s5871_s24  ;;  %2737 = vrot.lane.b32.xlu1 %v6683_v32, %s5870_s22 }
 0x313   : > { %2735 = vrot.lane.b32.xlu0 %v6681_v48, %s5870_s22  ;;  %2723 = vrot.lane.b32.xlu1 %v6689_v17, %s5870_s22 }
 0x317   : > { %2721 = vrot.lane.b32.xlu0 %v6677_v39, %s5870_s22  ;;  %1993 = vrot.lane.b32.xlu1 %v6831_v60, %s5871_s24 }
 0x31b   : > { %1991 = vrot.lane.b32.xlu0 %v6836_v7, %s5871_s24  ;;  %2741 = vrot.lane.b32.xlu1 %v6693_v2, %s5870_s22 }
 0x31d   : > { %v1312_v35 = vpop.permute.xlu0 %1311  ;;  %v1314_v44 = vpop.permute.xlu1 %1313 }
 0x31e   : > { %v1369_v37 = vsel %vm1343_vm2, %v1312_v35, 0  ;;  %v1372_v54 = vsel %vm1343_vm2, %v1314_v44, 0  ;;  %v1247_v44 = vld [vmem:[%s6075_s25] sm:$0xff] }
 0x31f   : > { %2739 = vrot.lane.b32.xlu0 %v6687_v27, %s5870_s22  ;;  %2727 = vrot.lane.b32.xlu1 %v6701_v53, %s5870_s22 }
 0x321   : > { %v1328_v4 = vpop.permute.xlu0 %1327  ;;  %v1330_v45 = vpop.permute.xlu1 %1329 }
 0x322   : > { %5071 = vmatprep.subr.msk.bf16.mxu0 %vm1343_vm2, %v1328_v4  ;;  %v1248_v4 = vld [vmem:[%s6075_s25 + $0x8] sm:$0xff] }
 0x323   : > { %4618 = vmatpush3.bf16.xpose.msra.mxu0 %v1369_v37  ;;  %2725 = vrot.lane.b32.xlu0 %v6695_v56, %s5870_s22  ;;  %v1264_v37 = vunpack.c.h.bf16 %v1247_v44 }
 0x324   : > { %5072 = vmatprep.subr.msk.bf16.mxu0 %vm1343_vm2, %v1330_v45  ;;  %v1263_v45 = vunpack.c.l.bf16 %v1247_v44 }
 0x325   : > { %v1332_v40 = vpop.permute.xlu1 %1331  ;;  %v1316_v16 = vpop.permute.xlu0 %1315 }
 0x326   : > { %v1375_v22 = vsel %vm1343_vm2, %v1316_v16, 0  ;;  %v1266_v16 = vunpack.c.h.bf16 %v1248_v4 }
 0x327   : > { %1995 = vrot.lane.b32.xlu0 %v6859_v14, %s5871_s24 }
 0x329   : > { %v1334_v61 = vpop.permute.xlu1 %1333  ;;  %v1318_v5 = vpop.permute.xlu0 %1317 }
 0x32a   : > { %v1378_v0 = vsel %vm1343_vm2, %v1318_v5, 0 }
 0x32b   : > { %4620 = vmatpush3.bf16.xpose.msra.mxu0 %v1372_v54 }
 0x32c   : > { %5073 = vmatprep.subr.msk.bf16.mxu0 %vm1343_vm2, %v1332_v40  ;;  %v1265_v40 = vunpack.c.l.bf16 %v1248_v4 }
 0x32d   : > { %v1336_v58 = vpop.permute.xlu1 %1335  ;;  %v1320_v62 = vpop.permute.xlu0 %1319 }
 0x32e   : > { %v1381_v31 = vsel %vm1343_vm2, %v1320_v62, 0 }
 0x331   : > { %v1338_v38 = vpop.permute.xlu1 %1337  ;;  %v1322_v6 = vpop.permute.xlu0 %1321 }
 0x332   : > { %v1384_v46 = vsel %vm1343_vm2, %v1322_v6, 0 }
 0x333   : > { %4622 = vmatpush3.bf16.xpose.msra.mxu0 %v1375_v22 }
 0x334   : > { %5074 = vmatprep.subr.msk.bf16.mxu0 %vm1343_vm2, %v1334_v61 }
 0x335   : > { %v1340_v50 = vpop.permute.xlu1 %1339  ;;  %v1324_v10 = vpop.permute.xlu0 %1323 }
 0x336   : > { %v1387_v23 = vsel %vm1343_vm2, %v1324_v10, 0 }
 0x339   : > { %v1342_v29 = vpop.permute.xlu1 %1341  ;;  %v1326_v8 = vpop.permute.xlu0 %1325 }
 0x33a   : > { %v1390_v59 = vsel %vm1343_vm2, %v1326_v8, 0 }
 0x33b   : > { %4624 = vmatpush3.bf16.xpose.msra.mxu0 %v1378_v0 }
 0x33c   : > { %5075 = vmatprep.subr.msk.bf16.mxu0 %vm1343_vm2, %v1336_v58  ;;  %v1249_v58 = vld [vmem:[%s6075_s25 + $0x10] sm:$0xff] }
 0x33d   : > { %v1754_v24 = vpop.permute.xlu0 %1753  ;;  %v1738_v63 = vpop.permute.xlu1 %1737 }
 0x33e   : > { %4649 = vmatprep.subr.bf16.mxu1 %v1754_v24 }
 0x33f   : > { %4650 = vmatpush3.bf16.msra.mxu1 %v1738_v63 }
 0x341   : > { %v1756_v43 = vpop.permute.xlu0 %1755  ;;  %v1758_v26 = vpop.permute.xlu1 %1757 }
 0x342   : > { %4651 = vmatprep.subr.bf16.mxu1 %v1756_v43 }
 0x343   : > { %4626 = vmatpush3.bf16.xpose.msra.mxu0 %v1381_v31 }
 0x344   : > { %5076 = vmatprep.subr.msk.bf16.mxu0 %vm1343_vm2, %v1338_v38 }
 0x345   : > { %v1740_v55 = vpop.permute.xlu0 %1739  ;;  %v1742_v15 = vpop.permute.xlu1 %1741 }
 0x346   : > { %4652 = vmatpush3.bf16.msra.mxu1 %v1740_v55  ;;  %v1251_v55 = vld [vmem:[%s6075_s25 + $0x20] sm:$0xff] }
 0x347   : > { %4653 = vmatprep.subr.bf16.mxu1 %v1758_v26 }
 0x349   : > { %v1760_v49 = vpop.permute.xlu0 %1759  ;;  %v1762_v51 = vpop.permute.xlu1 %1761 }
 0x34a   : > { %4654 = vmatpush3.bf16.msra.mxu1 %v1742_v15 }
 0x34b   : > { %4628 = vmatpush3.bf16.xpose.msra.mxu0 %v1384_v46  ;;  %4655 = vmatprep.subr.bf16.mxu1 %v1760_v49  ;;  %v1250_v46 = vld [vmem:[%s6075_s25 + $0x18] sm:$0xff] }
 0x34c   : > { %5077 = vmatprep.subr.msk.bf16.mxu0 %vm1343_vm2, %v1340_v50  ;;  %v1267_v50 = vunpack.c.l.bf16 %v1249_v58 }
 0x34d   : > { %v1744_v36 = vpop.permute.xlu0 %1743  ;;  %v1746_v13 = vpop.permute.xlu1 %1745 }
 0x34e   : > { %4656 = vmatpush3.bf16.msra.mxu1 %v1744_v36 }
 0x34f   : > { %4657 = vmatprep.subr.bf16.mxu1 %v1762_v51 }
 0x351   : > { %v1764_v28 = vpop.permute.xlu0 %1763  ;;  %v1766_v11 = vpop.permute.xlu1 %1765 }
 0x352   : > { %4658 = vmatpush3.bf16.msra.mxu1 %v1746_v13  ;;  %v1252_v13 = vld [vmem:[%s6075_s25 + $0x28] sm:$0xff] }
 0x353   : > { %4630 = vmatpush3.bf16.xpose.msra.mxu0 %v1387_v23  ;;  %4659 = vmatprep.subr.bf16.mxu1 %v1764_v28  ;;  %v1268_v23 = vunpack.c.h.bf16 %v1249_v58  ;;  %v1271_v28 = vunpack.c.l.bf16 %v1251_v55 }
 0x354   : > { %5078 = vmatprep.subr.msk.bf16.mxu0 %vm1343_vm2, %v1342_v29  ;;  %v1269_v29 = vunpack.c.l.bf16 %v1250_v46 }
 0x355   : > { %v1748_v47 = vpop.permute.xlu0 %1747  ;;  %v1750_v19 = vpop.permute.xlu1 %1749 }
 0x356   : > { %4660 = vmatpush3.bf16.msra.mxu1 %v1748_v47 }
 0x357   : > { %4661 = vmatprep.subr.bf16.mxu1 %v1766_v11  ;;  %v1272_v11 = vunpack.c.h.bf16 %v1251_v55 }
 0x359   : > { %v1768_v3 = vpop.permute.xlu0 %1767 }
 0x35a   : > { %4662 = vmatpush3.bf16.msra.mxu1 %v1750_v19  ;;  %v1273_v19 = vunpack.c.l.bf16 %v1252_v13 }
 0x35b   : > { %4632 = vmatpush3.bf16.xpose.msra.mxu0 %v1390_v59  ;;  %4663 = vmatprep.subr.bf16.mxu1 %v1768_v3  ;;  %v1270_v59 = vunpack.c.h.bf16 %v1250_v46 }
 0x35d   : > { %v1752_v30 = vpop.permute.xlu0 %1751 }
 0x35e   : > { %4664 = vmatpush3.bf16.msra.mxu1 %v1752_v30  ;;  %v1274_v30 = vunpack.c.h.bf16 %v1252_v13 }
 0x361   : > { %v2020_v35 = vpop.permute.xlu0 %2019 }
 0x362   : > { %4634 = vmatmul.mubr.msk.bf16.vlgmr.msra.gmra.mrb[0].mxu0 %vm1343_vm2, %v6727_v57  ;;  %5079 = vmatprep.subr.msk.bf16.mxu1 %vm1343_vm2, %v2020_v35 }
 0x363   : > { %4635 = vmatprep.mubr.msk.bf16.mxu0 %vm1343_vm2, %v6812_v42 }
 0x36a   : > { %4636 = vmatmul.mubr.msk.bf16.gmra.mrb[4].mxu0 %vm1343_vm2, %v6812_v42 }
 0x36b   : > { %4637 = vmatprep.mubr.msk.bf16.mxu0 %vm1343_vm2, %v6836_v7 }
 0x372   : > { %4638 = vmatmul.mubr.msk.bf16.gmra.mrb[8].mxu0 %vm1343_vm2, %v6836_v7 }
 0x373   : > { %4639 = vmatprep.mubr.msk.bf16.mxu0 %vm1343_vm2, %v6831_v60 }
 0x37a   : > { %4640 = vmatmul.mubr.msk.bf16.gmra.mrb[12].mxu0 %vm1343_vm2, %v6831_v60 }
 0x37b   : > { %4641 = vmatprep.mubr.msk.bf16.mxu0 %vm1343_vm2, %v6859_v14 }
 0x382   : > { %4642 = vmatmul.mubr.msk.bf16.gmra.mrb[16].mxu0 %vm1343_vm2, %v6859_v14 }
 0x383   : > { %4643 = vmatprep.mubr.msk.bf16.mxu0 %vm1343_vm2, %v6868_v12 }
 0x38a   : > { %4644 = vmatmul.mubr.msk.bf16.gmra.mrb[20].mxu0 %vm1343_vm2, %v6868_v12 }
 0x38b   : > { %4645 = vmatprep.mubr.msk.bf16.mxu0 %vm1343_vm2, %v6875_v21 }
 0x392   : > { %4646 = vmatmul.mubr.msk.bf16.gmra.mrb[24].mxu0 %vm1343_vm2, %v6875_v21 }
 0x393   : > { %4647 = vmatprep.mubr.msk.bf16.mxu0 %vm1343_vm2, %v6882_v9 }
 0x39a   : > { %4648 = vmatmul.mubr.msk.bf16.gmra.mrb[28].mxu0 %vm1343_vm2, %v6882_v9 }
 0x435   : > { %v1450_v54 = vpop.f32.mrb[0].mxu0 }
 0x436   : > { %v6893_v22 = vadd.f32 %v1450_v54, %v1263_v45  ;;  %v1452_v61 = vpop.f32.mrb[1].mxu0 }
 0x437   : > { %v6895_v5 = vadd.f32 %v1452_v61, %v1264_v37  ;;  %v1454_v0 = vpop.f32.mrb[2].mxu0  ;;  %v1253_v37 = vld [vmem:[%s6075_s25 + $0x30] sm:$0xff] }
 0x438   : > { %v6898_v62 = vadd.f32 %v1454_v0, %v1265_v40  ;;  %v1456_v31 = vpop.f32.mrb[3].mxu0  ;;  %v1254_v0 = vld [vmem:[%s6075_s25 + $0x38] sm:$0xff]  ;;  %v1275_v58 = vunpack.c.l.bf16 %v1253_v37 }
 0x439   : > { %v6900_v38 = vadd.f32 %v1456_v31, %v1266_v16  ;;  %v1529_v6 = vmax.f32 %v6893_v22, %v6895_v5  ;;  %v1277_v46 = vunpack.c.l.bf16 %v1254_v0 }
 0x43b   : > { %1530 = vmax.xlane.f32.xlu1 %v1529_v6  ;;  %v1532_v10 = vmax.f32 %v6898_v62, %v6900_v38  ;;  %v1276_v6 = vunpack.c.h.bf16 %v1253_v37 }
 0x43d   : > { %v1460_v8 = vpop.f32.mrb[4].mxu0  ;;  %1533 = vmax.xlane.f32.xlu0 %v1532_v10  ;;  %v1278_v10 = vunpack.c.h.bf16 %v1254_v0 }
 0x43e   : > { %v6907_v24 = vadd.f32 %v1460_v8, %v1267_v50  ;;  %v1462_v63 = vpop.f32.mrb[5].mxu0 }
 0x43f   : > { %v6909_v43 = vadd.f32 %v1462_v63, %v1268_v23  ;;  %v1464_v26 = vpop.f32.mrb[6].mxu0  ;;  %v1255_v63 = vld [vmem:[%s6075_s25 + $0x40] sm:$0xff] }
 0x440   : > { %v6912_v15 = vadd.f32 %v1464_v26, %v1269_v29  ;;  %v1466_v49 = vpop.f32.mrb[7].mxu0  ;;  %v1279_v13 = vunpack.c.l.bf16 %v1255_v63 }
 0x441   : > { %v6914_v51 = vadd.f32 %v1466_v49, %v1270_v59  ;;  %v1535_v36 = vmax.f32 %v6907_v24, %v6909_v43 }
 0x443   : > { %1536 = vmax.xlane.f32.xlu1 %v1535_v36  ;;  %v1538_v47 = vmax.f32 %v6912_v15, %v6914_v51 }
 0x445   : > { %v1470_v3 = vpop.f32.mrb[8].mxu0  ;;  %1539 = vmax.xlane.f32.xlu0 %v1538_v47 }
 0x446   : > { %v6921_v35 = vadd.f32 %v1470_v3, %v1271_v28  ;;  %v1472_v44 = vpop.f32.mrb[9].mxu0  ;;  %v1256_v28 = vld [vmem:[%s6075_s25 + $0x48] sm:$0xff] }
 0x447   : > { %v6923_v4 = vadd.f32 %v1472_v44, %v1272_v11  ;;  %v1474_v45 = vpop.f32.mrb[10].mxu0  ;;  %v1280_v11 = vunpack.c.h.bf16 %v1255_v63  ;;  %v1281_v3 = vunpack.c.l.bf16 %v1256_v28 }
 0x448   : > { %v6926_v40 = vadd.f32 %v1474_v45, %v1273_v19  ;;  %v1476_v54 = vpop.f32.mrb[11].mxu0 }
 0x449   : > { %v6928_v16 = vadd.f32 %v1476_v54, %v1274_v30  ;;  %v1541_v61 = vmax.f32 %v6921_v35, %v6923_v4  ;;  %v1282_v30 = vunpack.c.h.bf16 %v1256_v28 }
 0x44b   : > { %1542 = vmax.xlane.f32.xlu1 %v1541_v61  ;;  %v1544_v31 = vmax.f32 %v6926_v40, %v6928_v16  ;;  %v1257_v61 = vld [vmem:[%s6075_s25 + $0x50] sm:$0xff] }
 0x44d   : > { %v1480_v50 = vpop.f32.mrb[12].mxu0  ;;  %1545 = vmax.xlane.f32.xlu0 %v1544_v31 }
 0x44e   : > { %v6935_v23 = vadd.f32 %v1480_v50, %v1275_v58  ;;  %v1482_v29 = vpop.f32.mrb[13].mxu0  ;;  %v1283_v50 = vunpack.c.l.bf16 %v1257_v61 }
 0x44f   : > { %v6937_v8 = vadd.f32 %v1482_v29, %v1276_v6  ;;  %v1484_v59 = vpop.f32.mrb[14].mxu0 }
 0x450   : > { %v6940_v26 = vadd.f32 %v1484_v59, %v1277_v46  ;;  %v1486_v55 = vpop.f32.mrb[15].mxu0  ;;  %v1258_v46 = vld [vmem:[%s6075_s25 + $0x58] sm:$0xff] }
 0x451   : > { %v6942_v49 = vadd.f32 %v1486_v55, %v1278_v10  ;;  %v1547_v36 = vmax.f32 %v6935_v23, %v6937_v8  ;;  %v1284_v10 = vunpack.c.h.bf16 %v1257_v61  ;;  %v1285_v29 = vunpack.c.l.bf16 %v1258_v46 }
 0x452   : > { %v1286_v55 = vunpack.c.h.bf16 %v1258_v46 }
 0x453   : > { %1548 = vmax.xlane.f32.xlu1 %v1547_v36  ;;  %v1550_v47 = vmax.f32 %v6940_v26, %v6942_v49 }
 0x455   : > { %v1490_v19 = vpop.f32.mrb[16].mxu0  ;;  %1551 = vmax.xlane.f32.xlu0 %v1550_v47 }
 0x456   : > { %v6949_v44 = vadd.f32 %v1490_v19, %v1279_v13  ;;  %v1492_v45 = vpop.f32.mrb[17].mxu0 }
 0x457   : > { %v6951_v37 = vadd.f32 %v1492_v45, %v1280_v11  ;;  %v1494_v54 = vpop.f32.mrb[18].mxu0  ;;  %v1259_v11 = vld [vmem:[%s6075_s25 + $0x60] sm:$0xff] }
 0x458   : > { %v1496_v0 = vpop.f32.mrb[19].mxu0  ;;  %v6954_v58 = vadd.f32 %v1494_v54, %v1281_v3  ;;  %v1260_v54 = vld [vmem:[%s6075_s25 + $0x68] sm:$0xff]  ;;  %v1287_v61 = vunpack.c.l.bf16 %v1259_v11 }
 0x459   : > { %v6956_v31 = vadd.f32 %v1496_v0, %v1282_v30  ;;  %v1553_v6 = vmax.f32 %v6949_v44, %v6951_v37  ;;  %v1289_v46 = vunpack.c.l.bf16 %v1260_v54 }
 0x45b   : > { %1554 = vmax.xlane.f32.xlu1 %v1553_v6  ;;  %v1556_v63 = vmax.f32 %v6954_v58, %v6956_v31  ;;  %v1288_v6 = vunpack.c.h.bf16 %v1259_v11  ;;  %v1262_v11 = vld [vmem:[%s6075_s25 + $0x78] sm:$0xff] }
 0x45d   : > { %v1500_v59 = vpop.f32.mrb[20].mxu0 }
 0x45e   : > { %v6963_v36 = vadd.f32 %v1500_v59, %v1283_v50  ;;  %v1502_v13 = vpop.f32.mrb[21].mxu0 }
 0x45f   : > { %v6965_v28 = vadd.f32 %v1502_v13, %v1284_v10  ;;  %v1504_v47 = vpop.f32.mrb[22].mxu0  ;;  %1557 = vmax.xlane.f32.xlu1 %v1556_v63  ;;  %v1290_v10 = vunpack.c.h.bf16 %v1260_v54  ;;  %v1261_v13 = vld [vmem:[%s6075_s25 + $0x70] sm:$0xff] }
 0x460   : > { %v6968_v19 = vadd.f32 %v1504_v47, %v1285_v29  ;;  %v1506_v3 = vpop.f32.mrb[23].mxu0 }
 0x461   : > { %v6970_v30 = vadd.f32 %v1506_v3, %v1286_v55  ;;  %v1559_v45 = vmax.f32 %v6963_v36, %v6965_v28 }
 0x462   : > { %8831 = vst [vmem:[#allocation15_spill] sm:$0xff] %v6968_v19 }
 0x463   : > { %8832 = vst [vmem:[#allocation16_spill] sm:$0xff] %v6970_v30  ;;  %1560 = vmax.xlane.f32.xlu0 %v1559_v45  ;;  %v1562_v0 = vmax.f32 %v6968_v19, %v6970_v30  ;;  %v1291_v19 = vunpack.c.l.bf16 %v1261_v13 }
 0x465   : > { %v1510_v50 = vpop.f32.mrb[24].mxu0  ;;  %1563 = vmax.xlane.f32.xlu1 %v1562_v0  ;;  %v1293_v0 = vunpack.c.l.bf16 %v1262_v11 }
 0x466   : > { %v6977_v29 = vadd.f32 %v1510_v50, %v1287_v61  ;;  %v1512_v59 = vpop.f32.mrb[25].mxu0  ;;  %v1292_v61 = vunpack.c.h.bf16 %v1261_v13  ;;  %v1294_v50 = vunpack.c.h.bf16 %v1262_v11 }
 0x467   : > { %v6979_v63 = vadd.f32 %v1512_v59, %v1288_v6  ;;  %v1514_v55 = vpop.f32.mrb[26].mxu0 }
 0x468   : > { %8833 = vst [vmem:[#allocation17_spill] sm:$0xff] %v6977_v29  ;;  %v6982_v47 = vadd.f32 %v1514_v55, %v1289_v46  ;;  %v1516_v3 = vpop.f32.mrb[27].mxu0 }
 0x469   : > { %8834 = vst [vmem:[#allocation18_spill] sm:$0xff] %v6979_v63  ;;  %v6984_v45 = vadd.f32 %v1516_v3, %v1290_v10  ;;  %v1565_v30 = vmax.f32 %v6977_v29, %v6979_v63  ;;  %v6995_v3 = vpop.permute.xlu1 %2003 }
 0x46b   : > { %1566 = vmax.xlane.f32.xlu0 %v1565_v30  ;;  %v1568_v54 = vmax.f32 %v6982_v47, %v6984_v45 }
 0x46d   : > { %v1520_v6 = vpop.f32.mrb[28].mxu0  ;;  %1569 = vmax.xlane.f32.xlu1 %v1568_v54  ;;  %v7007_v54 = vpop.permute.xlu0 %2005 }
 0x46e   : > { %v6991_v59 = vadd.f32 %v1520_v6, %v1291_v19  ;;  %v1522_v46 = vpop.f32.mrb[29].mxu0  ;;  %v7005_v19 = vpop.permute.xlu1 %2021 }
 0x46f   : > { %v6993_v55 = vadd.f32 %v1522_v46, %v1292_v61  ;;  %v1524_v10 = vpop.f32.mrb[30].mxu0 }
 0x470   : > { %v6997_v63 = vadd.f32 %v1524_v10, %v1293_v0  ;;  %v1526_v29 = vpop.f32.mrb[31].mxu0 }
 0x471   : > { %v6999_v30 = vadd.f32 %v1526_v29, %v1294_v50  ;;  %v1571_v13 = vmax.f32 %v6991_v59, %v6993_v55  ;;  %v7011_v6 = vpop.permute.xlu0 %2007 }
 0x472   : > { %8835 = vst [vmem:[#allocation19_spill] sm:$0xff] %v6997_v63  ;;  %v7009_v61 = vpop.permute.xlu1 %2023 }
 0x473   : > { %8836 = vst [vmem:[#allocation20_spill] sm:$0xff] %v6999_v30  ;;  %1572 = vmax.xlane.f32.xlu0 %v1571_v13  ;;  %v1574_v11 = vmax.f32 %v6997_v63, %v6999_v30 }
 0x475   : > { %1575 = vmax.xlane.f32.xlu1 %v1574_v11  ;;  %v7015_v29 = vpop.permute.xlu0 %2009 }
 0x476   : > { %v7013_v0 = vpop.permute.xlu1 %2025 }
 0x479   : > { %v7023_v46 = vpop.permute.xlu0 %2011 }
 0x47a   : > { %v7019_v50 = vpop.permute.xlu1 %2027 }
 0x47d   : > { %v7033_v13 = vpop.permute.xlu0 %2013 }
 0x47e   : > { %v7029_v10 = vpop.permute.xlu1 %2029  ;;  %8837 = vst [vmem:[#allocation21_spill] sm:$0xff] %v7033_v13 }
 0x481   : > { %v7043_v30 = vpop.permute.xlu0 %2015 }
 0x482   : > { %v7039_v11 = vpop.permute.xlu1 %2031  ;;  %8839 = vst [vmem:[#allocation23_spill] sm:$0xff] %v7043_v30 }
 0x483   : > { %8838 = vst [vmem:[#allocation22_spill] sm:$0xff] %v7039_v11 }
 0x485   : > { %v7053_v63 = vpop.permute.xlu0 %2017 }
 0x486   : > { %1997 = vrot.lane.b32.xlu1 %v6868_v12, %s5871_s24  ;;  %v7049_v13 = vpop.permute.xlu1 %2033  ;;  %8840 = vst [vmem:[#allocation24_spill] sm:$0xff] %v7053_v63 }
 0x489   : > { %2743 = vrot.lane.b32.xlu0 %v6699_v1, %s5870_s22  ;;  %v7063_v11 = vpop.permute.xlu0 %1987 }
 0x48a   : > { %2745 = vrot.lane.b32.xlu1 %v6705_v41, %s5870_s22  ;;  %v7059_v30 = vpop.permute.xlu1 %2719 }
 0x48d   : > { %2729 = vrot.lane.b32.xlu0 %v6707_v52, %s5870_s22  ;;  %v7073_v63 = vpop.permute.xlu0 %2735 }
 0x48e   : > { %2731 = vrot.lane.b32.xlu1 %v6713_v33, %s5870_s22 }
 0x491   : > { %1999 = vrot.lane.b32.xlu0 %v6875_v21, %s5871_s24 }
 0x492   : > { %2001 = vrot.lane.b32.xlu1 %v6882_v9, %s5871_s24  ;;  %s4271_s24 = sshll.u32 %s6091_s18, 4  ;;  %s8700_s24 = int_to_ptr.vmem [resolvable:$true] %s4271_s24 }
 0x495   : > { %2747 = vrot.lane.b32.xlu0 %v6711_v25, %s5870_s22 }
 0x496   : > { %2749 = vrot.lane.b32.xlu1 %v6717_v34, %s5870_s22 }
 0x499   : > { %2733 = vrot.lane.b32.xlu0 %v6719_v18, %s5870_s22 }
 0x49a   : > { %3435 = vrot.lane.b32.xlu1 %v6675_v20, %s5872_s21  ;;  %v7069_v20 = vpop.permute.xlu1 %1989 }
 0x49d   : > { %2703 = vrot.lane.b32.xlu0 %v6727_v57, %s5873_s19 }
 0x49e   : > { %2705 = vrot.lane.b32.xlu1 %v6812_v42, %s5873_s19 }
 0x4a1   : > { %3451 = vrot.lane.b32.xlu0 %v6681_v48, %s5872_s21  ;;  %v7079_v48 = vpop.permute.xlu1 %2737 }
 0x4a2   : > { %3453 = vrot.lane.b32.xlu1 %v6683_v32, %s5872_s21  ;;  %v7083_v32 = vpop.permute.xlu0 %2721 }
 0x4a5   : > { %3437 = vrot.lane.b32.xlu0 %v6677_v39, %s5872_s21  ;;  %v7089_v39 = vpop.permute.xlu1 %2723 }
 0x4a6   : > { %3439 = vrot.lane.b32.xlu1 %v6689_v17, %s5872_s21  ;;  %8841 = vst [vmem:[#allocation25_spill] sm:$0xff] %v7089_v39  ;;  %v7093_v17 = vpop.permute.xlu0 %1991 }
 0x4a7   : > { %8842 = vst [vmem:[#allocation26_spill] sm:$0xff] %v7093_v17 }
 0x4a9   : > { %2707 = vrot.lane.b32.xlu0 %v6836_v7, %s5873_s19 }
 0x4aa   : > { %2709 = vrot.lane.b32.xlu1 %v6831_v60, %s5873_s19 }
 0x4ad   : > { %3455 = vrot.lane.b32.xlu0 %v6687_v27, %s5872_s21  ;;  %v7099_v27 = vpop.permute.xlu1 %1993 }
 0x4ae   : > { %3457 = vrot.lane.b32.xlu1 %v6693_v2, %s5872_s21  ;;  %8843 = vst [vmem:[#allocation27_spill] sm:$0xff] %v7099_v27  ;;  %v7103_v2 = vpop.permute.xlu0 %2739 }
 0x4af   : > { %8844 = vst [vmem:[#allocation28_spill] sm:$0xff] %v7103_v2 }
 0x4b1   : > { %3441 = vrot.lane.b32.xlu0 %v6695_v56, %s5872_s21  ;;  %v7109_v56 = vpop.permute.xlu1 %2741 }
 0x4b2   : > { %3443 = vrot.lane.b32.xlu1 %v6701_v53, %s5872_s21  ;;  %8845 = vst [vmem:[#allocation29_spill] sm:$0xff] %v7109_v56  ;;  %v7113_v53 = vpop.permute.xlu0 %2725 }
 0x4b3   : > { %8846 = vst [vmem:[#allocation30_spill] sm:$0xff] %v7113_v53 }
 0x4b5   : > { %2711 = vrot.lane.b32.xlu0 %v6859_v14, %s5873_s19 }
 0x4b6   : > { %2713 = vrot.lane.b32.xlu1 %v6868_v12, %s5873_s19 }
 0x4b9   : > { %3459 = vrot.lane.b32.xlu0 %v6699_v1, %s5872_s21  ;;  %v7119_v1 = vpop.permute.xlu1 %2727 }
 0x4ba   : > { %3461 = vrot.lane.b32.xlu1 %v6705_v41, %s5872_s21  ;;  %8847 = vst [vmem:[#allocation31_spill] sm:$0xff] %v7119_v1  ;;  %v7123_v41 = vpop.permute.xlu0 %1995 }
 0x4bb   : > { %8848 = vst [vmem:[#allocation32_spill] sm:$0xff] %v7123_v41 }
 0x4bd   : > { %3445 = vrot.lane.b32.xlu0 %v6707_v52, %s5872_s21 }
 0x4be   : > { %3447 = vrot.lane.b32.xlu1 %v6713_v33, %s5872_s21 }
 0x4c1   : > { %2715 = vrot.lane.b32.xlu0 %v6875_v21, %s5873_s19 }
 0x4c2   : > { %2717 = vrot.lane.b32.xlu1 %v6882_v9, %s5873_s19  ;;  %s9079_s19 = sld [smem:[#allocation97_spill]] }
 0x4c5   : > { %3463 = vrot.lane.b32.xlu0 %v6711_v25, %s5872_s21 }
 0x4c6   : > { %3465 = vrot.lane.b32.xlu1 %v6717_v34, %s5872_s21 }
 0x4c8   : > { %v1531_v52 = vpop.xlane.xlu1 %1530 }
 0x4c9   : > { %v1577_v33 = vsub.f32 %v6893_v22, %v1531_v52  ;;  %v1578_v53 = vsub.f32 %v6895_v5, %v1531_v52  ;;  %3449 = vrot.lane.b32.xlu0 %v6719_v18, %s5872_s21 }
 0x4ca   : > { %v1534_v56 = vpop.xlane.xlu0 %1533  ;;  %3421 = vrot.lane.b32.xlu1 %v6812_v42, %s5874_s23  ;;  %v2069_v42 = vsel %vm1343_vm2, %v7015_v29, 0 }
 0x4cb   : > { %v1609_v27 = vmul.f32 1.442695, %v1577_v33  ;;  %v1611_v39 = vmul.f32 1.442695, %v1578_v53  ;;  %v1579_v1 = vsub.f32 %v6898_v62, %v1534_v56  ;;  %v1580_v25 = vsub.f32 %v6900_v38, %v1534_v56 }
 0x4cd   : > { %5290 = vpow2.f32 %v1609_v27  ;;  %v1613_v41 = vmul.f32 1.442695, %v1579_v1  ;;  %v1615_v2 = vmul.f32 1.442695, %v1580_v25  ;;  %3419 = vrot.lane.b32.xlu0 %v6727_v57, %s5874_s23 }
 0x4ce   : > { %5292 = vpow2.f32 %v1611_v39  ;;  %3425 = vrot.lane.b32.xlu1 %v6831_v60, %s5874_s23 }
 0x4cf   : > { %5294 = vpow2.f32 %v1613_v41 }
 0x4d0   : > { %5296 = vpow2.f32 %v1615_v2  ;;  %v1537_v34 = vpop.xlane.xlu1 %1536 }
 0x4d1   : > { %v1581_v22 = vsub.f32 %v6907_v24, %v1537_v34  ;;  %v1582_v5 = vsub.f32 %v6909_v43, %v1537_v34  ;;  %3423 = vrot.lane.b32.xlu0 %v6836_v7, %s5874_s23 }
 0x4d2   : > { %v1540_v52 = vpop.xlane.xlu0 %1539  ;;  %3429 = vrot.lane.b32.xlu1 %v6868_v12, %s5874_s23 }
 0x4d3   : > { %v1617_v18 = vmul.f32 1.442695, %v1581_v22  ;;  %v1619_v17 = vmul.f32 1.442695, %v1582_v5  ;;  %v1583_v53 = vsub.f32 %v6912_v15, %v1540_v52  ;;  %v1584_v62 = vsub.f32 %v6914_v51, %v1540_v52 }
 0x4d5   : > { %5298 = vpow2.f32 %v1617_v18  ;;  %v1621_v38 = vmul.f32 1.442695, %v1583_v53  ;;  %v1623_v27 = vmul.f32 1.442695, %v1584_v62  ;;  %3427 = vrot.lane.b32.xlu0 %v6859_v14, %s5874_s23 }
 0x4d6   : > { %5300 = vpow2.f32 %v1619_v17  ;;  %3433 = vrot.lane.b32.xlu1 %v6882_v9, %s5874_s23 }
 0x4d7   : > { %v5291_v56 = vpop.eup %5290  ;;  %5302 = vpow2.f32 %v1621_v38 }
 0x4d8   : > { %v5293_v39 = vpop.eup %5292  ;;  %5304 = vpow2.f32 %v1623_v27  ;;  %v1543_v2 = vpop.xlane.xlu1 %1542 }
 0x4d9   : > { %v5295_v1 = vpop.eup %5294  ;;  %v1585_v24 = vsub.f32 %v6921_v35, %v1543_v2  ;;  %v1586_v43 = vsub.f32 %v6923_v4, %v1543_v2  ;;  %v7139_v41 = vadd.f32 %v5293_v39, %v5291_v56  ;;  %v2060_v4 = vsel %vm1343_vm2, %v6995_v3, 0  ;;  %3431 = vrot.lane.b32.xlu0 %v6875_v21, %s5874_s23  ;;  %s5880_s23 = smov 24  }
 0x4da   : > { %v5297_v33 = vpop.eup %5296  ;;  %v1546_v15 = vpop.xlane.xlu0 %1545  ;;  %v1721_v25 = vpack.c.bf16 %v5295_v1, %v5291_v56 }
 0x4db   : > { %8849 = vst [vmem:[#allocation33_spill] sm:$0xff] %v7139_v41  ;;  %v1625_v51 = vmul.f32 1.442695, %v1585_v24  ;;  %v1627_v34 = vmul.f32 1.442695, %v1586_v43  ;;  %v1587_v22 = vsub.f32 %v6926_v40, %v1546_v15  ;;  %v1588_v17 = vsub.f32 %v6928_v16, %v1546_v15 }
 0x4dc   : > { %v1722_v5 = vpack.c.bf16 %v5297_v33, %v5293_v39  ;;  %v7143_v52 = vadd.f32 %v5297_v33, %v5295_v1 }
 0x4dd   : > { %5306 = vpow2.f32 %v1625_v51  ;;  %v1629_v18 = vmul.f32 1.442695, %v1587_v22  ;;  %v1631_v53 = vmul.f32 1.442695, %v1588_v17 }
 0x4de   : > { %8850 = vst [vmem:[#allocation34_spill] sm:$0xff] %v7143_v52  ;;  %5308 = vpow2.f32 %v1627_v34  ;;  %1817 = vmatprep.mubr.bf16.mxu1 %v1722_v5 }
 0x4df   : > { %v5299_v35 = vpop.eup %5298  ;;  %5310 = vpow2.f32 %v1629_v18  ;;  %1818 = vmatmul.mubr.bf16.vlgmr.msra.gmra.mrb[0].mxu1 %v1721_v25 }
 0x4e0   : > { %v5301_v62 = vpop.eup %5300  ;;  %5312 = vpow2.f32 %v1631_v53  ;;  %4714 = vmatpush3.bf16.xpose.msra.mxu1 %v2060_v4  ;;  %v1549_v40 = vpop.xlane.xlu1 %1548 }
 0x4e1   : > { %v5303_v38 = vpop.eup %5302  ;;  %5080 = vmatprep.subr.msk.bf16.mxu1 %vm1343_vm2, %v7005_v19  ;;  %v1589_v16 = vsub.f32 %v6935_v23, %v1549_v40  ;;  %v1590_v27 = vsub.f32 %v6937_v8, %v1549_v40  ;;  %v7151_v56 = vadd.f32 %v5301_v62, %v5299_v35  ;;  %v2063_v8 = vsel %vm1343_vm2, %v7007_v54, 0 }
 0x4e2   : > { %v5305_v39 = vpop.eup %5304  ;;  %v1552_v2 = vpop.xlane.xlu0 %1551  ;;  %v1723_v1 = vpack.c.bf16 %v5303_v38, %v5299_v35 }
 0x4e3   : > { %8851 = vst [vmem:[#allocation35_spill] sm:$0xff] %v7151_v56  ;;  %v1633_v3 = vmul.f32 1.442695, %v1589_v16  ;;  %v1635_v24 = vmul.f32 1.442695, %v1590_v27  ;;  %v1591_v43 = vsub.f32 %v6940_v26, %v1552_v2  ;;  %v1592_v33 = vsub.f32 %v6942_v49, %v1552_v2 }
 0x4e4   : > { %v1724_v15 = vpack.c.bf16 %v5305_v39, %v5301_v62  ;;  %v7155_v25 = vadd.f32 %v5305_v39, %v5303_v38 }
 0x4e5   : > { %5314 = vpow2.f32 %v1633_v3  ;;  %v1637_v19 = vmul.f32 1.442695, %v1591_v43  ;;  %v1639_v51 = vmul.f32 1.442695, %v1592_v33 }
 0x4e6   : > { %8852 = vst [vmem:[#allocation36_spill] sm:$0xff] %v7155_v25  ;;  %5316 = vpow2.f32 %v1635_v24  ;;  %1825 = vmatprep.mubr.bf16.mxu1 %v1724_v15 }
 0x4e7   : > { %v5307_v23 = vpop.eup %5306  ;;  %5318 = vpow2.f32 %v1637_v19  ;;  %1826 = vmatmul.mubr.bf16.gmra.mrb[4].mxu1 %v1723_v1 }
 0x4e8   : > { %v5309_v34 = vpop.eup %5308  ;;  %5320 = vpow2.f32 %v1639_v51  ;;  %4716 = vmatpush3.bf16.xpose.msra.mxu1 %v2063_v8  ;;  %v1555_v26 = vpop.xlane.xlu1 %1554 }
 0x4e9   : > { %v5311_v22 = vpop.eup %5310  ;;  %5081 = vmatprep.subr.msk.bf16.mxu1 %vm1343_vm2, %v7009_v61  ;;  %v1593_v49 = vsub.f32 %v6949_v44, %v1555_v26  ;;  %v1594_v17 = vsub.f32 %v6951_v37, %v1555_v26  ;;  %v7163_v5 = vadd.f32 %v5309_v34, %v5307_v23  ;;  %v2066_v37 = vsel %vm1343_vm2, %v7011_v6, 0 }
 0x4ea   : > { %v5313_v18 = vpop.eup %5312  ;;  %v1725_v53 = vpack.c.bf16 %v5311_v22, %v5307_v23 }
 0x4eb   : > { %8853 = vst [vmem:[#allocation37_spill] sm:$0xff] %v7163_v5  ;;  %v1641_v35 = vmul.f32 1.442695, %v1593_v49  ;;  %v1643_v54 = vmul.f32 1.442695, %v1594_v17  ;;  %v1726_v4 = vpack.c.bf16 %v5313_v18, %v5309_v34  ;;  %v7165_v62 = vadd.f32 %v5313_v18, %v5311_v22  ;;  %v8859_v49 = vld [vmem:[#allocation17_spill] sm:$0xff] }
 0x4ec   : > { %v1558_v40 = vpop.xlane.xlu1 %1557  ;;  %v8860_v18 = vld [vmem:[#allocation18_spill] sm:$0xff] }
 0x4ed   : > { %8854 = vst [vmem:[#allocation38_spill] sm:$0xff] %v7165_v62  ;;  %5322 = vpow2.f32 %v1641_v35  ;;  %v1595_v38 = vsub.f32 %v6954_v58, %v1558_v40  ;;  %v1596_v16 = vsub.f32 %v6956_v31, %v1558_v40  ;;  %1833 = vmatprep.mubr.bf16.mxu1 %v1726_v4 }
 0x4ee   : > { %5324 = vpow2.f32 %v1643_v54 }
 0x4ef   : > { %v5315_v44 = vpop.eup %5314  ;;  %v1645_v61 = vmul.f32 1.442695, %v1595_v38  ;;  %v1647_v27 = vmul.f32 1.442695, %v1596_v16  ;;  %1834 = vmatmul.mubr.bf16.gmra.mrb[8].mxu1 %v1725_v53 }
 0x4f0   : > { %v5317_v39 = vpop.eup %5316  ;;  %4718 = vmatpush3.bf16.xpose.msra.mxu1 %v2066_v37  ;;  %v1561_v2 = vpop.xlane.xlu0 %1560 }
 0x4f1   : > { %v5319_v1 = vpop.eup %5318  ;;  %5326 = vpow2.f32 %v1645_v61  ;;  %5082 = vmatprep.subr.msk.bf16.mxu1 %vm1343_vm2, %v7013_v0  ;;  %v1597_v58 = vsub.f32 %v6963_v36, %v1561_v2  ;;  %v1598_v31 = vsub.f32 %v6965_v28, %v1561_v2  ;;  %v7175_v3 = vadd.f32 %v5317_v39, %v5315_v44  ;;  %v8856_v0 = vld [vmem:[#allocation15_spill] sm:$0xff]  ;;  %v8857_v36 = vld [vmem:[#allocation16_spill] sm:$0xff] }
 0x4f2   : > { %v5321_v24 = vpop.eup %5320  ;;  %5328 = vpow2.f32 %v1647_v27  ;;  %v1564_v6 = vpop.xlane.xlu1 %1563  ;;  %v1727_v43 = vpack.c.bf16 %v5319_v1, %v5315_v44 }
 0x4f3   : > { %8855 = vst [vmem:[#allocation39_spill] sm:$0xff] %v7175_v3  ;;  %v1649_v33 = vmul.f32 1.442695, %v1597_v58  ;;  %v1651_v15 = vmul.f32 1.442695, %v1598_v31  ;;  %v1599_v19 = vsub.f32 %v8856_v0, %v1564_v6  ;;  %v1600_v51 = vsub.f32 %v8857_v36, %v1564_v6  ;;  %v7217_v58 = vld [vmem:[#allocation2] sm:$0xff] }
 0x4f4   : > { %v1728_v28 = vpack.c.bf16 %v5321_v24, %v5317_v39  ;;  %v7183_v23 = vadd.f32 %v5321_v24, %v5319_v1  ;;  %2428 = vrot.lane.b32.xlu1 %v7217_v58, %s5875_s16  ;;  %v8864_v24 = vld [vmem:[#allocation19_spill] sm:$0xff] }
 0x4f5   : > { %5330 = vpow2.f32 %v1649_v33  ;;  %v1653_v8 = vmul.f32 1.442695, %v1599_v19  ;;  %v1655_v34 = vmul.f32 1.442695, %v1600_v51  ;;  %v7223_v33 = vld [vmem:[#allocation2 + $0x40] sm:$0xff]  ;;  %v7229_v19 = vld [vmem:[#allocation2 + $0x8] sm:$0xff] }
 0x4f6   : > { %8858 = vst [vmem:[#allocation15_spill] sm:$0xff] %v7183_v23  ;;  %5332 = vpow2.f32 %v1651_v15  ;;  %1841 = vmatprep.mubr.bf16.mxu1 %v1728_v28  ;;  %2444 = vrot.lane.b32.xlu0 %v7223_v33, %s5875_s16  ;;  %v8867_v51 = vld [vmem:[#allocation21_spill] sm:$0xff] }
 0x4f7   : > { %v5323_v57 = vpop.eup %5322  ;;  %5334 = vpow2.f32 %v1653_v8  ;;  %1842 = vmatmul.mubr.bf16.gmra.mrb[12].mxu1 %v1727_v43  ;;  %v2075_v28 = vsel %vm1343_vm2, %v8867_v51, 0 }
 0x4f8   : > { %v5325_v26 = vpop.eup %5324  ;;  %5336 = vpow2.f32 %v1655_v34  ;;  %4720 = vmatpush3.bf16.xpose.msra.mxu1 %v2069_v42  ;;  %v1567_v22 = vpop.xlane.xlu0 %1566  ;;  %2430 = vrot.lane.b32.xlu1 %v7229_v19, %s5875_s16  ;;  %v7235_v34 = vld [vmem:[#allocation2 + $0x48] sm:$0xff] }
 0x4f9   : > { %5083 = vmatprep.subr.msk.bf16.mxu1 %vm1343_vm2, %v7019_v50  ;;  %v1601_v17 = vsub.f32 %v8859_v49, %v1567_v22  ;;  %v1602_v60 = vsub.f32 %v8860_v18, %v1567_v22  ;;  %v7195_v53 = vadd.f32 %v5325_v26, %v5323_v57 }
 0x4fa   : > { %v1570_v35 = vpop.xlane.xlu1 %1569  ;;  %2446 = vrot.lane.b32.xlu0 %v7235_v34, %s5875_s16 }
 0x4fb   : > { %8861 = vst [vmem:[#allocation16_spill] sm:$0xff] %v7195_v53  ;;  %v5327_v29 = vpop.eup %5326  ;;  %v1657_v54 = vmul.f32 1.442695, %v1601_v17  ;;  %v1659_v7 = vmul.f32 1.442695, %v1602_v60  ;;  %v1603_v4 = vsub.f32 %v6982_v47, %v1570_v35  ;;  %v1604_v40 = vsub.f32 %v6984_v45, %v1570_v35  ;;  %v7243_v17 = vld [vmem:[#allocation2 + $0x10] sm:$0xff] }
 0x4fc   : > { %v5329_v50 = vpop.eup %5328  ;;  %v1729_v38 = vpack.c.bf16 %v5327_v29, %v5323_v57  ;;  %v2072_v47 = vsel %vm1343_vm2, %v7023_v46, 0  ;;  %2432 = vrot.lane.b32.xlu1 %v7243_v17, %s5875_s16  ;;  %v7247_v60 = vld [vmem:[#allocation2 + $0x50] sm:$0xff] }
 0x4fd   : > { %5338 = vpow2.f32 %v1657_v54  ;;  %v1661_v16 = vmul.f32 1.442695, %v1603_v4  ;;  %v1663_v44 = vmul.f32 1.442695, %v1604_v40  ;;  %v1730_v37 = vpack.c.bf16 %v5329_v50, %v5325_v26  ;;  %v8868_v26 = vld [vmem:[#allocation22_spill] sm:$0xff] }
 0x4fe   : > { %5340 = vpow2.f32 %v1659_v7  ;;  %v7205_v12 = vadd.f32 %v5329_v50, %v5327_v29  ;;  %2448 = vrot.lane.b32.xlu0 %v7247_v60, %s5875_s16  ;;  %v7253_v29 = vld [vmem:[#allocation2 + $0x18] sm:$0xff]  ;;  %v8871_v7 = vld [vmem:[#allocation23_spill] sm:$0xff] }
 0x4ff   : > { %v5331_v61 = vpop.eup %5330  ;;  %5342 = vpow2.f32 %v1661_v16  ;;  %1849 = vmatprep.mubr.bf16.mxu1 %v1730_v37  ;;  %v2078_v4 = vsel %vm1343_vm2, %v8871_v7, 0  ;;  %v7259_v50 = vld [vmem:[#allocation2 + $0x58] sm:$0xff] }
 0x500   : > { %8862 = vst [vmem:[#allocation17_spill] sm:$0xff] %v7205_v12  ;;  %v5333_v14 = vpop.eup %5332  ;;  %5344 = vpow2.f32 %v1663_v44  ;;  %4722 = vmatpush3.bf16.xpose.msra.mxu1 %v2072_v47  ;;  %v1573_v45 = vpop.xlane.xlu0 %1572  ;;  %2434 = vrot.lane.b32.xlu1 %v7253_v29, %s5875_s16 }
 0x501   : > { %v5335_v27 = vpop.eup %5334  ;;  %5084 = vmatprep.subr.msk.bf16.mxu1 %vm1343_vm2, %v7029_v10  ;;  %1850 = vmatmul.mubr.bf16.gmra.mrb[16].mxu1 %v1729_v38  ;;  %v1605_v9 = vsub.f32 %v6991_v59, %v1573_v45  ;;  %v1606_v39 = vsub.f32 %v6993_v55, %v1573_v45  ;;  %v7215_v2 = vadd.f32 %v5333_v14, %v5331_v61  ;;  %v8865_v10 = vld [vmem:[#allocation20_spill] sm:$0xff] }
 0x502   : > { %v5337_v46 = vpop.eup %5336  ;;  %v1576_v1 = vpop.xlane.xlu1 %1575  ;;  %v1731_v8 = vpack.c.bf16 %v5335_v27, %v5331_v61  ;;  %2450 = vrot.lane.b32.xlu0 %v7259_v50, %s5875_s16  ;;  %v7267_v61 = vld [vmem:[#allocation2 + $0x20] sm:$0xff] }
 0x503   : > { %8863 = vst [vmem:[#allocation18_spill] sm:$0xff] %v7215_v2  ;;  %v1665_v21 = vmul.f32 1.442695, %v1605_v9  ;;  %v1667_v31 = vmul.f32 1.442695, %v1606_v39  ;;  %v1607_v6 = vsub.f32 %v8864_v24, %v1576_v1  ;;  %v1608_v43 = vsub.f32 %v8865_v10, %v1576_v1  ;;  %v5686_v1 = vld [vmem:[#allocation2 + $0x30] sm:$0xff] }
 0x504   : > { %v1732_v59 = vpack.c.bf16 %v5337_v46, %v5333_v14  ;;  %v7227_v55 = vadd.f32 %v5337_v46, %v5335_v27  ;;  %2436 = vrot.lane.b32.xlu1 %v7267_v61, %s5875_s16  ;;  %v7271_v14 = vld [vmem:[#allocation2 + $0x60] sm:$0xff]  ;;  %v7277_v27 = vld [vmem:[#allocation2 + $0x28] sm:$0xff]  ;;  %v5689_v24 = vld [vmem:[#allocation2 + $0x78] sm:$0xff] }
 0x505   : > { %5346 = vpow2.f32 %v1665_v21  ;;  %v1669_v15 = vmul.f32 1.442695, %v1607_v6  ;;  %v1671_v0 = vmul.f32 1.442695, %v1608_v43  ;;  %v7283_v46 = vld [vmem:[#allocation2 + $0x68] sm:$0xff]  ;;  %v5687_v21 = vld [vmem:[#allocation2 + $0x70] sm:$0xff] }
 0x506   : > { %8866 = vst [vmem:[#allocation19_spill] sm:$0xff] %v7227_v55  ;;  %5348 = vpow2.f32 %v1667_v31  ;;  %1857 = vmatprep.mubr.bf16.mxu1 %v1732_v59  ;;  %2452 = vrot.lane.b32.xlu0 %v7271_v14, %s5875_s16  ;;  %v5688_v31 = vld [vmem:[#allocation2 + $0x38] sm:$0xff]  ;;  %v2776_v6 = vsel %vm1343_vm2, %v7059_v30, 0  ;;  %v8876_v30 = vld [vmem:[#allocation28_spill] sm:$0xff] }
 0x507   : > { %v5339_v36 = vpop.eup %5338  ;;  %5350 = vpow2.f32 %v1669_v15  ;;  %v8875_v10 = vld [vmem:[#allocation26_spill] sm:$0xff] }
 0x508   : > { %v5341_v57 = vpop.eup %5340  ;;  %5352 = vpow2.f32 %v1671_v0  ;;  %4724 = vmatpush3.bf16.xpose.msra.mxu1 %v2075_v28  ;;  %2438 = vrot.lane.b32.xlu1 %v7277_v27, %s5875_s16  ;;  %v8880_v59 = vld [vmem:[#allocation30_spill] sm:$0xff]  ;;  %v8881_v0 = vld [vmem:[#allocation32_spill] sm:$0xff] }
 0x509   : > { %v5343_v42 = vpop.eup %5342  ;;  %5085 = vmatprep.subr.msk.bf16.mxu1 %vm1343_vm2, %v8868_v26  ;;  %1858 = vmatmul.mubr.bf16.gmra.mrb[20].mxu1 %v1731_v8  ;;  %v7241_v22 = vadd.f32 %v5341_v57, %v5339_v36  ;;  %v2785_v15 = vsel %vm1343_vm2, %v8880_v59, 0  ;;  %v8882_v8 = vld [vmem:[#allocation31_spill] sm:$0xff] }
 0x50a   : > { %v5345_v49 = vpop.eup %5344  ;;  %v1733_v40 = vpack.c.bf16 %v5343_v42, %v5339_v36  ;;  %2454 = vrot.lane.b32.xlu0 %v7283_v46, %s5875_s16  ;;  %v1998_v36 = vpop.permute.xlu1 %1997 }
 0x50b   : > { %8869 = vst [vmem:[#allocation20_spill] sm:$0xff] %v7241_v22  ;;  %v1734_v18 = vpack.c.bf16 %v5345_v49, %v5341_v57  ;;  %v7251_v35 = vadd.f32 %v5345_v49, %v5343_v42  ;;  %v2788_v57 = vsel %vm1343_vm2, %v8882_v8, 0 }
 0x50c   : > { %2440 = vrot.lane.b32.xlu1 %v5686_v1, %s5875_s16 }
 0x50d   : > { %8870 = vst [vmem:[#allocation21_spill] sm:$0xff] %v7251_v35  ;;  %1865 = vmatprep.mubr.bf16.mxu1 %v1734_v18 }
 0x50e   : > { %2456 = vrot.lane.b32.xlu0 %v5687_v21, %s5875_s16  ;;  %v2746_v28 = vpop.permute.xlu1 %2745 }
 0x50f   : > { %v5347_v54 = vpop.eup %5346 }
 0x510   : > { %v5349_v38 = vpop.eup %5348  ;;  %4726 = vmatpush3.bf16.xpose.msra.mxu1 %v2078_v4  ;;  %2442 = vrot.lane.b32.xlu1 %v5688_v31, %s5875_s16 }
 0x511   : > { %v5351_v16 = vpop.eup %5350  ;;  %5086 = vmatprep.subr.msk.bf16.mxu1 %vm1343_vm2, %v7049_v13  ;;  %1866 = vmatmul.mubr.bf16.gmra.mrb[24].mxu1 %v1733_v40  ;;  %v7265_v44 = vadd.f32 %v5349_v38, %v5347_v54  ;;  %v8874_v13 = vld [vmem:[#allocation24_spill] sm:$0xff] }
 0x512   : > { %v5353_v37 = vpop.eup %5352  ;;  %v2081_v9 = vsel %vm1343_vm2, %v8874_v13, 0  ;;  %v1735_v39 = vpack.c.bf16 %v5351_v16, %v5347_v54  ;;  %2458 = vrot.lane.b32.xlu0 %v5689_v24, %s5875_s16  ;;  %v2732_v26 = vpop.permute.xlu1 %2731  ;;  %s8715_s16 = scalar_lea.sflag [#allocation6], %s350_s13 }
 0x513   : > { %8872 = vst [vmem:[#allocation22_spill] sm:$0xff] %v7265_v44  ;;  %v1736_v47 = vpack.c.bf16 %v5353_v37, %v5349_v38  ;;  %v7275_v45 = vadd.f32 %v5353_v37, %v5351_v16 }
 0x514   : > { %3160 = vrot.lane.b32.xlu1 %v7223_v33, %s5876_s17  ;;  %v2794_v33 = vsel %vm1343_vm2, %v2732_v26, 0 }
 0x515   : > { %8873 = vst [vmem:[#allocation23_spill] sm:$0xff] %v7275_v45  ;;  %1873 = vmatprep.mubr.bf16.mxu1 %v1736_v47 }
 0x516   : > { %3144 = vrot.lane.b32.xlu0 %v7217_v58, %s5876_s17  ;;  %v2002_v54 = vpop.permute.xlu1 %2001 }
 0x518   : > { %4728 = vmatpush3.bf16.xpose.msra.mxu1 %v2081_v9  ;;  %3162 = vrot.lane.b32.xlu1 %v7235_v34, %s5876_s17 }
 0x519   : > { %5087 = vmatprep.subr.msk.bf16.mxu1 %vm1343_vm2, %v7073_v63  ;;  %1874 = vmatmul.mubr.bf16.gmra.mrb[28].mxu1 %v1735_v39  ;;  %v2779_v63 = vsel %vm1343_vm2, %v7083_v32, 0  ;;  %v8879_v32 = vld [vmem:[#allocation29_spill] sm:$0xff] }
 0x51a   : > { %4729 = vmatprep.mubr.msk.bf16.mxu1 %vm1343_vm2, %v7063_v11  ;;  %3164 = vrot.lane.b32.xlu0 %v7247_v60, %s5876_s17  ;;  %v2750_v58 = vpop.permute.xlu1 %2749 }
 0x51c   : > { %3146 = vrot.lane.b32.xlu1 %v7229_v19, %s5876_s17 }
 0x51e   : > { %3166 = vrot.lane.b32.xlu0 %v7259_v50, %s5876_s17  ;;  %v3436_v34 = vpop.permute.xlu1 %3435 }
 0x51f   : > { %v3492_v38 = vsel %vm1343_vm2, %v3436_v34, 0 }
 0x520   : > { %3148 = vrot.lane.b32.xlu1 %v7243_v17, %s5876_s17 }
 0x521   : > { %4730 = vmatmul.mubr.msk.bf16.vlgmr.msra.gmra.mrb[32].mxu1 %vm1343_vm2, %v7063_v11  ;;  %v8877_v11 = vld [vmem:[#allocation25_spill] sm:$0xff] }
 0x522   : > { %4810 = vmatpush3.bf16.xpose.msra.mxu1 %v2776_v6  ;;  %4731 = vmatprep.mubr.msk.bf16.mxu1 %vm1343_vm2, %v7069_v20  ;;  %v2782_v43 = vsel %vm1343_vm2, %v8877_v11, 0  ;;  %v2706_v40 = vpop.permute.xlu1 %2705 }
 0x523   : > { %5088 = vmatprep.subr.msk.bf16.mxu1 %vm1343_vm2, %v7079_v48  ;;  %v8878_v48 = vld [vmem:[#allocation27_spill] sm:$0xff] }
 0x524   : > { %3150 = vrot.lane.b32.xlu1 %v7253_v29, %s5876_s17 }
 0x526   : > { %v3454_v16 = vpop.permute.xlu1 %3453 }
 0x529   : > { %4732 = vmatmul.mubr.msk.bf16.gmra.mrb[36].mxu1 %vm1343_vm2, %v7069_v20  ;;  %v2744_v20 = vpop.permute.xlu0 %2743 }
 0x52a   : > { %4812 = vmatpush3.bf16.xpose.msra.mxu1 %v2779_v63  ;;  %4733 = vmatprep.mubr.msk.bf16.mxu1 %vm1343_vm2, %v8875_v10  ;;  %v3440_v29 = vpop.permute.xlu1 %3439 }
 0x52b   : > { %5089 = vmatprep.subr.msk.bf16.mxu1 %vm1343_vm2, %v8876_v30  ;;  %v3498_v39 = vsel %vm1343_vm2, %v3440_v29, 0 }
 0x52d   : > { %v2730_v51 = vpop.permute.xlu0 %2729 }
 0x52e   : > { %v2791_v49 = vsel %vm1343_vm2, %v2730_v51, 0  ;;  %v2710_v13 = vpop.permute.xlu1 %2709 }
 0x531   : > { %4734 = vmatmul.mubr.msk.bf16.gmra.mrb[40].mxu1 %vm1343_vm2, %v8875_v10  ;;  %v2000_v42 = vpop.permute.xlu0 %1999 }
 0x532   : > { %4814 = vmatpush3.bf16.xpose.msra.mxu1 %v2782_v43  ;;  %4735 = vmatprep.mubr.msk.bf16.mxu1 %vm1343_vm2, %v8878_v48  ;;  %v3458_v1 = vpop.permute.xlu1 %3457 }
 0x533   : > { %5090 = vmatprep.subr.msk.bf16.mxu1 %vm1343_vm2, %v8879_v32 }
 0x535   : > { %v2748_v18 = vpop.permute.xlu0 %2747 }
 0x536   : > { %v3444_v31 = vpop.permute.xlu1 %3443 }
 0x537   : > { %v3504_v30 = vsel %vm1343_vm2, %v3444_v31, 0 }
 0x539   : > { %4736 = vmatmul.mubr.msk.bf16.gmra.mrb[44].mxu1 %vm1343_vm2, %v8878_v48  ;;  %v2734_v7 = vpop.permute.xlu0 %2733 }
 0x53a   : > { %4816 = vmatpush3.bf16.xpose.msra.mxu1 %v2785_v15  ;;  %4737 = vmatprep.mubr.msk.bf16.mxu1 %vm1343_vm2, %v8881_v0  ;;  %v2797_v60 = vsel %vm1343_vm2, %v2734_v7, 0  ;;  %v2714_v63 = vpop.permute.xlu1 %2713 }
 0x53b   : > { %5091 = vmatprep.subr.msk.bf16.mxu1 %vm1343_vm2, %v2744_v20 }
 0x53d   : > { %v2704_v4 = vpop.permute.xlu0 %2703 }
 0x53e   : > { %v3462_v11 = vpop.permute.xlu1 %3461 }
 0x541   : > { %4738 = vmatmul.mubr.msk.bf16.gmra.mrb[48].mxu1 %vm1343_vm2, %v8881_v0  ;;  %v3452_v19 = vpop.permute.xlu0 %3451 }
 0x542   : > { %4818 = vmatpush3.bf16.xpose.msra.mxu1 %v2788_v57  ;;  %4739 = vmatprep.mubr.msk.bf16.mxu1 %vm1343_vm2, %v1998_v36  ;;  %v3448_v48 = vpop.permute.xlu1 %3447 }
 0x543   : > { %5092 = vmatprep.subr.msk.bf16.mxu1 %vm1343_vm2, %v2746_v28  ;;  %v3510_v15 = vsel %vm1343_vm2, %v3448_v48, 0 }
 0x545   : > { %v3438_v50 = vpop.permute.xlu0 %3437 }
 0x546   : > { %v3495_v37 = vsel %vm1343_vm2, %v3438_v50, 0  ;;  %v2718_v59 = vpop.permute.xlu1 %2717 }
 0x549   : > { %4740 = vmatmul.mubr.msk.bf16.gmra.mrb[52].mxu1 %vm1343_vm2, %v1998_v36  ;;  %v2708_v17 = vpop.permute.xlu0 %2707 }
 0x54a   : > { %4820 = vmatpush3.bf16.xpose.msra.mxu1 %v2791_v49  ;;  %4741 = vmatprep.mubr.msk.bf16.mxu1 %vm1343_vm2, %v2000_v42  ;;  %v3466_v0 = vpop.permute.xlu1 %3465 }
 0x54b   : > { %5093 = vmatprep.subr.msk.bf16.mxu1 %vm1343_vm2, %v2748_v18 }
 0x54d   : > { %v3456_v47 = vpop.permute.xlu0 %3455 }
 0x54e   : > { %v3422_v8 = vpop.permute.xlu1 %3421 }
 0x551   : > { %4742 = vmatmul.mubr.msk.bf16.gmra.mrb[56].mxu1 %vm1343_vm2, %v2000_v42  ;;  %v3442_v9 = vpop.permute.xlu0 %3441 }
 0x552   : > { %4822 = vmatpush3.bf16.xpose.msra.mxu1 %v2794_v33  ;;  %4743 = vmatprep.mubr.msk.bf16.mxu1 %vm1343_vm2, %v2002_v54  ;;  %v3501_v24 = vsel %vm1343_vm2, %v3442_v9, 0  ;;  %v3426_v42 = vpop.permute.xlu1 %3425 }
 0x553   : > { %5094 = vmatprep.subr.msk.bf16.mxu1 %vm1343_vm2, %v2750_v58 }
 0x555   : > { %v2712_v21 = vpop.permute.xlu0 %2711 }
 0x559   : > { %4744 = vmatmul.mubr.msk.bf16.gmra.mrb[60].mxu1 %vm1343_vm2, %v2002_v54  ;;  %v3460_v6 = vpop.permute.xlu0 %3459 }
 0x55a   : > { %4824 = vmatpush3.bf16.xpose.msra.mxu1 %v2797_v60  ;;  %4825 = vmatprep.mubr.msk.bf16.mxu1 %vm1343_vm2, %v2704_v4 }
 0x55b   : > { %5095 = vmatprep.subr.msk.bf16.mxu1 %vm1343_vm2, %v3452_v19 }
 0x55d   : > { %v3446_v10 = vpop.permute.xlu0 %3445 }
 0x55e   : > { %v3507_v32 = vsel %vm1343_vm2, %v3446_v10, 0 }
 0x561   : > { %4826 = vmatmul.mubr.msk.bf16.vlgmr.msra.gmra.mrb[64].mxu1 %vm1343_vm2, %v2704_v4  ;;  %v2716_v43 = vpop.permute.xlu0 %2715 }
 0x562   : > { %4906 = vmatpush3.bf16.xpose.msra.mxu1 %v3492_v38  ;;  %4827 = vmatprep.mubr.msk.bf16.mxu1 %vm1343_vm2, %v2706_v40  ;;  %v3430_v38 = vpop.permute.xlu1 %3429 }
 0x563   : > { %5096 = vmatprep.subr.msk.bf16.mxu1 %vm1343_vm2, %v3454_v16 }
 0x565   : > { %v3464_v20 = vpop.permute.xlu0 %3463 }
 0x569   : > { %4828 = vmatmul.mubr.msk.bf16.gmra.mrb[68].mxu1 %vm1343_vm2, %v2706_v40  ;;  %v3450_v36 = vpop.permute.xlu0 %3449 }
 0x56a   : > { %4908 = vmatpush3.bf16.xpose.msra.mxu1 %v3495_v37  ;;  %4829 = vmatprep.mubr.msk.bf16.mxu1 %vm1343_vm2, %v2708_v17  ;;  %v3513_v51 = vsel %vm1343_vm2, %v3450_v36, 0  ;;  %v3434_v37 = vpop.permute.xlu1 %3433 }
 0x56b   : > { %5097 = vmatprep.subr.msk.bf16.mxu1 %vm1343_vm2, %v3456_v47 }
 0x56d   : > { %v3420_v28 = vpop.permute.xlu0 %3419 }
 0x571   : > { %4830 = vmatmul.mubr.msk.bf16.gmra.mrb[72].mxu1 %vm1343_vm2, %v2708_v17  ;;  %v3424_v57 = vpop.permute.xlu0 %3423 }
 0x572   : > { %4831 = vmatprep.mubr.msk.bf16.mxu1 %vm1343_vm2, %v2710_v13  ;;  %4910 = vmatpush3.bf16.xpose.msra.mxu1 %v3498_v39 }
 0x573   : > { %5098 = vmatprep.subr.msk.bf16.mxu1 %vm1343_vm2, %v3458_v1 }
 0x575   : > { %v3428_v58 = vpop.permute.xlu0 %3427 }
 0x579   : > { %4832 = vmatmul.mubr.msk.bf16.gmra.mrb[76].mxu1 %vm1343_vm2, %v2710_v13  ;;  %v3432_v17 = vpop.permute.xlu0 %3431 }
 0x57a   : > { %4912 = vmatpush3.bf16.xpose.msra.mxu1 %v3501_v24  ;;  %4833 = vmatprep.mubr.msk.bf16.mxu1 %vm1343_vm2, %v2712_v21 }
 0x57b   : > { %5099 = vmatprep.subr.msk.bf16.mxu1 %vm1343_vm2, %v3460_v6 }
 0x57d   : > { %v2445_v1 = vpop.permute.xlu0 %2444 }
 0x57e   : > { %4745 = vmatprep.subr.bf16.mxu0 %v2445_v1 }
 0x581   : > { %4834 = vmatmul.mubr.msk.bf16.gmra.mrb[80].mxu1 %vm1343_vm2, %v2712_v21  ;;  %v2429_v21 = vpop.permute.xlu1 %2428  ;;  %v2447_v24 = vpop.permute.xlu0 %2446 }
 0x582   : > { %4914 = vmatpush3.bf16.xpose.msra.mxu1 %v3504_v30  ;;  %4835 = vmatprep.mubr.msk.bf16.mxu1 %vm1343_vm2, %v2714_v63 }
 0x583   : > { %5100 = vmatprep.subr.msk.bf16.mxu1 %vm1343_vm2, %v3462_v11  ;;  %4746 = vmatpush3.bf16.msra.mxu0 %v2429_v21 }
 0x584   : > { %4747 = vmatprep.subr.bf16.mxu0 %v2447_v24 }
 0x585   : > { %v2449_v48 = vpop.permute.xlu0 %2448 }
 0x589   : > { %4836 = vmatmul.mubr.msk.bf16.gmra.mrb[84].mxu1 %vm1343_vm2, %v2714_v63  ;;  %v2431_v63 = vpop.permute.xlu1 %2430 }
 0x58a   : > { %4916 = vmatpush3.bf16.xpose.msra.mxu1 %v3507_v32  ;;  %4837 = vmatprep.mubr.msk.bf16.mxu1 %vm1343_vm2, %v2716_v43 }
 0x58b   : > { %5101 = vmatprep.subr.msk.bf16.mxu1 %vm1343_vm2, %v3464_v20  ;;  %4748 = vmatpush3.bf16.msra.mxu0 %v2431_v63  ;;  %v2451_v20 = vpop.permute.xlu0 %2450 }
 0x58c   : > { %4749 = vmatprep.subr.bf16.mxu0 %v2449_v48 }
 0x58d   : > { %v2433_v32 = vpop.permute.xlu1 %2432 }
 0x58f   : > { %4750 = vmatpush3.bf16.msra.mxu0 %v2433_v32 }
 0x590   : > { %4751 = vmatprep.subr.bf16.mxu0 %v2451_v20  ;;  %v4428_v20 = vld [vmem:[%s6075_s25 + $0x88] sm:$0xff] }
 0x591   : > { %4838 = vmatmul.mubr.msk.bf16.gmra.mrb[88].mxu1 %vm1343_vm2, %v2716_v43 }
 0x592   : > { %4918 = vmatpush3.bf16.xpose.msra.mxu1 %v3510_v15  ;;  %4839 = vmatprep.mubr.msk.bf16.mxu1 %vm1343_vm2, %v2718_v59 }
 0x593   : > { %5102 = vmatprep.subr.msk.bf16.mxu1 %vm1343_vm2, %v3466_v0 }
 0x599   : > { %4840 = vmatmul.mubr.msk.bf16.gmra.mrb[92].mxu1 %vm1343_vm2, %v2718_v59  ;;  %v2435_v59 = vpop.permute.xlu1 %2434 }
 0x59a   : > { %4920 = vmatpush3.bf16.xpose.msra.mxu1 %v3513_v51  ;;  %4921 = vmatprep.mubr.msk.bf16.mxu1 %vm1343_vm2, %v3420_v28 }
 0x59b   : > { %4752 = vmatpush3.bf16.msra.mxu0 %v2435_v59 }
 0x5a1   : > { %4922 = vmatmul.mubr.msk.bf16.vlgmr.msra.gmra.mrb[96].mxu1 %vm1343_vm2, %v3420_v28  ;;  %v2453_v28 = vpop.permute.xlu0 %2452 }
 0x5a2   : > { %4923 = vmatprep.mubr.msk.bf16.mxu1 %vm1343_vm2, %v3422_v8  ;;  %4753 = vmatprep.subr.bf16.mxu0 %v2453_v28  ;;  %v1950_v28 = vunpack.c.h.bf16 %v4428_v20 }
 0x5a9   : > { %4924 = vmatmul.mubr.msk.bf16.gmra.mrb[100].mxu1 %vm1343_vm2, %v3422_v8 }
 0x5aa   : > { %4925 = vmatprep.mubr.msk.bf16.mxu1 %vm1343_vm2, %v3424_v57 }
 0x5b1   : > { %4926 = vmatmul.mubr.msk.bf16.gmra.mrb[104].mxu1 %vm1343_vm2, %v3424_v57  ;;  %v2437_v57 = vpop.permute.xlu1 %2436 }
 0x5b2   : > { %v4665_v26 = vpop.f32.mrb[0].mxu1  ;;  %4927 = vmatprep.mubr.msk.bf16.mxu1 %vm1343_vm2, %v3426_v42  ;;  %4754 = vmatpush3.bf16.msra.mxu0 %v2437_v57 }
 0x5b3   : > { %v4666_v49 = vpop.f32.mrb[1].mxu1 }
 0x5b4   : > { %v7397_v18 = vadd.f32 %v4666_v49, %v4665_v26  ;;  %v4668_v54 = vpop.f32.mrb[2].mxu1  ;;  %v2455_v26 = vpop.permute.xlu0 %2454 }
 0x5b5   : > { %v4669_v7 = vpop.f32.mrb[3].mxu1  ;;  %v2439_v49 = vpop.permute.xlu1 %2438  ;;  %4755 = vmatprep.subr.bf16.mxu0 %v2455_v26 }
 0x5b6   : > { %8883 = vst [vmem:[#allocation24_spill] sm:$0xff] %v7397_v18  ;;  %v7399_v33 = vadd.f32 %v4669_v7, %v4668_v54  ;;  %4756 = vmatpush3.bf16.msra.mxu0 %v2439_v49 }
 0x5b8   : > { %8884 = vst [vmem:[#allocation26_spill] sm:$0xff] %v7399_v33 }
 0x5b9   : > { %4928 = vmatmul.mubr.msk.bf16.gmra.mrb[108].mxu1 %vm1343_vm2, %v3426_v42 }
 0x5ba   : > { %v4671_v4 = vpop.f32.mrb[4].mxu1  ;;  %4929 = vmatprep.mubr.msk.bf16.mxu1 %vm1343_vm2, %v3428_v58 }
 0x5bb   : > { %v4672_v34 = vpop.f32.mrb[5].mxu1 }
 0x5bc   : > { %v7403_v60 = vadd.f32 %v4672_v34, %v4671_v4  ;;  %v4674_v19 = vpop.f32.mrb[6].mxu1  ;;  %v2457_v34 = vpop.permute.xlu0 %2456 }
 0x5bd   : > { %v4675_v40 = vpop.f32.mrb[7].mxu1  ;;  %4757 = vmatprep.subr.bf16.mxu0 %v2457_v34 }
 0x5be   : > { %8885 = vst [vmem:[#allocation28_spill] sm:$0xff] %v7403_v60  ;;  %v7405_v50 = vadd.f32 %v4675_v40, %v4674_v19  ;;  %v2441_v40 = vpop.permute.xlu1 %2440 }
 0x5bf   : > { %4758 = vmatpush3.bf16.msra.mxu0 %v2441_v40  ;;  %v4430_v40 = vld [vmem:[%s6075_s25 + $0x98] sm:$0xff] }
 0x5c0   : > { %8886 = vst [vmem:[#allocation25_spill] sm:$0xff] %v7405_v50  ;;  %v4442_v50 = vld [vmem:[%s6075_s25 + $0xf8] sm:$0xff] }
 0x5c1   : > { %4930 = vmatmul.mubr.msk.bf16.gmra.mrb[112].mxu1 %vm1343_vm2, %v3428_v58 }
 0x5c2   : > { %v4677_v16 = vpop.f32.mrb[8].mxu1  ;;  %4931 = vmatprep.mubr.msk.bf16.mxu1 %vm1343_vm2, %v3430_v38 }
 0x5c3   : > { %v4678_v29 = vpop.f32.mrb[9].mxu1 }
 0x5c4   : > { %v7409_v47 = vadd.f32 %v4678_v29, %v4677_v16  ;;  %v4680_v13 = vpop.f32.mrb[10].mxu1  ;;  %v2459_v16 = vpop.permute.xlu0 %2458 }
 0x5c5   : > { %v4681_v9 = vpop.f32.mrb[11].mxu1  ;;  %4759 = vmatprep.subr.bf16.mxu0 %v2459_v16 }
 0x5c6   : > { %8887 = vst [vmem:[#allocation27_spill] sm:$0xff] %v7409_v47  ;;  %v7411_v39 = vadd.f32 %v4681_v9, %v4680_v13 }
 0x5c8   : > { %8888 = vst [vmem:[#allocation29_spill] sm:$0xff] %v7411_v39 }
 0x5c9   : > { %4932 = vmatmul.mubr.msk.bf16.gmra.mrb[116].mxu1 %vm1343_vm2, %v3430_v38 }
 0x5ca   : > { %v4683_v31 = vpop.f32.mrb[12].mxu1  ;;  %4933 = vmatprep.mubr.msk.bf16.mxu1 %vm1343_vm2, %v3432_v17 }
 0x5cb   : > { %v4684_v6 = vpop.f32.mrb[13].mxu1 }
 0x5cc   : > { %v7415_v10 = vadd.f32 %v4684_v6, %v4683_v31  ;;  %v4686_v30 = vpop.f32.mrb[14].mxu1 }
 0x5cd   : > { %v4687_v11 = vpop.f32.mrb[15].mxu1 }
 0x5ce   : > { %8889 = vst [vmem:[#allocation30_spill] sm:$0xff] %v7415_v10  ;;  %v7417_v43 = vadd.f32 %v4687_v11, %v4686_v30  ;;  %v4427_v11 = vld [vmem:[%s6075_s25 + $0x80] sm:$0xff] }
 0x5cf   : > { %v1947_v59 = vunpack.c.l.bf16 %v4427_v11 }
 0x5d0   : > { %8890 = vst [vmem:[#allocation32_spill] sm:$0xff] %v7417_v43 }
 0x5d1   : > { %4934 = vmatmul.mubr.msk.bf16.gmra.mrb[120].mxu1 %vm1343_vm2, %v3432_v17  ;;  %v2443_v17 = vpop.permute.xlu1 %2442 }
 0x5d2   : > { %4935 = vmatprep.mubr.msk.bf16.mxu1 %vm1343_vm2, %v3434_v37  ;;  %4760 = vmatpush3.bf16.msra.mxu0 %v2443_v17 }
 0x5d4   : > { %v4689_v15 = vpop.f32.mrb[16].mxu1 }
 0x5d5   : > { %v4690_v0 = vpop.f32.mrb[17].mxu1  ;;  %v3161_v21 = vpop.permute.xlu1 %3160 }
 0x5d6   : > { %v7421_v36 = vadd.f32 %v4690_v0, %v4689_v15  ;;  %v4692_v51 = vpop.f32.mrb[18].mxu1  ;;  %4841 = vmatprep.subr.bf16.mxu0 %v3161_v21  ;;  %v1948_v15 = vunpack.c.h.bf16 %v4427_v11  ;;  %v1949_v0 = vunpack.c.l.bf16 %v4428_v20  ;;  %v4431_v11 = vld [vmem:[%s6075_s25 + $0xa0] sm:$0xff] }
 0x5d7   : > { %v4693_v8 = vpop.f32.mrb[19].mxu1 }
 0x5d8   : > { %8891 = vst [vmem:[#allocation31_spill] sm:$0xff] %v7421_v36  ;;  %v7423_v42 = vadd.f32 %v4693_v8, %v4692_v51 }
 0x5d9   : > { %4936 = vmatmul.mubr.msk.bf16.gmra.mrb[124].mxu1 %vm1343_vm2, %v3434_v37 }
 0x5da   : > { %8892 = vst [vmem:[#allocation40_spill] sm:$0xff] %v7423_v42 }
 0x5dc   : > { %v4695_v54 = vpop.f32.mrb[20].mxu1 }
 0x5dd   : > { %v4696_v7 = vpop.f32.mrb[21].mxu1 }
 0x5de   : > { %v7426_v58 = vadd.f32 %v4696_v7, %v4695_v54  ;;  %v4698_v4 = vpop.f32.mrb[22].mxu1  ;;  %v4429_v54 = vld [vmem:[%s6075_s25 + $0x90] sm:$0xff] }
 0x5df   : > { %v4699_v19 = vpop.f32.mrb[23].mxu1  ;;  %v1951_v16 = vunpack.c.l.bf16 %v4429_v54 }
 0x5e0   : > { %8893 = vst [vmem:[#allocation41_spill] sm:$0xff] %v7426_v58  ;;  %v7428_v38 = vadd.f32 %v4699_v19, %v4698_v4  ;;  %v4438_v58 = vld [vmem:[%s6075_s25 + $0xd8] sm:$0xff] }
 0x5e2   : > { %8894 = vst [vmem:[#allocation42_spill] sm:$0xff] %v7428_v38 }
 0x5e4   : > { %v4701_v29 = vpop.f32.mrb[24].mxu1 }
 0x5e5   : > { %v4702_v37 = vpop.f32.mrb[25].mxu1 }
 0x5e6   : > { %v7430_v13 = vadd.f32 %v4702_v37, %v4701_v29  ;;  %v4704_v9 = vpop.f32.mrb[26].mxu1  ;;  %v1952_v29 = vunpack.c.h.bf16 %v4429_v54  ;;  %v1953_v37 = vunpack.c.l.bf16 %v4430_v40 }
 0x5e7   : > { %v4705_v1 = vpop.f32.mrb[27].mxu1 }
 0x5e8   : > { %8895 = vst [vmem:[#allocation43_spill] sm:$0xff] %v7430_v13  ;;  %v7432_v31 = vadd.f32 %v4705_v1, %v4704_v9  ;;  %v1954_v1 = vunpack.c.h.bf16 %v4430_v40 }
 0x5ea   : > { %8896 = vst [vmem:[#allocation44_spill] sm:$0xff] %v7432_v31 }
 0x5ec   : > { %v4707_v24 = vpop.f32.mrb[28].mxu1 }
 0x5ed   : > { %v4708_v6 = vpop.f32.mrb[29].mxu1 }
 0x5ee   : > { %v7434_v63 = vadd.f32 %v4708_v6, %v4707_v24  ;;  %v4710_v30 = vpop.f32.mrb[30].mxu1 }
 0x5ef   : > { %v4711_v48 = vpop.f32.mrb[31].mxu1 }
 0x5f0   : > { %8897 = vst [vmem:[#allocation45_spill] sm:$0xff] %v7434_v63  ;;  %v7437_v32 = vadd.f32 %v4711_v48, %v4710_v30 }
 0x5f2   : > { %8898 = vst [vmem:[#allocation46_spill] sm:$0xff] %v7437_v32 }
 0x5f4   : > { %v2141_v51 = vpop.f32.mrb[32].mxu1 }
 0x5f5   : > { %v7440_v8 = vadd.f32 %v2141_v51, %v1947_v59  ;;  %v2143_v57 = vpop.f32.mrb[33].mxu1  ;;  %v1955_v51 = vunpack.c.l.bf16 %v4431_v11 }
 0x5f6   : > { %v7442_v26 = vadd.f32 %v2143_v57, %v1948_v15  ;;  %v2145_v49 = vpop.f32.mrb[34].mxu1  ;;  %v1956_v57 = vunpack.c.h.bf16 %v4431_v11 }
 0x5f7   : > { %v7445_v7 = vadd.f32 %v2145_v49, %v1949_v0  ;;  %v2147_v4 = vpop.f32.mrb[35].mxu1  ;;  %v4432_v0 = vld [vmem:[%s6075_s25 + $0xa8] sm:$0xff] }
 0x5f8   : > { %v2220_v34 = vmax.f32 %v7440_v8, %v7442_v26  ;;  %v7449_v19 = vadd.f32 %v2147_v4, %v1950_v28  ;;  %v1957_v49 = vunpack.c.l.bf16 %v4432_v0  ;;  %v1958_v4 = vunpack.c.h.bf16 %v4432_v0 }
 0x5fa   : > { %v2223_v17 = vmax.f32 %v7445_v7, %v7449_v19  ;;  %2221 = vmax.xlane.f32.xlu0 %v2220_v34 }
 0x5fc   : > { %v2151_v9 = vpop.f32.mrb[36].mxu1  ;;  %2224 = vmax.xlane.f32.xlu1 %v2223_v17 }
 0x5fd   : > { %v7454_v21 = vadd.f32 %v2151_v9, %v1951_v16  ;;  %v2153_v24 = vpop.f32.mrb[37].mxu1 }
 0x5fe   : > { %v7456_v6 = vadd.f32 %v2153_v24, %v1952_v29  ;;  %v2155_v30 = vpop.f32.mrb[38].mxu1  ;;  %v4433_v29 = vld [vmem:[%s6075_s25 + $0xb0] sm:$0xff] }
 0x5ff   : > { %v7459_v48 = vadd.f32 %v2155_v30, %v1953_v37  ;;  %v2157_v20 = vpop.f32.mrb[39].mxu1  ;;  %v4434_v30 = vld [vmem:[%s6075_s25 + $0xb8] sm:$0xff]  ;;  %v1959_v11 = vunpack.c.l.bf16 %v4433_v29 }
 0x600   : > { %v2226_v59 = vmax.f32 %v7454_v21, %v7456_v6  ;;  %v7463_v15 = vadd.f32 %v2157_v20, %v1954_v1  ;;  %v1961_v0 = vunpack.c.l.bf16 %v4434_v30 }
 0x602   : > { %v2229_v28 = vmax.f32 %v7459_v48, %v7463_v15  ;;  %2227 = vmax.xlane.f32.xlu0 %v2226_v59  ;;  %v1960_v59 = vunpack.c.h.bf16 %v4433_v29  ;;  %v4436_v29 = vld [vmem:[%s6075_s25 + $0xc8] sm:$0xff] }
 0x604   : > { %v2161_v54 = vpop.f32.mrb[40].mxu1  ;;  %2230 = vmax.xlane.f32.xlu1 %v2229_v28  ;;  %v1962_v28 = vunpack.c.h.bf16 %v4434_v30 }
 0x605   : > { %v7468_v34 = vadd.f32 %v2161_v54, %v1955_v51  ;;  %v2163_v40 = vpop.f32.mrb[41].mxu1 }
 0x606   : > { %v7470_v16 = vadd.f32 %v2163_v40, %v1956_v57  ;;  %v2165_v17 = vpop.f32.mrb[42].mxu1 }
 0x607   : > { %v7473_v37 = vadd.f32 %v2165_v17, %v1957_v49  ;;  %v2167_v9 = vpop.f32.mrb[43].mxu1 }
 0x608   : > { %v2232_v1 = vmax.f32 %v7468_v34, %v7470_v16  ;;  %v7477_v24 = vadd.f32 %v2167_v9, %v1958_v4  ;;  %v4435_v4 = vld [vmem:[%s6075_s25 + $0xc0] sm:$0xff] }
 0x609   : > { %v1963_v63 = vunpack.c.l.bf16 %v4435_v4 }
 0x60a   : > { %v2235_v20 = vmax.f32 %v7473_v37, %v7477_v24  ;;  %2233 = vmax.xlane.f32.xlu0 %v2232_v1 }
 0x60c   : > { %v2171_v51 = vpop.f32.mrb[44].mxu1  ;;  %2236 = vmax.xlane.f32.xlu1 %v2235_v20  ;;  %v1965_v20 = vunpack.c.l.bf16 %v4436_v29 }
 0x60d   : > { %v7482_v57 = vadd.f32 %v2171_v51, %v1959_v11  ;;  %v2173_v49 = vpop.f32.mrb[45].mxu1  ;;  %v1964_v11 = vunpack.c.h.bf16 %v4435_v4 }
 0x60e   : > { %v7484_v54 = vadd.f32 %v2173_v49, %v1960_v59  ;;  %v2175_v40 = vpop.f32.mrb[46].mxu1 }
 0x60f   : > { %v7487_v17 = vadd.f32 %v2175_v40, %v1961_v0  ;;  %v2177_v9 = vpop.f32.mrb[47].mxu1  ;;  %v1966_v0 = vunpack.c.h.bf16 %v4436_v29 }
 0x610   : > { %v2238_v32 = vmax.f32 %v7482_v57, %v7484_v54  ;;  %v7491_v1 = vadd.f32 %v2177_v9, %v1962_v28  ;;  %v4437_v28 = vld [vmem:[%s6075_s25 + $0xd0] sm:$0xff] }
 0x611   : > { %v1967_v4 = vunpack.c.l.bf16 %v4437_v28  ;;  %v1968_v29 = vunpack.c.h.bf16 %v4437_v28  ;;  %v4440_v28 = vld [vmem:[%s6075_s25 + $0xe8] sm:$0xff] }
 0x612   : > { %v2241_v30 = vmax.f32 %v7487_v17, %v7491_v1  ;;  %2239 = vmax.xlane.f32.xlu0 %v2238_v32 }
 0x614   : > { %v2181_v59 = vpop.f32.mrb[48].mxu1  ;;  %2242 = vmax.xlane.f32.xlu1 %v2241_v30 }
 0x615   : > { %v7496_v51 = vadd.f32 %v2181_v59, %v1963_v63  ;;  %v2183_v49 = vpop.f32.mrb[49].mxu1 }
 0x616   : > { %v7498_v40 = vadd.f32 %v2183_v49, %v1964_v11  ;;  %v2185_v31 = vpop.f32.mrb[50].mxu1  ;;  %v1969_v11 = vunpack.c.l.bf16 %v4438_v58 }
 0x617   : > { %v7501_v9 = vadd.f32 %v2185_v31, %v1965_v20  ;;  %v2187_v13 = vpop.f32.mrb[51].mxu1  ;;  %v1970_v31 = vunpack.c.h.bf16 %v4438_v58 }
 0x618   : > { %v2244_v32 = vmax.f32 %v7496_v51, %v7498_v40  ;;  %v7505_v38 = vadd.f32 %v2187_v13, %v1966_v0  ;;  %v4439_v13 = vld [vmem:[%s6075_s25 + $0xe0] sm:$0xff] }
 0x619   : > { %v1972_v58 = vunpack.c.h.bf16 %v4439_v13 }
 0x61a   : > { %v2247_v63 = vmax.f32 %v7501_v9, %v7505_v38  ;;  %2245 = vmax.xlane.f32.xlu0 %v2244_v32 }
 0x61c   : > { %v2191_v30 = vpop.f32.mrb[52].mxu1  ;;  %2248 = vmax.xlane.f32.xlu1 %v2247_v63  ;;  %v1971_v63 = vunpack.c.l.bf16 %v4439_v13 }
 0x61d   : > { %v7510_v20 = vadd.f32 %v2191_v30, %v1967_v4  ;;  %v2193_v59 = vpop.f32.mrb[53].mxu1  ;;  %v1973_v4 = vunpack.c.l.bf16 %v4440_v28 }
 0x61e   : > { %v7512_v49 = vadd.f32 %v2193_v59, %v1968_v29  ;;  %v2195_v42 = vpop.f32.mrb[54].mxu1  ;;  %v1974_v59 = vunpack.c.h.bf16 %v4440_v28 }
 0x61f   : > { %v2197_v0 = vpop.f32.mrb[55].mxu1  ;;  %v7517_v43 = vadd.f32 %v2195_v42, %v1969_v11  ;;  %v4441_v11 = vld [vmem:[%s6075_s25 + $0xf0] sm:$0xff] }
 0x620   : > { %v2250_v36 = vmax.f32 %v7510_v20, %v7512_v49  ;;  %v7519_v32 = vadd.f32 %v2197_v0, %v1970_v31  ;;  %v1975_v60 = vunpack.c.l.bf16 %v4441_v11 }
 0x622   : > { %2251 = vmax.xlane.f32.xlu0 %v2250_v36  ;;  %v2253_v29 = vmax.f32 %v7517_v43, %v7519_v32 }
 0x624   : > { %v2201_v30 = vpop.f32.mrb[56].mxu1 }
 0x625   : > { %v7524_v10 = vadd.f32 %v2201_v30, %v1971_v63  ;;  %v2203_v39 = vpop.f32.mrb[57].mxu1  ;;  %v1977_v63 = vunpack.c.l.bf16 %v4442_v50 }
 0x626   : > { %v7526_v47 = vadd.f32 %v2203_v39, %v1972_v58  ;;  %2254 = vmax.xlane.f32.xlu0 %v2253_v29  ;;  %v2205_v42 = vpop.f32.mrb[58].mxu1  ;;  %v1976_v39 = vunpack.c.h.bf16 %v4441_v11  ;;  %v4452_v11 = vld [vmem:[%s6075_s25 + $0x108] sm:$0xff] }
 0x627   : > { %v7529_v31 = vadd.f32 %v2205_v42, %v1973_v4  ;;  %v2207_v0 = vpop.f32.mrb[59].mxu1  ;;  %v1978_v4 = vunpack.c.h.bf16 %v4442_v50 }
 0x628   : > { %v2256_v36 = vmax.f32 %v7524_v10, %v7526_v47  ;;  %v7533_v13 = vadd.f32 %v2207_v0, %v1974_v59  ;;  %v4451_v59 = vld [vmem:[%s6075_s25 + $0x100] sm:$0xff] }
 0x629   : > { %v2671_v44 = vunpack.c.l.bf16 %v4451_v59  ;;  %v2672_v50 = vunpack.c.h.bf16 %v4451_v59  ;;  %v4454_v59 = vld [vmem:[%s6075_s25 + $0x118] sm:$0xff] }
 0x62a   : > { %v2259_v28 = vmax.f32 %v7529_v31, %v7533_v13  ;;  %2257 = vmax.xlane.f32.xlu1 %v2256_v36 }
 0x62c   : > { %v2211_v58 = vpop.f32.mrb[60].mxu1  ;;  %2260 = vmax.xlane.f32.xlu0 %v2259_v28  ;;  %v2673_v28 = vunpack.c.l.bf16 %v4452_v11 }
 0x62d   : > { %v7538_v29 = vadd.f32 %v2211_v58, %v1975_v60  ;;  %v2213_v30 = vpop.f32.mrb[61].mxu1 }
 0x62e   : > { %v7540_v42 = vadd.f32 %v2213_v30, %v1976_v39  ;;  %v2215_v33 = vpop.f32.mrb[62].mxu1 }
 0x62f   : > { %v7543_v0 = vadd.f32 %v2215_v33, %v1977_v63  ;;  %v2217_v18 = vpop.f32.mrb[63].mxu1  ;;  %v2674_v33 = vunpack.c.h.bf16 %v4452_v11 }
 0x630   : > { %v2262_v45 = vmax.f32 %v7538_v29, %v7540_v42  ;;  %v7547_v36 = vadd.f32 %v2217_v18, %v1978_v4  ;;  %v4453_v18 = vld [vmem:[%s6075_s25 + $0x110] sm:$0xff] }
 0x631   : > { %8899 = vst [vmem:[#allocation47_spill] sm:$0xff] %v7543_v0  ;;  %v2676_v11 = vunpack.c.h.bf16 %v4453_v18 }
 0x632   : > { %8900 = vst [vmem:[#allocation48_spill] sm:$0xff] %v7547_v36  ;;  %v2265_v60 = vmax.f32 %v7543_v0, %v7547_v36  ;;  %2263 = vmax.xlane.f32.xlu1 %v2262_v45 }
 0x634   : > { %2266 = vmax.xlane.f32.xlu0 %v2265_v60  ;;  %v2857_v39 = vpop.f32.mrb[64].mxu1  ;;  %v2675_v60 = vunpack.c.l.bf16 %v4453_v18 }
 0x635   : > { %v7552_v63 = vadd.f32 %v2857_v39, %v2671_v44  ;;  %v2859_v58 = vpop.f32.mrb[65].mxu1 }
 0x636   : > { %v7554_v30 = vadd.f32 %v2859_v58, %v2672_v50  ;;  %v2861_v35 = vpop.f32.mrb[66].mxu1  ;;  %v2677_v50 = vunpack.c.l.bf16 %v4454_v59 }
 0x637   : > { %8901 = vst [vmem:[#allocation49_spill] sm:$0xff] %v7552_v63  ;;  %v7557_v4 = vadd.f32 %v2861_v35, %v2673_v28  ;;  %v2863_v22 = vpop.f32.mrb[67].mxu1  ;;  %v2678_v35 = vunpack.c.h.bf16 %v4454_v59 }
 0x638   : > { %8902 = vst [vmem:[#allocation50_spill] sm:$0xff] %v7554_v30  ;;  %v2936_v55 = vmax.f32 %v7552_v63, %v7554_v30  ;;  %v7561_v45 = vadd.f32 %v2863_v22, %v2674_v33  ;;  %v4455_v22 = vld [vmem:[%s6075_s25 + $0x120] sm:$0xff] }
 0x639   : > { %8903 = vst [vmem:[#allocation51_spill] sm:$0xff] %v7557_v4  ;;  %v2679_v18 = vunpack.c.l.bf16 %v4455_v22 }
 0x63a   : > { %8904 = vst [vmem:[#allocation52_spill] sm:$0xff] %v7561_v45  ;;  %v2939_v44 = vmax.f32 %v7557_v4, %v7561_v45  ;;  %2937 = vmax.xlane.f32.xlu1 %v2936_v55  ;;  %v4456_v55 = vld [vmem:[%s6075_s25 + $0x128] sm:$0xff] }
 0x63c   : > { %v2867_v39 = vpop.f32.mrb[68].mxu1  ;;  %2940 = vmax.xlane.f32.xlu0 %v2939_v44  ;;  %v2681_v44 = vunpack.c.l.bf16 %v4456_v55 }
 0x63d   : > { %v7566_v28 = vadd.f32 %v2867_v39, %v2675_v60  ;;  %v2869_v58 = vpop.f32.mrb[69].mxu1  ;;  %v2680_v60 = vunpack.c.h.bf16 %v4455_v22  ;;  %v2682_v39 = vunpack.c.h.bf16 %v4456_v55 }
 0x63e   : > { %v7568_v2 = vadd.f32 %v2869_v58, %v2676_v11  ;;  %v2871_v12 = vpop.f32.mrb[70].mxu1 }
 0x63f   : > { %8905 = vst [vmem:[#allocation53_spill] sm:$0xff] %v7566_v28  ;;  %v7571_v33 = vadd.f32 %v2871_v12, %v2677_v50  ;;  %v2873_v53 = vpop.f32.mrb[71].mxu1 }
 0x640   : > { %8906 = vst [vmem:[#allocation54_spill] sm:$0xff] %v7568_v2  ;;  %v2942_v23 = vmax.f32 %v7566_v28, %v7568_v2  ;;  %v7575_v3 = vadd.f32 %v2873_v53, %v2678_v35  ;;  %v4458_v28 = vld [vmem:[%s6075_s25 + $0x138] sm:$0xff] }
 0x641   : > { %8907 = vst [vmem:[#allocation55_spill] sm:$0xff] %v7571_v33  ;;  %v2685_v63 = vunpack.c.l.bf16 %v4458_v28 }
 0x642   : > { %8908 = vst [vmem:[#allocation56_spill] sm:$0xff] %v7575_v3  ;;  %v2945_v59 = vmax.f32 %v7571_v33, %v7575_v3  ;;  %2943 = vmax.xlane.f32.xlu0 %v2942_v23  ;;  %v7641_v33 = vpop.permute.xlu0 %3144 }
 0x644   : > { %2946 = vmax.xlane.f32.xlu1 %v2945_v59  ;;  %v2877_v11 = vpop.f32.mrb[72].mxu1 }
 0x645   : > { %v7580_v58 = vadd.f32 %v2877_v11, %v2679_v18  ;;  %v2879_v12 = vpop.f32.mrb[73].mxu1 }
 0x646   : > { %v7582_v50 = vadd.f32 %v2879_v12, %v2680_v60  ;;  %v2881_v62 = vpop.f32.mrb[74].mxu1  ;;  %v7650_v36 = vpop.permute.xlu0 %3164 }
 0x647   : > { %8909 = vst [vmem:[#allocation57_spill] sm:$0xff] %v7580_v58  ;;  %v7584_v5 = vadd.f32 %v2881_v62, %v2681_v44  ;;  %v2883_v53 = vpop.f32.mrb[75].mxu1 }
 0x648   : > { %8910 = vst [vmem:[#allocation58_spill] sm:$0xff] %v7582_v50  ;;  %v2948_v35 = vmax.f32 %v7580_v58, %v7582_v50  ;;  %v7588_v25 = vadd.f32 %v2883_v53, %v2682_v39  ;;  %v4457_v58 = vld [vmem:[%s6075_s25 + $0x130] sm:$0xff] }
 0x649   : > { %8911 = vst [vmem:[#allocation59_spill] sm:$0xff] %v7584_v5  ;;  %v2683_v4 = vunpack.c.l.bf16 %v4457_v58  ;;  %v2684_v30 = vunpack.c.h.bf16 %v4457_v58 }
 0x64a   : > { %8912 = vst [vmem:[#allocation60_spill] sm:$0xff] %v7588_v25  ;;  %v2951_v23 = vmax.f32 %v7584_v5, %v7588_v25  ;;  %2949 = vmax.xlane.f32.xlu0 %v2948_v35 }
 0x64c   : > { %2952 = vmax.xlane.f32.xlu1 %v2951_v23  ;;  %v2887_v22 = vpop.f32.mrb[76].mxu1 }
 0x64d   : > { %v2889_v55 = vpop.f32.mrb[77].mxu1 }
 0x64e   : > { %v2891_v18 = vpop.f32.mrb[78].mxu1 }
 0x64f   : > { %v2893_v59 = vpop.f32.mrb[79].mxu1 }
 0x654   : > { %v7592_v60 = vpop.f32.mrb[80].mxu1 }
 0x655   : > { %v7594_v11 = vpop.f32.mrb[81].mxu1 }
 0x656   : > { %v7596_v62 = vpop.f32.mrb[82].mxu1 }
 0x657   : > { %v7598_v44 = vpop.f32.mrb[83].mxu1 }
 0x65c   : > { %v7600_v12 = vpop.f32.mrb[84].mxu1 }
 0x65d   : > { %3152 = vrot.lane.b32.xlu1 %v7267_v61, %s5876_s17  ;;  %v7604_v39 = vpop.f32.mrb[85].mxu1 }
 0x65e   : > { %v7606_v53 = vpop.f32.mrb[86].mxu1 }
 0x65f   : > { %v7608_v35 = vpop.f32.mrb[87].mxu1 }
 0x660   : > { %3168 = vrot.lane.b32.xlu0 %v7271_v14, %s5876_s17 }
 0x661   : > { %3154 = vrot.lane.b32.xlu1 %v7277_v27, %s5876_s17  ;;  %v7632_v27 = vpop.permute.xlu1 %3162 }
 0x664   : > { %3170 = vrot.lane.b32.xlu0 %v7283_v46, %s5876_s17  ;;  %v7616_v23 = vpop.f32.mrb[88].mxu1 }
 0x665   : > { %v7618_v61 = vpop.f32.mrb[89].mxu1  ;;  %v7646_v45 = vpop.permute.xlu1 %3146 }
 0x666   : > { %v7620_v56 = vpop.f32.mrb[90].mxu1 }
 0x667   : > { %8913 = vst [vmem:[#allocation61_spill] sm:$0xff] %v7620_v56  ;;  %v7622_v52 = vpop.f32.mrb[91].mxu1 }
 0x668   : > { %8914 = vst [vmem:[#allocation62_spill] sm:$0xff] %v7622_v52  ;;  %v7662_v52 = vadd.f32 %v2891_v18, %v2685_v63 }
 0x66a   : > { %8924 = vst [vmem:[#allocation72_spill] sm:$0xff] %v7662_v52 }
 0x66c   : > { %v7624_v41 = vpop.f32.mrb[92].mxu1 }
 0x66d   : > { %v7626_v25 = vpop.f32.mrb[93].mxu1 }
 0x66e   : > { %v7628_v14 = vpop.f32.mrb[94].mxu1 }
 0x66f   : > { %8915 = vst [vmem:[#allocation63_spill] sm:$0xff] %v7628_v14  ;;  %v7630_v5 = vpop.f32.mrb[95].mxu1 }
 0x670   : > { %8916 = vst [vmem:[#allocation64_spill] sm:$0xff] %v7630_v5  ;;  %v2686_v5 = vunpack.c.h.bf16 %v4458_v28 }
 0x672   : > { %v7664_v56 = vadd.f32 %v2893_v59, %v2686_v5 }
 0x674   : > { %v7634_v46 = vpop.f32.mrb[96].mxu1  ;;  %8925 = vst [vmem:[#allocation73_spill] sm:$0xff] %v7664_v56 }
 0x675   : > { %8917 = vst [vmem:[#allocation65_spill] sm:$0xff] %v7634_v46  ;;  %v7636_v50 = vpop.f32.mrb[97].mxu1  ;;  %v7652_v46 = vadd.f32 %v2887_v22, %v2683_v4 }
 0x676   : > { %8918 = vst [vmem:[#allocation66_spill] sm:$0xff] %v7636_v50  ;;  %v7639_v3 = vpop.f32.mrb[98].mxu1  ;;  %v7654_v50 = vadd.f32 %v2889_v55, %v2684_v30  ;;  %v2957_v30 = vmax.f32 %v7662_v52, %v7664_v56 }
 0x677   : > { %8919 = vst [vmem:[#allocation67_spill] sm:$0xff] %v7639_v3  ;;  %v7643_v2 = vpop.f32.mrb[99].mxu1  ;;  %8922 = vst [vmem:[#allocation70_spill] sm:$0xff] %v7652_v46 }
 0x678   : > { %8920 = vst [vmem:[#allocation68_spill] sm:$0xff] %v7643_v2  ;;  %8923 = vst [vmem:[#allocation71_spill] sm:$0xff] %v7654_v50  ;;  %v7660_v2 = vpop.permute.xlu1 %3148  ;;  %v2954_v28 = vmax.f32 %v7652_v46, %v7654_v50 }
 0x67c   : > { %v7648_v14 = vpop.f32.mrb[100].mxu1  ;;  %v7676_v22 = vpop.permute.xlu1 %3150 }
 0x67d   : > { %8921 = vst [vmem:[#allocation69_spill] sm:$0xff] %v7648_v14  ;;  %v7656_v3 = vpop.f32.mrb[101].mxu1  ;;  %v7670_v14 = vpop.permute.xlu0 %3166 }
 0x67e   : > { %v7658_v0 = vpop.f32.mrb[102].mxu1 }
 0x67f   : > { %v7666_v58 = vpop.f32.mrb[103].mxu1 }
 0x680   : > { %8926 = vst [vmem:[#allocation74_spill] sm:$0xff] %v7666_v58 }
 0x683   : > { %2955 = vmax.xlane.f32.xlu0 %v2954_v28 }
 0x684   : > { %v7674_v4 = vpop.f32.mrb[104].mxu1 }
 0x685   : > { %8927 = vst [vmem:[#allocation75_spill] sm:$0xff] %v7674_v4  ;;  %2958 = vmax.xlane.f32.xlu1 %v2957_v30  ;;  %v7678_v63 = vpop.f32.mrb[105].mxu1 }
 0x686   : > { %8928 = vst [vmem:[#allocation76_spill] sm:$0xff] %v7678_v63  ;;  %v7680_v5 = vpop.f32.mrb[106].mxu1 }
 0x687   : > { %8929 = vst [vmem:[#allocation77_spill] sm:$0xff] %v7680_v5  ;;  %v2222_v55 = vpop.xlane.xlu0 %2221  ;;  %v7682_v18 = vpop.f32.mrb[107].mxu1 }
 0x688   : > { %8930 = vst [vmem:[#allocation78_spill] sm:$0xff] %v7682_v18  ;;  %v2268_v59 = vsub.f32 %v7440_v8, %v2222_v55  ;;  %v2269_v50 = vsub.f32 %v7442_v26, %v2222_v55 }
 0x689   : > { %v2225_v46 = vpop.xlane.xlu1 %2224 }
 0x68a   : > { %v2300_v58 = vmul.f32 1.442695, %v2268_v59  ;;  %v2302_v56 = vmul.f32 1.442695, %v2269_v50  ;;  %v2270_v28 = vsub.f32 %v7445_v7, %v2225_v46  ;;  %v2271_v4 = vsub.f32 %v7449_v19, %v2225_v46 }
 0x68c   : > { %5354 = vpow2.f32 %v2300_v58  ;;  %v2304_v30 = vmul.f32 1.442695, %v2270_v28  ;;  %v2306_v52 = vmul.f32 1.442695, %v2271_v4  ;;  %v7688_v63 = vpop.f32.mrb[108].mxu1 }
 0x68d   : > { %5356 = vpow2.f32 %v2302_v56  ;;  %v7690_v5 = vpop.f32.mrb[109].mxu1 }
 0x68e   : > { %5358 = vpow2.f32 %v2304_v30  ;;  %v7692_v18 = vpop.f32.mrb[110].mxu1 }
 0x68f   : > { %5360 = vpow2.f32 %v2306_v52  ;;  %v2228_v8 = vpop.xlane.xlu0 %2227  ;;  %v7694_v26 = vpop.f32.mrb[111].mxu1 }
 0x690   : > { %v2272_v50 = vsub.f32 %v7454_v21, %v2228_v8  ;;  %v2273_v7 = vsub.f32 %v7456_v6, %v2228_v8  ;;  %v5690_v21 = vld [vmem:[#allocation2 + $0x30] sm:$0xff] }
 0x691   : > { %v2231_v19 = vpop.xlane.xlu1 %2230 }
 0x692   : > { %v2308_v46 = vmul.f32 1.442695, %v2272_v50  ;;  %v2310_v58 = vmul.f32 1.442695, %v2273_v7  ;;  %v2274_v4 = vsub.f32 %v7459_v48, %v2231_v19  ;;  %v2275_v56 = vsub.f32 %v7463_v15, %v2231_v19 }
 0x694   : > { %5362 = vpow2.f32 %v2308_v46  ;;  %v2312_v55 = vmul.f32 1.442695, %v2274_v4  ;;  %v2314_v59 = vmul.f32 1.442695, %v2275_v56  ;;  %v7700_v28 = vpop.f32.mrb[112].mxu1  ;;  %v5691_v4 = vld [vmem:[#allocation2 + $0x70] sm:$0xff] }
 0x695   : > { %8931 = vst [vmem:[#allocation79_spill] sm:$0xff] %v7700_v28  ;;  %5364 = vpow2.f32 %v2310_v58  ;;  %v7702_v52 = vpop.f32.mrb[113].mxu1 }
 0x696   : > { %8932 = vst [vmem:[#allocation80_spill] sm:$0xff] %v7702_v52  ;;  %v5355_v30 = vpop.eup %5354  ;;  %5366 = vpow2.f32 %v2312_v55  ;;  %3156 = vrot.lane.b32.xlu1 %v5690_v21, %s5876_s17  ;;  %v7705_v6 = vpop.f32.mrb[114].mxu1  ;;  %v5692_v52 = vld [vmem:[#allocation2 + $0x38] sm:$0xff] }
 0x697   : > { %8933 = vst [vmem:[#allocation81_spill] sm:$0xff] %v7705_v6  ;;  %v5357_v8 = vpop.eup %5356  ;;  %5368 = vpow2.f32 %v2314_v59  ;;  %v2234_v48 = vpop.xlane.xlu0 %2233 }
 0x698   : > { %v7707_v50 = vpop.f32.mrb[115].mxu1  ;;  %v5359_v15 = vpop.eup %5358  ;;  %v2276_v7 = vsub.f32 %v7468_v34, %v2234_v48  ;;  %v2277_v19 = vsub.f32 %v7470_v16, %v2234_v48  ;;  %v7717_v48 = vadd.f32 %v5357_v8, %v5355_v30 }
 0x699   : > { %8934 = vst [vmem:[#allocation82_spill] sm:$0xff] %v7707_v50  ;;  %v5361_v46 = vpop.eup %5360  ;;  %v2237_v58 = vpop.xlane.xlu1 %2236  ;;  %3172 = vrot.lane.b32.xlu0 %v5691_v4, %s5876_s17  ;;  %v2412_v56 = vpack.c.bf16 %v5359_v15, %v5355_v30  ;;  %v5693_v4 = vld [vmem:[#allocation2 + $0x78] sm:$0xff] }
 0x69a   : > { %v2316_v55 = vmul.f32 1.442695, %v2276_v7  ;;  %v2318_v21 = vmul.f32 1.442695, %v2277_v19  ;;  %v2278_v6 = vsub.f32 %v7473_v37, %v2237_v58  ;;  %v2279_v59 = vsub.f32 %v7477_v24, %v2237_v58  ;;  %3158 = vrot.lane.b32.xlu1 %v5692_v52, %s5876_s17  ;;  %8935 = vst [vmem:[#allocation83_spill] sm:$0xff] %v7717_v48  ;;  %v7794_v48 = vld [vmem:[%s6075_s25 + $0x170] sm:$0xff] }
 0x69b   : > { %v2413_v50 = vpack.c.bf16 %v5361_v46, %v5357_v8  ;;  %v7722_v37 = vadd.f32 %v5361_v46, %v5359_v15 }
 0x69c   : > { %5370 = vpow2.f32 %v2316_v55  ;;  %v2320_v34 = vmul.f32 1.442695, %v2278_v6  ;;  %v2322_v28 = vmul.f32 1.442695, %v2279_v59  ;;  %v7715_v16 = vpop.f32.mrb[116].mxu1 }
 0x69d   : > { %5372 = vpow2.f32 %v2318_v21  ;;  %2508 = vmatprep.mubr.bf16.mxu0 %v2413_v50  ;;  %3174 = vrot.lane.b32.xlu0 %v5693_v4, %s5876_s17  ;;  %v7720_v7 = vpop.f32.mrb[117].mxu1  ;;  %8936 = vst [vmem:[#allocation84_spill] sm:$0xff] %v7722_v37  ;;  %s5740_s17 = scalar_lea.vmem %s8700_s24, 2048 }
 0x69e   : > { %v5363_v24 = vpop.eup %5362  ;;  %5374 = vpow2.f32 %v2320_v34  ;;  %2509 = vmatmul.mubr.bf16.vlgmr.msra.gmra.mrb[32].mxu0 %v2412_v56  ;;  %v7724_v52 = vpop.f32.mrb[118].mxu1  ;;  %p5741_p8 = scmp.ne.s32.totalorder %s8700_s24, %s5740_s17 }
 0x69f   : > { %v5365_v6 = vpop.eup %5364  ;;  %5376 = vpow2.f32 %v2322_v28  ;;  %4842 = vmatpush3.bf16.msra.mxu0 %v7641_v33  ;;  %v2240_v30 = vpop.xlane.xlu0 %2239 }
 0x6a0   : > { %v7727_v8 = vpop.f32.mrb[119].mxu1  ;;  %v5367_v50 = vpop.eup %5366  ;;  %4843 = vmatprep.subr.bf16.mxu0 %v7632_v27  ;;  %v2280_v19 = vsub.f32 %v7482_v57, %v2240_v30  ;;  %v2281_v15 = vsub.f32 %v7484_v54, %v2240_v30  ;;  %v7732_v56 = vadd.f32 %v5365_v6, %v5363_v24  ;;  %p5742_p0 = pnand %p5741_p8, %p9080_p4 }
 0x6a1   : > { %v5369_v46 = vpop.eup %5368  ;;  %v2243_v58 = vpop.xlane.xlu1 %2242  ;;  %v2414_v55 = vpack.c.bf16 %v5367_v50, %v5363_v24 }
 0x6a2   : > { %8937 = vst [vmem:[#allocation85_spill] sm:$0xff] %v7732_v56  ;;  %v2324_v21 = vmul.f32 1.442695, %v2280_v19  ;;  %v2326_v59 = vmul.f32 1.442695, %v2281_v15  ;;  %v2282_v28 = vsub.f32 %v7487_v17, %v2243_v58  ;;  %v2283_v33 = vsub.f32 %v7491_v1, %v2243_v58  ;;  %p5743_p1 = pneg %p5742_p0 }
 0x6a3   : > { %4844 = vmatpush3.bf16.msra.mxu0 %v7646_v45  ;;  %v2415_v34 = vpack.c.bf16 %v5369_v46, %v5365_v6  ;;  %v7737_v4 = vadd.f32 %v5369_v46, %v5367_v50 }
 0x6a4   : > { %5378 = vpow2.f32 %v2324_v21  ;;  %v2328_v57 = vmul.f32 1.442695, %v2282_v28  ;;  %v2330_v27 = vmul.f32 1.442695, %v2283_v33  ;;  %4845 = vmatprep.subr.bf16.mxu0 %v7650_v36  ;;  %v7740_v54 = vpop.f32.mrb[120].mxu1 }
 0x6a5   : > { %8938 = vst [vmem:[#allocation86_spill] sm:$0xff] %v7737_v4  ;;  %5380 = vpow2.f32 %v2326_v59  ;;  %2516 = vmatprep.mubr.bf16.mxu0 %v2415_v34  ;;  %v7742_v24 = vpop.f32.mrb[121].mxu1 }
 0x6a6   : > { %v5371_v30 = vpop.eup %5370  ;;  %5382 = vpow2.f32 %v2328_v57  ;;  %2517 = vmatmul.mubr.bf16.gmra.mrb[36].mxu0 %v2414_v55  ;;  %v7744_v17 = vpop.f32.mrb[122].mxu1 }
 0x6a7   : > { %v5373_v1 = vpop.eup %5372  ;;  %5384 = vpow2.f32 %v2330_v27  ;;  %4846 = vmatpush3.bf16.msra.mxu0 %v7660_v2  ;;  %v2246_v45 = vpop.xlane.xlu0 %2245  ;;  %v4460_v27 = vld [vmem:[%s6075_s25 + $0x148] sm:$0xff] }
 0x6a8   : > { %v7747_v6 = vpop.f32.mrb[123].mxu1  ;;  %v5375_v36 = vpop.eup %5374  ;;  %4847 = vmatprep.subr.bf16.mxu0 %v7670_v14  ;;  %v2284_v50 = vsub.f32 %v7496_v51, %v2246_v45  ;;  %v2285_v19 = vsub.f32 %v7498_v40, %v2246_v45  ;;  %v7752_v55 = vadd.f32 %v5373_v1, %v5371_v30  ;;  %v4459_v40 = vld [vmem:[%s6075_s25 + $0x140] sm:$0xff]  ;;  %v7766_v45 = vld [vmem:[%s6075_s25 + $0x150] sm:$0xff] }
 0x6a9   : > { %8939 = vst [vmem:[#allocation87_spill] sm:$0xff] %v7747_v6  ;;  %v5377_v15 = vpop.eup %5376  ;;  %v2249_v46 = vpop.xlane.xlu1 %2248  ;;  %v2416_v58 = vpack.c.bf16 %v5375_v36, %v5371_v30 }
 0x6aa   : > { %8940 = vst [vmem:[#allocation88_spill] sm:$0xff] %v7752_v55  ;;  %v2332_v21 = vmul.f32 1.442695, %v2284_v50  ;;  %v2334_v59 = vmul.f32 1.442695, %v2285_v19  ;;  %v2286_v2 = vsub.f32 %v7501_v9, %v2249_v46  ;;  %v2287_v28 = vsub.f32 %v7505_v38, %v2249_v46  ;;  %v7769_v38 = vld [vmem:[%s6075_s25 + $0x158] sm:$0xff] }
 0x6ab   : > { %4848 = vmatpush3.bf16.msra.mxu0 %v7676_v22  ;;  %v2417_v14 = vpack.c.bf16 %v5377_v15, %v5373_v1  ;;  %v7757_v51 = vadd.f32 %v5377_v15, %v5375_v36  ;;  %v2687_v36 = vunpack.c.l.bf16 %v4459_v40  ;;  %v2688_v50 = vunpack.c.h.bf16 %v4459_v40  ;;  %v4463_v40 = vld [vmem:[%s6075_s25 + $0x160] sm:$0xff]  ;;  %v7784_v55 = vld [vmem:[%s6075_s25 + $0x168] sm:$0xff] }
 0x6ac   : > { %5386 = vpow2.f32 %v2332_v21  ;;  %v2336_v33 = vmul.f32 1.442695, %v2286_v2  ;;  %v2338_v34 = vmul.f32 1.442695, %v2287_v28  ;;  %v7760_v57 = vpop.f32.mrb[124].mxu1  ;;  %v2689_v21 = vunpack.c.l.bf16 %v4460_v27 }
 0x6ad   : > { %8941 = vst [vmem:[#allocation89_spill] sm:$0xff] %v7757_v51  ;;  %5388 = vpow2.f32 %v2334_v59  ;;  %2524 = vmatprep.mubr.bf16.mxu0 %v2417_v14  ;;  %v7763_v30 = vpop.f32.mrb[125].mxu1  ;;  %v2690_v59 = vunpack.c.h.bf16 %v4460_v27  ;;  %v2691_v14 = vunpack.c.l.bf16 %v7766_v45  ;;  %v2693_v51 = vunpack.c.l.bf16 %v7769_v38 }
 0x6ae   : > { %v5379_v9 = vpop.eup %5378  ;;  %5390 = vpow2.f32 %v2336_v33  ;;  %2525 = vmatmul.mubr.bf16.gmra.mrb[40].mxu0 %v2416_v58  ;;  %v7771_v22 = vpop.f32.mrb[126].mxu1  ;;  %v2692_v33 = vunpack.c.h.bf16 %v7766_v45  ;;  %v2694_v45 = vunpack.c.h.bf16 %v7769_v38 }
 0x6af   : > { %8942 = vst [vmem:[#allocation90_spill] sm:$0xff] %v7771_v22  ;;  %v5381_v1 = vpop.eup %5380  ;;  %5392 = vpow2.f32 %v2338_v34  ;;  %v2252_v19 = vpop.xlane.xlu0 %2251 }
 0x6b0   : > { %v7773_v15 = vpop.f32.mrb[127].mxu1  ;;  %v5383_v46 = vpop.eup %5382  ;;  %v2288_v2 = vsub.f32 %v7510_v20, %v2252_v19  ;;  %v2289_v28 = vsub.f32 %v7512_v49, %v2252_v19  ;;  %v7781_v34 = vadd.f32 %v5381_v1, %v5379_v9  ;;  %v7787_v49 = vadd.f32 %v7592_v60, %v2687_v36 }
 0x6b1   : > { %8943 = vst [vmem:[#allocation91_spill] sm:$0xff] %v7773_v15  ;;  %v5385_v58 = vpop.eup %5384  ;;  %v2418_v20 = vpack.c.bf16 %v5383_v46, %v5379_v9  ;;  %v7790_v19 = vadd.f32 %v7594_v11, %v2688_v50  ;;  %v2696_v60 = vunpack.c.h.bf16 %v4463_v40  ;;  %v2697_v11 = vunpack.c.l.bf16 %v7784_v55 }
 0x6b2   : > { %8944 = vst [vmem:[#allocation92_spill] sm:$0xff] %v7781_v34  ;;  %v2340_v4 = vmul.f32 1.442695, %v2288_v2  ;;  %v2342_v27 = vmul.f32 1.442695, %v2289_v28  ;;  %v2419_v37 = vpack.c.bf16 %v5385_v58, %v5381_v1  ;;  %v7796_v15 = vadd.f32 %v5385_v58, %v5383_v46  ;;  %v7801_v1 = vld [vmem:[%s6075_s25 + $0x178] sm:$0xff] }
 0x6b3   : > { %v2255_v56 = vpop.xlane.xlu0 %2254  ;;  %v2695_v34 = vunpack.c.l.bf16 %v4463_v40  ;;  %v2699_v46 = vunpack.c.l.bf16 %v7794_v48  ;;  %v7821_v36 = vadd.f32 %v7600_v12, %v2691_v14  ;;  %v4475_v14 = vld [vmem:[%s6075_s25 + $0x180] sm:$0xff] }
 0x6b4   : > { %8945 = vst [vmem:[#allocation93_spill] sm:$0xff] %v7796_v15  ;;  %5394 = vpow2.f32 %v2340_v4  ;;  %2532 = vmatprep.mubr.bf16.mxu0 %v2419_v37  ;;  %v2290_v2 = vsub.f32 %v7517_v43, %v2255_v56  ;;  %v2291_v9 = vsub.f32 %v7519_v32, %v2255_v56  ;;  %v2700_v37 = vunpack.c.h.bf16 %v7794_v48  ;;  %v8985_v15 = vld [vmem:[#allocation74_spill] sm:$0xff] }
 0x6b5   : > { %5396 = vpow2.f32 %v2342_v27  ;;  %v2960_v43 = vmax.f32 %v7787_v49, %v7790_v19  ;;  %v7810_v32 = vadd.f32 %v7596_v62, %v2689_v21  ;;  %v7813_v56 = vadd.f32 %v7598_v44, %v2690_v59 }
 0x6b6   : > { %v5387_v38 = vpop.eup %5386  ;;  %v2344_v50 = vmul.f32 1.442695, %v2290_v2  ;;  %v2346_v28 = vmul.f32 1.442695, %v2291_v9  ;;  %2533 = vmatmul.mubr.bf16.gmra.mrb[44].mxu0 %v2418_v20  ;;  %v7824_v62 = vadd.f32 %v7604_v39, %v2692_v33  ;;  %v7837_v33 = vadd.f32 %v7618_v61, %v2696_v60 }
 0x6b7   : > { %v5389_v4 = vpop.eup %5388  ;;  %v2258_v40 = vpop.xlane.xlu1 %2257  ;;  %v3387_v60 = vunpack.c.l.bf16 %v4475_v14 }
 0x6b8   : > { %v5391_v27 = vpop.eup %5390  ;;  %5398 = vpow2.f32 %v2344_v50  ;;  %v2292_v20 = vsub.f32 %v7524_v10, %v2258_v40  ;;  %v2293_v48 = vsub.f32 %v7526_v47, %v2258_v40  ;;  %v7818_v2 = vadd.f32 %v5389_v4, %v5387_v38 }
 0x6b9   : > { %v5393_v9 = vpop.eup %5392  ;;  %5400 = vpow2.f32 %v2346_v28  ;;  %v2261_v44 = vpop.xlane.xlu0 %2260  ;;  %v2420_v21 = vpack.c.bf16 %v5391_v27, %v5387_v38  ;;  %v2963_v47 = vmax.f32 %v7810_v32, %v7813_v56  ;;  %v7831_v40 = vadd.f32 %v7616_v23, %v2695_v34 }
 0x6ba   : > { %8946 = vst [vmem:[#allocation94_spill] sm:$0xff] %v7818_v2  ;;  %v2348_v59 = vmul.f32 1.442695, %v2292_v20  ;;  %v2350_v50 = vmul.f32 1.442695, %v2293_v48  ;;  %v2294_v10 = vsub.f32 %v7529_v31, %v2261_v44  ;;  %v2295_v58 = vsub.f32 %v7533_v13, %v2261_v44  ;;  %v7840_v31 = vld [vmem:[%s6075_s25 + $0x188] sm:$0xff] }
 0x6bb   : > { %v2421_v12 = vpack.c.bf16 %v5393_v9, %v5389_v4  ;;  %v7834_v39 = vadd.f32 %v5393_v9, %v5391_v27  ;;  %v7843_v13 = vadd.f32 %v7606_v53, %v2693_v51  ;;  %v7846_v20 = vadd.f32 %v7608_v35, %v2694_v45  ;;  %v8951_v44 = vld [vmem:[#allocation62_spill] sm:$0xff] }
 0x6bc   : > { %5402 = vpow2.f32 %v2348_v59  ;;  %v2352_v38 = vmul.f32 1.442695, %v2294_v10  ;;  %v2354_v28 = vmul.f32 1.442695, %v2295_v58  ;;  %2961 = vmax.xlane.f32.xlu0 %v2960_v43  ;;  %v2702_v23 = vunpack.c.h.bf16 %v7801_v1 }
 0x6bd   : > { %8947 = vst [vmem:[#allocation95_spill] sm:$0xff] %v7834_v39  ;;  %5404 = vpow2.f32 %v2350_v50  ;;  %2540 = vmatprep.mubr.bf16.mxu0 %v2421_v12  ;;  %v2966_v61 = vmax.f32 %v7821_v36, %v7824_v62  ;;  %v3388_v4 = vunpack.c.h.bf16 %v4475_v14  ;;  %v7852_v53 = vadd.f32 %v7624_v41, %v2699_v46  ;;  %v8953_v14 = vld [vmem:[#allocation48_spill] sm:$0xff] }
 0x6be   : > { %v5395_v34 = vpop.eup %5394  ;;  %5406 = vpow2.f32 %v2352_v38  ;;  %2541 = vmatmul.mubr.bf16.gmra.mrb[48].mxu0 %v2420_v21  ;;  %2964 = vmax.xlane.f32.xlu1 %v2963_v47  ;;  %v7855_v35 = vadd.f32 %v7626_v25, %v2700_v37  ;;  %v3389_v45 = vunpack.c.l.bf16 %v7840_v31  ;;  %v2972_v58 = vmax.f32 %v7831_v40, %v7837_v33  ;;  %v8949_v25 = vld [vmem:[#allocation61_spill] sm:$0xff]  ;;  %v8952_v47 = vld [vmem:[#allocation47_spill] sm:$0xff] }
 0x6bf   : > { %v5397_v43 = vpop.eup %5396  ;;  %5408 = vpow2.f32 %v2354_v28  ;;  %v2264_v51 = vpop.xlane.xlu1 %2263  ;;  %v2969_v41 = vmax.f32 %v7843_v13, %v7846_v20  ;;  %v7869_v46 = vadd.f32 %v8949_v25, %v2697_v11  ;;  %v8950_v37 = vunpack.c.h.bf16 %v7784_v55 }
 0x6c0   : > { %v2296_v27 = vsub.f32 %v7538_v29, %v2264_v51  ;;  %v2297_v48 = vsub.f32 %v7540_v42, %v2264_v51  ;;  %2967 = vmax.xlane.f32.xlu0 %v2966_v61  ;;  %v7862_v9 = vadd.f32 %v5397_v43, %v5395_v34  ;;  %v3390_v29 = vunpack.c.h.bf16 %v7840_v31  ;;  %v8954_v61 = vld [vmem:[#allocation65_spill] sm:$0xff]  ;;  %v8955_v51 = vld [vmem:[#allocation66_spill] sm:$0xff] }
 0x6c1   : > { %v7874_v21 = vadd.f32 %v8951_v44, %v8950_v37  ;;  %v2267_v59 = vpop.xlane.xlu0 %2266  ;;  %v2978_v11 = vmax.f32 %v7852_v53, %v7855_v35  ;;  %v7882_v55 = vadd.f32 %v8954_v61, %v3387_v60  ;;  %v7885_v25 = vadd.f32 %v8955_v51, %v3388_v4 }
 0x6c2   : > { %8948 = vst [vmem:[#allocation96_spill] sm:$0xff] %v7862_v9  ;;  %v5399_v42 = vpop.eup %5398  ;;  %v2356_v50 = vmul.f32 1.442695, %v2296_v27  ;;  %v2358_v10 = vmul.f32 1.442695, %v2297_v48  ;;  %v2298_v12 = vsub.f32 %v8952_v47, %v2267_v59  ;;  %v2299_v38 = vsub.f32 %v8953_v14, %v2267_v59  ;;  %2973 = vmax.xlane.f32.xlu1 %v2972_v58  ;;  %v8957_v59 = vld [vmem:[#allocation63_spill] sm:$0xff] }
 0x6c3   : > { %v5401_v28 = vpop.eup %5400  ;;  %v2422_v37 = vpack.c.bf16 %v5399_v42, %v5395_v34  ;;  %v8956_v44 = vunpack.c.l.bf16 %v7801_v1  ;;  %v8958_v47 = vld [vmem:[#allocation64_spill] sm:$0xff]  ;;  %v2975_v34 = vmax.f32 %v7869_v46, %v7874_v21  ;;  %v8984_v9 = vld [vmem:[#allocation69_spill] sm:$0xff] }
 0x6c4   : > { %5410 = vpow2.f32 %v2356_v50  ;;  %v2360_v31 = vmul.f32 1.442695, %v2298_v12  ;;  %v2362_v27 = vmul.f32 1.442695, %v2299_v38  ;;  %2970 = vmax.xlane.f32.xlu0 %v2969_v41  ;;  %v2423_v48 = vpack.c.bf16 %v5401_v28, %v5397_v43 }
 0x6c5   : > { %v7890_v58 = vadd.f32 %v8957_v59, %v8956_v44  ;;  %v7893_v14 = vadd.f32 %v8958_v47, %v2702_v23  ;;  %5412 = vpow2.f32 %v2358_v10  ;;  %v7895_v60 = vadd.f32 %v5401_v28, %v5399_v42  ;;  %v8960_v23 = vld [vmem:[#allocation49_spill] sm:$0xff]  ;;  %v8961_v10 = vld [vmem:[#allocation50_spill] sm:$0xff]  ;;  %v8965_v59 = vld [vmem:[#allocation51_spill] sm:$0xff] }
 0x6c6   : > { %v5403_v61 = vpop.eup %5402  ;;  %5414 = vpow2.f32 %v2360_v31  ;;  %2548 = vmatprep.mubr.bf16.mxu0 %v2423_v48  ;;  %2979 = vmax.xlane.f32.xlu1 %v2978_v11  ;;  %v3652_v41 = vmax.f32 %v7882_v55, %v7885_v25  ;;  %v8963_v11 = vld [vmem:[#allocation67_spill] sm:$0xff] }
 0x6c7   : > { %8959 = vst [vmem:[#allocation61_spill] sm:$0xff] %v7895_v60  ;;  %v5405_v4 = vpop.eup %5404  ;;  %5416 = vpow2.f32 %v2362_v27  ;;  %2549 = vmatmul.mubr.bf16.gmra.mrb[52].mxu0 %v2422_v37  ;;  %v2938_v1 = vpop.xlane.xlu1 %2937  ;;  %v2981_v28 = vmax.f32 %v7890_v58, %v7893_v14  ;;  %v7908_v51 = vadd.f32 %v8963_v11, %v3389_v45  ;;  %v8964_v37 = vld [vmem:[#allocation68_spill] sm:$0xff] }
 0x6c8   : > { %v5407_v43 = vpop.eup %5406  ;;  %v2984_v50 = vsub.f32 %v8960_v23, %v2938_v1  ;;  %v2985_v42 = vsub.f32 %v8961_v10, %v2938_v1  ;;  %2976 = vmax.xlane.f32.xlu0 %v2975_v34  ;;  %v7903_v12 = vadd.f32 %v5405_v4, %v5403_v61  ;;  %v7911_v31 = vadd.f32 %v8964_v37, %v3390_v29  ;;  %v8966_v23 = vld [vmem:[#allocation52_spill] sm:$0xff]  ;;  %v8969_v37 = vld [vmem:[#allocation54_spill] sm:$0xff] }
 0x6c9   : > { %v5409_v38 = vpop.eup %5408  ;;  %v2941_v27 = vpop.xlane.xlu0 %2940  ;;  %v2424_v45 = vpack.c.bf16 %v5407_v43, %v5403_v61 }
 0x6ca   : > { %8962 = vst [vmem:[#allocation62_spill] sm:$0xff] %v7903_v12  ;;  %v3016_v48 = vmul.f32 1.442695, %v2984_v50  ;;  %v3018_v44 = vmul.f32 1.442695, %v2985_v42  ;;  %v2986_v47 = vsub.f32 %v8965_v59, %v2941_v27  ;;  %v2987_v1 = vsub.f32 %v8966_v23, %v2941_v27  ;;  %3653 = vmax.xlane.f32.xlu1 %v3652_v41  ;;  %v8971_v59 = vld [vmem:[#allocation55_spill] sm:$0xff] }
 0x6cb   : > { %v2425_v34 = vpack.c.bf16 %v5409_v38, %v5405_v4  ;;  %v7915_v10 = vadd.f32 %v5409_v38, %v5407_v43  ;;  %v3655_v50 = vmax.f32 %v7908_v51, %v7911_v31  ;;  %v8968_v4 = vld [vmem:[#allocation53_spill] sm:$0xff]  ;;  %v8972_v23 = vld [vmem:[#allocation56_spill] sm:$0xff] }
 0x6cc   : > { %5418 = vpow2.f32 %v3016_v48  ;;  %v3020_v12 = vmul.f32 1.442695, %v2986_v47  ;;  %v3022_v60 = vmul.f32 1.442695, %v2987_v1  ;;  %2982 = vmax.xlane.f32.xlu0 %v2981_v28 }
 0x6cd   : > { %8967 = vst [vmem:[#allocation47_spill] sm:$0xff] %v7915_v10  ;;  %5420 = vpow2.f32 %v3018_v44  ;;  %2556 = vmatprep.mubr.bf16.mxu0 %v2425_v34 }
 0x6ce   : > { %v5411_v29 = vpop.eup %5410  ;;  %5422 = vpow2.f32 %v3020_v12 }
 0x6cf   : > { %v5413_v42 = vpop.eup %5412  ;;  %5424 = vpow2.f32 %v3022_v60  ;;  %2557 = vmatmul.mubr.bf16.gmra.mrb[56].mxu0 %v2424_v45  ;;  %v2944_v11 = vpop.xlane.xlu0 %2943 }
 0x6d0   : > { %v5415_v41 = vpop.eup %5414  ;;  %v2988_v38 = vsub.f32 %v8968_v4, %v2944_v11  ;;  %v2989_v27 = vsub.f32 %v8969_v37, %v2944_v11  ;;  %3656 = vmax.xlane.f32.xlu0 %v3655_v50  ;;  %v7921_v48 = vadd.f32 %v5413_v42, %v5411_v29 }
 0x6d1   : > { %v5417_v28 = vpop.eup %5416  ;;  %v2947_v44 = vpop.xlane.xlu1 %2946  ;;  %v2426_v11 = vpack.c.bf16 %v5415_v41, %v5411_v29 }
 0x6d2   : > { %8970 = vst [vmem:[#allocation48_spill] sm:$0xff] %v7921_v48  ;;  %v3024_v61 = vmul.f32 1.442695, %v2988_v38  ;;  %v3026_v43 = vmul.f32 1.442695, %v2989_v27  ;;  %v2990_v47 = vsub.f32 %v8971_v59, %v2947_v44  ;;  %v2991_v12 = vsub.f32 %v8972_v23, %v2947_v44  ;;  %v8974_v27 = vld [vmem:[#allocation57_spill] sm:$0xff] }
 0x6d3   : > { %v2427_v1 = vpack.c.bf16 %v5417_v28, %v5413_v42  ;;  %v7925_v60 = vadd.f32 %v5417_v28, %v5415_v41  ;;  %v8975_v42 = vld [vmem:[#allocation58_spill] sm:$0xff]  ;;  %v8977_v41 = vld [vmem:[#allocation59_spill] sm:$0xff] }
 0x6d4   : > { %5426 = vpow2.f32 %v3024_v61  ;;  %v3028_v34 = vmul.f32 1.442695, %v2990_v47  ;;  %v3030_v45 = vmul.f32 1.442695, %v2991_v12  ;;  %v8978_v12 = vld [vmem:[#allocation60_spill] sm:$0xff] }
 0x6d5   : > { %8973 = vst [vmem:[#allocation65_spill] sm:$0xff] %v7925_v60  ;;  %5428 = vpow2.f32 %v3026_v43  ;;  %2564 = vmatprep.mubr.bf16.mxu0 %v2427_v1 }
 0x6d6   : > { %v7927_v50 = vpop.eup %5418  ;;  %5430 = vpow2.f32 %v3028_v34  ;;  %v5694_v34 = vld [vmem:[#allocation2 + $0x40] sm:$0xff] }
 0x6d7   : > { %v5421_v4 = vpop.eup %5420  ;;  %5432 = vpow2.f32 %v3030_v45  ;;  %2565 = vmatmul.mubr.bf16.gmra.mrb[60].mxu0 %v2426_v11  ;;  %v2950_v38 = vpop.xlane.xlu0 %2949 }
 0x6d8   : > { %v7929_v37 = vpop.eup %5422  ;;  %v2992_v44 = vsub.f32 %v8974_v27, %v2950_v38  ;;  %v2993_v28 = vsub.f32 %v8975_v42, %v2950_v38  ;;  %v7934_v61 = vadd.f32 %v5421_v4, %v7927_v50 }
 0x6d9   : > { %v5425_v59 = vpop.eup %5424  ;;  %v2953_v43 = vpop.xlane.xlu1 %2952 }
 0x6da   : > { %8976 = vst [vmem:[#allocation66_spill] sm:$0xff] %v7934_v61  ;;  %v3032_v47 = vmul.f32 1.442695, %v2992_v44  ;;  %v3034_v29 = vmul.f32 1.442695, %v2993_v28  ;;  %v2994_v23 = vsub.f32 %v8977_v41, %v2953_v43  ;;  %v2995_v1 = vsub.f32 %v8978_v12, %v2953_v43  ;;  %v5695_v41 = vld [vmem:[#allocation2 + $0x48] sm:$0xff] }
 0x6db   : > { %3876 = vrot.lane.b32.xlu1 %v5694_v34, %s5877_s26  ;;  %v3129_v45 = vpack.c.bf16 %v5425_v59, %v5421_v4  ;;  %v3169_v11 = vpop.permute.xlu0 %3168  ;;  %v7940_v27 = vadd.f32 %v5425_v59, %v7929_v37 }
 0x6dc   : > { %5434 = vpow2.f32 %v3032_v47  ;;  %v3036_v38 = vmul.f32 1.442695, %v2994_v23  ;;  %v3038_v42 = vmul.f32 1.442695, %v2995_v1  ;;  %4849 = vmatprep.subr.bf16.mxu0 %v3169_v11  ;;  %v5696_v1 = vld [vmem:[#allocation2 + $0x8] sm:$0xff] }
 0x6dd   : > { %8979 = vst [vmem:[#allocation63_spill] sm:$0xff] %v7940_v27  ;;  %5436 = vpow2.f32 %v3034_v29  ;;  %3224 = vmatprep.mubr.bf16.mxu0 %v3129_v45  ;;  %v3153_v44 = vpop.permute.xlu1 %3152  ;;  %v5697_v45 = vld [vmem:[#allocation2] sm:$0xff] }
 0x6de   : > { %v7942_v28 = vpop.eup %5426  ;;  %5438 = vpow2.f32 %v3036_v38  ;;  %4850 = vmatpush3.bf16.msra.mxu0 %v3153_v44 }
 0x6df   : > { %v7944_v43 = vpop.eup %5428  ;;  %5440 = vpow2.f32 %v3038_v42  ;;  %3878 = vrot.lane.b32.xlu1 %v5695_v41, %s5877_s26  ;;  %v3171_v4 = vpop.permute.xlu0 %3170 }
 0x6e0   : > { %v7947_v59 = vpop.eup %5430  ;;  %4851 = vmatprep.subr.bf16.mxu0 %v3171_v4  ;;  %v7951_v47 = vadd.f32 %v7944_v43, %v7942_v28  ;;  %v4477_v4 = vld [vmem:[%s6075_s25 + $0x190] sm:$0xff] }
 0x6e1   : > { %v5433_v29 = vpop.eup %5432  ;;  %v3155_v23 = vpop.permute.xlu1 %3154  ;;  %v3391_v60 = vunpack.c.l.bf16 %v4477_v4  ;;  %v3392_v48 = vunpack.c.h.bf16 %v4477_v4 }
 0x6e2   : > { %8980 = vst [vmem:[#allocation64_spill] sm:$0xff] %v7951_v47  ;;  %4852 = vmatpush3.bf16.msra.mxu0 %v3155_v23  ;;  %v7954_v12 = vadd.f32 %v5433_v29, %v7947_v59  ;;  %v4478_v23 = vld [vmem:[%s6075_s25 + $0x198] sm:$0xff] }
 0x6e3   : > { %3862 = vrot.lane.b32.xlu1 %v5696_v1, %s5877_s26  ;;  %v3393_v1 = vunpack.c.l.bf16 %v4478_v23  ;;  %v3394_v10 = vunpack.c.h.bf16 %v4478_v23  ;;  %v7971_v39 = vadd.f32 %v8984_v9, %v3391_v60  ;;  %v8986_v9 = vld [vmem:[#allocation70_spill] sm:$0xff] }
 0x6e4   : > { %8981 = vst [vmem:[#allocation49_spill] sm:$0xff] %v7954_v12  ;;  %v8987_v12 = vld [vmem:[#allocation71_spill] sm:$0xff] }
 0x6e5   : > { %v7977_v2 = vadd.f32 %v7658_v0, %v3393_v1  ;;  %v8988_v1 = vld [vmem:[#allocation72_spill] sm:$0xff] }
 0x6e6   : > { %v7957_v34 = vpop.eup %5434  ;;  %3860 = vrot.lane.b32.xlu0 %v5697_v45, %s5877_s26  ;;  %v7974_v45 = vadd.f32 %v7656_v3, %v3392_v48 }
 0x6e7   : > { %v5437_v11 = vpop.eup %5436 }
 0x6e8   : > { %v7960_v38 = vpop.eup %5438  ;;  %v7963_v42 = vadd.f32 %v5437_v11, %v7957_v34 }
 0x6e9   : > { %v5441_v44 = vpop.eup %5440 }
 0x6ea   : > { %8982 = vst [vmem:[#allocation50_spill] sm:$0xff] %v7963_v42  ;;  %v7966_v41 = vadd.f32 %v5441_v44, %v7960_v38  ;;  %v7980_v42 = vadd.f32 %v8985_v15, %v3394_v10  ;;  %v8989_v15 = vld [vmem:[#allocation73_spill] sm:$0xff] }
 0x6ec   : > { %8983 = vst [vmem:[#allocation67_spill] sm:$0xff] %v7966_v41  ;;  %v3658_v41 = vmax.f32 %v7971_v39, %v7974_v45  ;;  %v3661_v4 = vmax.f32 %v7977_v2, %v7980_v42 }
 0x705   : > { %3659 = vmax.xlane.f32.xlu0 %v3658_v41 }
 0x707   : > { %3662 = vmax.xlane.f32.xlu1 %v3661_v4  ;;  %v5698_v4 = vld [vmem:[#allocation2 + $0x10] sm:$0xff] }
 0x710   : > { %v2956_v23 = vpop.xlane.xlu0 %2955 }
 0x711   : > { %v2996_v60 = vsub.f32 %v8986_v9, %v2956_v23  ;;  %v2997_v3 = vsub.f32 %v8987_v12, %v2956_v23  ;;  %v5699_v9 = vld [vmem:[#allocation2 + $0x50] sm:$0xff] }
 0x712   : > { %v2959_v48 = vpop.xlane.xlu1 %2958 }
 0x713   : > { %v3040_v27 = vmul.f32 1.442695, %v2996_v60  ;;  %v3042_v0 = vmul.f32 1.442695, %v2997_v3  ;;  %v2998_v47 = vsub.f32 %v8988_v1, %v2959_v48  ;;  %v2999_v10 = vsub.f32 %v8989_v15, %v2959_v48  ;;  %v5700_v60 = vld [vmem:[#allocation2 + $0x18] sm:$0xff]  ;;  %v4479_v15 = vld [vmem:[%s6075_s25 + $0x1a0] sm:$0xff] }
 0x714   : > { %v3173_v61 = vpop.permute.xlu0 %3172 }
 0x715   : > { %5442 = vpow2.f32 %v3040_v27  ;;  %v3044_v22 = vmul.f32 1.442695, %v2998_v47  ;;  %v3046_v6 = vmul.f32 1.442695, %v2999_v10  ;;  %4853 = vmatprep.subr.bf16.mxu0 %v3173_v61  ;;  %v3128_v61 = vpack.c.bf16 %v7929_v37, %v7927_v50  ;;  %v5701_v27 = vld [vmem:[#allocation2 + $0x58] sm:$0xff]  ;;  %v4480_v10 = vld [vmem:[%s6075_s25 + $0x1a8] sm:$0xff] }
 0x716   : > { %5444 = vpow2.f32 %v3042_v0  ;;  %v3157_v41 = vpop.permute.xlu1 %3156  ;;  %v3130_v50 = vpack.c.bf16 %v7947_v59, %v7942_v28  ;;  %v3133_v37 = vpack.c.bf16 %v5441_v44, %v5437_v11  ;;  %v8991_v28 = vld [vmem:[#allocation76_spill] sm:$0xff]  ;;  %v8992_v11 = vld [vmem:[#allocation77_spill] sm:$0xff] }
 0x717   : > { %5446 = vpow2.f32 %v3044_v22  ;;  %4854 = vmatpush3.bf16.msra.mxu0 %v3157_v41  ;;  %v3131_v22 = vpack.c.bf16 %v5433_v29, %v7944_v43  ;;  %v3132_v43 = vpack.c.bf16 %v7960_v38, %v7957_v34  ;;  %v3395_v41 = vunpack.c.l.bf16 %v4479_v15  ;;  %v8993_v34 = vld [vmem:[#allocation78_spill] sm:$0xff] }
 0x718   : > { %5448 = vpow2.f32 %v3046_v6  ;;  %3864 = vrot.lane.b32.xlu1 %v5698_v4, %s5877_s26  ;;  %v3175_v12 = vpop.permute.xlu0 %3174  ;;  %v3396_v4 = vunpack.c.h.bf16 %v4479_v15 }
 0x719   : > { %4855 = vmatprep.subr.bf16.mxu0 %v3175_v12 }
 0x71a   : > { %v3159_v23 = vpop.permute.xlu1 %3158  ;;  %v8011_v59 = vadd.f32 %v8991_v28, %v3396_v4 }
 0x71b   : > { %3880 = vrot.lane.b32.xlu0 %v5699_v9, %s5877_s26  ;;  %4856 = vmatpush3.bf16.msra.mxu0 %v3159_v23  ;;  %v3397_v23 = vunpack.c.l.bf16 %v4480_v10  ;;  %v3398_v9 = vunpack.c.h.bf16 %v4480_v10 }
 0x71c   : > { %3866 = vrot.lane.b32.xlu1 %v5700_v60, %s5877_s26  ;;  %v8990_v60 = vld [vmem:[#allocation75_spill] sm:$0xff] }
 0x71d   : > { %v8014_v44 = vadd.f32 %v8992_v11, %v3397_v23  ;;  %v8017_v38 = vadd.f32 %v8993_v34, %v3398_v9 }
 0x71e   : > { %3225 = vmatmul.mubr.bf16.vlgmr.msra.gmra.mrb[64].mxu0 %v3128_v61  ;;  %v8008_v61 = vadd.f32 %v8990_v60, %v3395_v41  ;;  %v5702_v60 = vld [vmem:[#allocation2 + $0x20] sm:$0xff] }
 0x71f   : > { %v5443_v6 = vpop.eup %5442  ;;  %3882 = vrot.lane.b32.xlu0 %v5701_v27, %s5877_s26  ;;  %3232 = vmatprep.mubr.bf16.mxu0 %v3131_v22 }
 0x720   : > { %v5445_v47 = vpop.eup %5444  ;;  %v3664_v22 = vmax.f32 %v8008_v61, %v8011_v59 }
 0x721   : > { %v5447_v3 = vpop.eup %5446  ;;  %v7997_v48 = vadd.f32 %v5445_v47, %v5443_v6 }
 0x722   : > { %v5449_v0 = vpop.eup %5448  ;;  %v3134_v12 = vpack.c.bf16 %v5447_v3, %v5443_v6  ;;  %v3667_v6 = vmax.f32 %v8014_v44, %v8017_v38 }
 0x723   : > { %v7999_v1 = vadd.f32 %v5449_v0, %v5447_v3  ;;  %v3135_v29 = vpack.c.bf16 %v5449_v0, %v5445_v47 }
 0x726   : > { %3233 = vmatmul.mubr.bf16.gmra.mrb[68].mxu0 %v3130_v50 }
 0x727   : > { %3240 = vmatprep.mubr.bf16.mxu0 %v3133_v37 }
 0x72e   : > { %3241 = vmatmul.mubr.bf16.gmra.mrb[72].mxu0 %v3132_v43 }
 0x72f   : > { %3248 = vmatprep.mubr.bf16.mxu0 %v3135_v29 }
 0x736   : > { %3249 = vmatmul.mubr.bf16.gmra.mrb[76].mxu0 %v3134_v12 }
 0x73e   : > { %3665 = vmax.xlane.f32.xlu0 %v3664_v22 }
 0x740   : > { %3668 = vmax.xlane.f32.xlu1 %v3667_v6  ;;  %v5703_v6 = vld [vmem:[#allocation2 + $0x60] sm:$0xff] }
 0x749   : > { %v2962_v27 = vpop.xlane.xlu0 %2961 }
 0x74a   : > { %v3000_v47 = vsub.f32 %v7787_v49, %v2962_v27  ;;  %v3001_v3 = vsub.f32 %v7790_v19, %v2962_v27 }
 0x74b   : > { %v2965_v0 = vpop.xlane.xlu1 %2964 }
 0x74c   : > { %v3048_v50 = vmul.f32 1.442695, %v3000_v47  ;;  %v3050_v37 = vmul.f32 1.442695, %v3001_v3  ;;  %v3002_v43 = vsub.f32 %v7810_v32, %v2965_v0  ;;  %v3003_v29 = vsub.f32 %v7813_v56, %v2965_v0  ;;  %v5704_v47 = vld [vmem:[#allocation2 + $0x28] sm:$0xff] }
 0x74d   : > { %v2968_v15 = vpop.xlane.xlu0 %2967 }
 0x74e   : > { %5450 = vpow2.f32 %v3048_v50  ;;  %v3052_v10 = vmul.f32 1.442695, %v3002_v43  ;;  %v3054_v41 = vmul.f32 1.442695, %v3003_v29  ;;  %v3004_v4 = vsub.f32 %v7821_v36, %v2968_v15  ;;  %v5705_v43 = vld [vmem:[#allocation2 + $0x68] sm:$0xff] }
 0x74f   : > { %5452 = vpow2.f32 %v3050_v37  ;;  %v3005_v12 = vsub.f32 %v7824_v62, %v2968_v15  ;;  %v2974_v23 = vpop.xlane.xlu1 %2973 }
 0x750   : > { %5454 = vpow2.f32 %v3052_v10  ;;  %v3056_v49 = vmul.f32 1.442695, %v3004_v4  ;;  %v3008_v19 = vsub.f32 %v7831_v40, %v2974_v23  ;;  %v3009_v9 = vsub.f32 %v7837_v33, %v2974_v23 }
 0x751   : > { %5456 = vpow2.f32 %v3054_v41  ;;  %v3058_v32 = vmul.f32 1.442695, %v3005_v12  ;;  %3868 = vrot.lane.b32.xlu1 %v5702_v60, %s5877_s26  ;;  %v2971_v56 = vpop.xlane.xlu0 %2970 }
 0x752   : > { %5458 = vpow2.f32 %v3056_v49  ;;  %v3064_v28 = vmul.f32 1.442695, %v3008_v19  ;;  %v3066_v11 = vmul.f32 1.442695, %v3009_v9  ;;  %v3006_v36 = vsub.f32 %v7843_v13, %v2971_v56 }
 0x753   : > { %5460 = vpow2.f32 %v3058_v32  ;;  %v3007_v62 = vsub.f32 %v7846_v20, %v2971_v56  ;;  %v2980_v34 = vpop.xlane.xlu1 %2979 }
 0x754   : > { %5462 = vpow2.f32 %v3064_v28  ;;  %v3060_v22 = vmul.f32 1.442695, %v3006_v36  ;;  %v3012_v40 = vsub.f32 %v7852_v53, %v2980_v34  ;;  %v3013_v33 = vsub.f32 %v7855_v35, %v2980_v34  ;;  %3884 = vrot.lane.b32.xlu0 %v5703_v6, %s5877_s26 }
 0x755   : > { %5464 = vpow2.f32 %v3066_v11  ;;  %v3062_v27 = vmul.f32 1.442695, %v3007_v62  ;;  %3870 = vrot.lane.b32.xlu1 %v5704_v47, %s5877_s26  ;;  %v2977_v3 = vpop.xlane.xlu0 %2976 }
 0x756   : > { %5466 = vpow2.f32 %v3060_v22  ;;  %v3072_v13 = vmul.f32 1.442695, %v3012_v40  ;;  %v3074_v0 = vmul.f32 1.442695, %v3013_v33  ;;  %v3010_v20 = vsub.f32 %v7869_v46, %v2977_v3 }
 0x757   : > { %5468 = vpow2.f32 %v3062_v27  ;;  %v3011_v50 = vsub.f32 %v7874_v21, %v2977_v3  ;;  %v8040_v53 = vpop.xlane.xlu1 %3653 }
 0x758   : > { %v5451_v35 = vpop.eup %5450  ;;  %5470 = vpow2.f32 %v3072_v13  ;;  %v3068_v37 = vmul.f32 1.442695, %v3010_v20  ;;  %3886 = vrot.lane.b32.xlu0 %v5705_v43, %s5877_s26  ;;  %v3700_v10 = vsub.f32 %v7882_v55, %v8040_v53 }
 0x759   : > { %v5453_v29 = vpop.eup %5452  ;;  %5472 = vpow2.f32 %v3074_v0  ;;  %v3070_v15 = vmul.f32 1.442695, %v3011_v50  ;;  %v2983_v41 = vpop.xlane.xlu0 %2982  ;;  %v3701_v50 = vsub.f32 %v7885_v25, %v8040_v53  ;;  %v4481_v53 = vld [vmem:[%s6075_s25 + $0x1b0] sm:$0xff] }
 0x75a   : > { %v5455_v4 = vpop.eup %5454  ;;  %5474 = vpow2.f32 %v3068_v37  ;;  %v3014_v46 = vsub.f32 %v7890_v58, %v2983_v41  ;;  %v3015_v12 = vsub.f32 %v7893_v14, %v2983_v41  ;;  %v8047_v19 = vadd.f32 %v5453_v29, %v5451_v35 }
 0x75b   : > { %v5457_v21 = vpop.eup %5456  ;;  %5476 = vpow2.f32 %v3070_v15  ;;  %v3877_v23 = vpop.permute.xlu1 %3876  ;;  %v3136_v49 = vpack.c.bf16 %v5455_v4, %v5451_v35  ;;  %v3732_v28 = vmul.f32 1.442695, %v3700_v10 }
 0x75c   : > { %v5459_v9 = vpop.eup %5458  ;;  %v3076_v32 = vmul.f32 1.442695, %v3014_v46  ;;  %4937 = vmatprep.subr.bf16.mxu0 %v3877_v23  ;;  %v3137_v60 = vpack.c.bf16 %v5457_v21, %v5453_v29  ;;  %v8049_v56 = vadd.f32 %v5457_v21, %v5455_v4  ;;  %v3078_v11 = vmul.f32 1.442695, %v3015_v12 }
 0x75d   : > { %v5461_v55 = vpop.eup %5460  ;;  %v3657_v36 = vpop.xlane.xlu0 %3656  ;;  %v3734_v4 = vmul.f32 1.442695, %v3701_v50 }
 0x75e   : > { %v5463_v62 = vpop.eup %5462  ;;  %5478 = vpow2.f32 %v3076_v32  ;;  %3256 = vmatprep.mubr.bf16.mxu0 %v3137_v60  ;;  %v3702_v58 = vsub.f32 %v7908_v51, %v3657_v36  ;;  %v8052_v14 = vadd.f32 %v5461_v55, %v5459_v9  ;;  %v3703_v47 = vsub.f32 %v7911_v31, %v3657_v36 }
 0x75f   : > { %v5465_v34 = vpop.eup %5464  ;;  %5480 = vpow2.f32 %v3078_v11  ;;  %3257 = vmatmul.mubr.bf16.gmra.mrb[80].mxu0 %v3136_v49  ;;  %v3879_v22 = vpop.permute.xlu1 %3878  ;;  %v4482_v49 = vld [vmem:[%s6075_s25 + $0x1b8] sm:$0xff]  ;;  %v3400_v32 = vunpack.c.h.bf16 %v4481_v53 }
 0x760   : > { %v5467_v40 = vpop.eup %5466  ;;  %v3736_v33 = vmul.f32 1.442695, %v3702_v58  ;;  %v8054_v6 = vadd.f32 %v5465_v34, %v5463_v62  ;;  %5482 = vpow2.f32 %v3732_v28  ;;  %v3738_v29 = vmul.f32 1.442695, %v3703_v47 }
 0x761   : > { %v5469_v27 = vpop.eup %5468  ;;  %v3861_v3 = vpop.permute.xlu0 %3860  ;;  %v3138_v15 = vpack.c.bf16 %v5467_v40, %v5459_v9  ;;  %v3399_v9 = vunpack.c.l.bf16 %v4481_v53  ;;  %v3401_v11 = vunpack.c.l.bf16 %v4482_v49  ;;  %v3402_v36 = vunpack.c.h.bf16 %v4482_v49 }
 0x762   : > { %v5471_v13 = vpop.eup %5470  ;;  %5484 = vpow2.f32 %v3736_v33  ;;  %4938 = vmatpush3.bf16.msra.mxu0 %v3861_v3  ;;  %v3139_v0 = vpack.c.bf16 %v5469_v27, %v5461_v55  ;;  %v8057_v51 = vadd.f32 %v5469_v27, %v5467_v40  ;;  %v9004_v55 = vld [vmem:[#allocation80_spill] sm:$0xff] }
 0x763   : > { %v5473_v20 = vpop.eup %5472  ;;  %4939 = vmatprep.subr.bf16.mxu0 %v3879_v22  ;;  %v3863_v31 = vpop.permute.xlu1 %3862  ;;  %5486 = vpow2.f32 %v3738_v29  ;;  %v8076_v58 = vadd.f32 %v7688_v63, %v3399_v9  ;;  %v8087_v27 = vadd.f32 %v7694_v26, %v3402_v36 }
 0x764   : > { %v5475_v35 = vpop.eup %5474  ;;  %3264 = vmatprep.mubr.bf16.mxu0 %v3139_v0  ;;  %v8061_v37 = vadd.f32 %v5473_v20, %v5471_v13  ;;  %5488 = vpow2.f32 %v3734_v4 }
 0x765   : > { %v5477_v43 = vpop.eup %5476  ;;  %v3140_v60 = vpack.c.bf16 %v5475_v35, %v5463_v62  ;;  %v8084_v62 = vadd.f32 %v7692_v18, %v3401_v11 }
 0x766   : > { %4940 = vmatpush3.bf16.msra.mxu0 %v3863_v31  ;;  %v3141_v10 = vpack.c.bf16 %v5477_v43, %v5465_v34  ;;  %v8063_v41 = vadd.f32 %v5477_v43, %v5475_v35  ;;  %v8079_v34 = vadd.f32 %v7690_v5, %v3400_v32 }
 0x767   : > { %3265 = vmatmul.mubr.bf16.gmra.mrb[84].mxu0 %v3138_v15  ;;  %v3673_v18 = vmax.f32 %v8084_v62, %v8087_v27 }
 0x768   : > { %v5479_v46 = vpop.eup %5478  ;;  %3272 = vmatprep.mubr.bf16.mxu0 %v3141_v10  ;;  %v3670_v63 = vmax.f32 %v8076_v58, %v8079_v34 }
 0x769   : > { %v5481_v25 = vpop.eup %5480  ;;  %v3142_v50 = vpack.c.bf16 %v5479_v46, %v5471_v13 }
 0x76a   : > { %v8066_v21 = vadd.f32 %v5481_v25, %v5479_v46  ;;  %v8068_v12 = vpop.eup %5482  ;;  %v3143_v28 = vpack.c.bf16 %v5481_v25, %v5473_v20 }
 0x76c   : > { %v8070_v23 = vpop.eup %5484 }
 0x76d   : > { %v8081_v33 = vpop.eup %5486 }
 0x76e   : > { %v8091_v20 = vpop.eup %5488 }
 0x76f   : > { %3273 = vmatmul.mubr.bf16.gmra.mrb[88].mxu0 %v3140_v60  ;;  %v3845_v35 = vpack.c.bf16 %v8081_v33, %v8091_v20  ;;  %v5706_v60 = vld [vmem:[#allocation2 + $0x30] sm:$0xff] }
 0x770   : > { %3280 = vmatprep.mubr.bf16.mxu0 %v3143_v28 }
 0x771   : > { %v4761_v22 = vpop.f32.mrb[32].mxu0 }
 0x772   : > { %v4762_v40 = vpop.f32.mrb[33].mxu0 }
 0x773   : > { %v8089_v47 = vadd.f32 %v4762_v40, %v4761_v22  ;;  %v4764_v3 = vpop.f32.mrb[34].mxu0  ;;  %v5707_v40 = vld [vmem:[#allocation2 + $0x70] sm:$0xff] }
 0x774   : > { %v4765_v0 = vpop.f32.mrb[35].mxu0 }
 0x775   : > { %v8095_v5 = vadd.f32 %v4765_v0, %v4764_v3  ;;  %v5708_v3 = vld [vmem:[#allocation2 + $0x38] sm:$0xff] }
 0x777   : > { %3281 = vmatmul.mubr.bf16.gmra.mrb[92].mxu0 %v3142_v50  ;;  %3671 = vmax.xlane.f32.xlu0 %v3670_v63  ;;  %v5709_v63 = vld [vmem:[#allocation2 + $0x78] sm:$0xff] }
 0x778   : > { %3940 = vmatprep.mubr.bf16.mxu0 %v3845_v35 }
 0x779   : > { %v4767_v26 = vpop.f32.mrb[36].mxu0  ;;  %3674 = vmax.xlane.f32.xlu1 %v3673_v18 }
 0x77a   : > { %v4768_v43 = vpop.f32.mrb[37].mxu0 }
 0x77b   : > { %v8101_v29 = vadd.f32 %v4768_v43, %v4767_v26  ;;  %v4770_v31 = vpop.f32.mrb[38].mxu0 }
 0x77c   : > { %v4771_v15 = vpop.f32.mrb[39].mxu0 }
 0x77d   : > { %v8103_v10 = vadd.f32 %v4771_v15, %v4770_v31 }
 0x781   : > { %v4773_v4 = vpop.f32.mrb[40].mxu0 }
 0x782   : > { %v4774_v13 = vpop.f32.mrb[41].mxu0 }
 0x783   : > { %v8105_v46 = vadd.f32 %v4774_v13, %v4773_v4  ;;  %v4776_v25 = vpop.f32.mrb[42].mxu0 }
 0x784   : > { %v4777_v53 = vpop.f32.mrb[43].mxu0 }
 0x785   : > { %v8107_v49 = vadd.f32 %v4777_v53, %v4776_v25 }
 0x787   : > { %8994 = vst [vmem:[#allocation68_spill] sm:$0xff] %v8107_v49 }
 0x789   : > { %v4779_v9 = vpop.f32.mrb[44].mxu0 }
 0x78a   : > { %v4780_v32 = vpop.f32.mrb[45].mxu0  ;;  %3872 = vrot.lane.b32.xlu1 %v5706_v60, %s5877_s26 }
 0x78b   : > { %v8110_v28 = vadd.f32 %v4780_v32, %v4779_v9  ;;  %v4782_v11 = vpop.f32.mrb[46].mxu0 }
 0x78c   : > { %v4783_v36 = vpop.f32.mrb[47].mxu0 }
 0x78d   : > { %8995 = vst [vmem:[#allocation51_spill] sm:$0xff] %v8110_v28  ;;  %v8112_v22 = vadd.f32 %v4783_v36, %v4782_v11  ;;  %3888 = vrot.lane.b32.xlu0 %v5707_v40, %s5877_s26 }
 0x78e   : > { %3874 = vrot.lane.b32.xlu1 %v5708_v3, %s5877_s26 }
 0x78f   : > { %8996 = vst [vmem:[#allocation52_spill] sm:$0xff] %v8112_v22  ;;  %v4489_v22 = vld [vmem:[%s6075_s25 + $0x1f0] sm:$0xff] }
 0x791   : > { %v4785_v0 = vpop.f32.mrb[48].mxu0  ;;  %3890 = vrot.lane.b32.xlu0 %v5709_v63, %s5877_s26  ;;  %s4511_s26 = sshll.u32 %s5846_s11, 4 }
 0x792   : > { %v4786_v50 = vpop.f32.mrb[49].mxu0  ;;  %v3660_v35 = vpop.xlane.xlu0 %3659 }
 0x793   : > { %v8117_v18 = vadd.f32 %v4786_v50, %v4785_v0  ;;  %v4788_v26 = vpop.f32.mrb[50].mxu0  ;;  %v3704_v43 = vsub.f32 %v7971_v39, %v3660_v35  ;;  %v3705_v31 = vsub.f32 %v7974_v45, %v3660_v35 }
 0x794   : > { %v4789_v15 = vpop.f32.mrb[51].mxu0  ;;  %v3663_v4 = vpop.xlane.xlu1 %3662 }
 0x795   : > { %8997 = vst [vmem:[#allocation53_spill] sm:$0xff] %v8117_v18  ;;  %v8121_v13 = vadd.f32 %v4789_v15, %v4788_v26  ;;  %v3740_v25 = vmul.f32 1.442695, %v3704_v43  ;;  %v3742_v53 = vmul.f32 1.442695, %v3705_v31  ;;  %v3706_v9 = vsub.f32 %v7977_v2, %v3663_v4  ;;  %v4483_v15 = vld [vmem:[%s6075_s25 + $0x1c0] sm:$0xff] }
 0x796   : > { %v3707_v32 = vsub.f32 %v7980_v42, %v3663_v4  ;;  %v3881_v60 = vpop.permute.xlu0 %3880 }
 0x797   : > { %8998 = vst [vmem:[#allocation54_spill] sm:$0xff] %v8121_v13  ;;  %5490 = vpow2.f32 %v3740_v25  ;;  %v3744_v11 = vmul.f32 1.442695, %v3706_v9  ;;  %4941 = vmatprep.subr.bf16.mxu0 %v3881_v60  ;;  %v4484_v60 = vld [vmem:[%s6075_s25 + $0x1c8] sm:$0xff] }
 0x798   : > { %5492 = vpow2.f32 %v3742_v53  ;;  %v3746_v36 = vmul.f32 1.442695, %v3707_v32  ;;  %v3865_v40 = vpop.permute.xlu1 %3864 }
 0x799   : > { %5494 = vpow2.f32 %v3744_v11  ;;  %4942 = vmatpush3.bf16.msra.mxu0 %v3865_v40  ;;  %v3403_v40 = vunpack.c.l.bf16 %v4483_v15 }
 0x79a   : > { %5496 = vpow2.f32 %v3746_v36  ;;  %v4791_v39 = vpop.f32.mrb[52].mxu0  ;;  %v3883_v45 = vpop.permute.xlu0 %3882 }
 0x79b   : > { %v4792_v3 = vpop.f32.mrb[53].mxu0  ;;  %4943 = vmatprep.subr.bf16.mxu0 %v3883_v45 }
 0x79c   : > { %v8125_v0 = vadd.f32 %v4792_v3, %v4791_v39  ;;  %v4794_v2 = vpop.f32.mrb[54].mxu0  ;;  %v3867_v42 = vpop.permute.xlu1 %3866  ;;  %v3404_v39 = vunpack.c.h.bf16 %v4483_v15  ;;  %v4485_v3 = vld [vmem:[%s6075_s25 + $0x1d0] sm:$0xff] }
 0x79d   : > { %v4795_v63 = vpop.f32.mrb[55].mxu0  ;;  %4944 = vmatpush3.bf16.msra.mxu0 %v3867_v42  ;;  %v3406_v42 = vunpack.c.h.bf16 %v4484_v60  ;;  %v3407_v32 = vunpack.c.l.bf16 %v4485_v3 }
 0x79e   : > { %8999 = vst [vmem:[#allocation55_spill] sm:$0xff] %v8125_v0  ;;  %v8127_v50 = vadd.f32 %v4795_v63, %v4794_v2  ;;  %v3405_v2 = vunpack.c.l.bf16 %v4484_v60  ;;  %v4487_v63 = vld [vmem:[%s6075_s25 + $0x1e0] sm:$0xff]  ;;  %v4486_v0 = vld [vmem:[%s6075_s25 + $0x1d8] sm:$0xff] }
 0x79f   : > { %v3411_v13 = vunpack.c.l.bf16 %v4487_v63  ;;  %v3412_v60 = vunpack.c.h.bf16 %v4487_v63  ;;  %v8168_v49 = vadd.f32 %v7715_v16, %v3407_v32  ;;  %v3415_v63 = vunpack.c.l.bf16 %v4489_v22 }
 0x7a0   : > { %9000 = vst [vmem:[#allocation56_spill] sm:$0xff] %v8127_v50  ;;  %v3408_v50 = vunpack.c.h.bf16 %v4485_v3 }
 0x7a1   : > { %v8129_v35 = vpop.eup %5490 }
 0x7a2   : > { %v8131_v26 = vpop.eup %5492  ;;  %v4797_v43 = vpop.f32.mrb[56].mxu0 }
 0x7a3   : > { %v8133_v31 = vpop.eup %5494  ;;  %v4798_v4 = vpop.f32.mrb[57].mxu0 }
 0x7a4   : > { %v8136_v25 = vpop.eup %5496  ;;  %v8138_v53 = vadd.f32 %v4798_v4, %v4797_v43  ;;  %v4800_v9 = vpop.f32.mrb[58].mxu0  ;;  %v9003_v43 = vld [vmem:[#allocation79_spill] sm:$0xff] }
 0x7a5   : > { %v4801_v11 = vpop.f32.mrb[59].mxu0  ;;  %v8150_v4 = vadd.f32 %v9003_v43, %v3403_v40 }
 0x7a6   : > { %9001 = vst [vmem:[#allocation57_spill] sm:$0xff] %v8138_v53  ;;  %v8145_v45 = vadd.f32 %v4801_v11, %v4800_v9  ;;  %v8153_v53 = vadd.f32 %v9004_v55, %v3404_v39  ;;  %v9005_v9 = vld [vmem:[#allocation81_spill] sm:$0xff]  ;;  %v3409_v55 = vunpack.c.l.bf16 %v4486_v0  ;;  %v3410_v39 = vunpack.c.h.bf16 %v4486_v0 }
 0x7a7   : > { %v8157_v11 = vadd.f32 %v9005_v9, %v3405_v2  ;;  %v8171_v2 = vadd.f32 %v7720_v7, %v3408_v50  ;;  %v8179_v0 = vadd.f32 %v7740_v54, %v3411_v13  ;;  %v3416_v9 = vunpack.c.h.bf16 %v4489_v22 }
 0x7a8   : > { %9002 = vst [vmem:[#allocation58_spill] sm:$0xff] %v8145_v45  ;;  %v9006_v45 = vld [vmem:[#allocation82_spill] sm:$0xff]  ;;  %v3676_v3 = vmax.f32 %v8150_v4, %v8153_v53  ;;  %v8187_v50 = vadd.f32 %v7724_v52, %v3409_v55 }
 0x7a9   : > { %v8160_v18 = vadd.f32 %v9006_v45, %v3406_v42  ;;  %v4488_v45 = vld [vmem:[%s6075_s25 + $0x1e8] sm:$0xff]  ;;  %v3682_v7 = vmax.f32 %v8168_v49, %v8171_v2  ;;  %v8199_v22 = vadd.f32 %v7763_v30, %v3416_v9  ;;  %v9011_v9 = vld [vmem:[#allocation83_spill] sm:$0xff] }
 0x7aa   : > { %v4803_v36 = vpop.f32.mrb[60].mxu0  ;;  %v3413_v16 = vunpack.c.l.bf16 %v4488_v45  ;;  %v3414_v32 = vunpack.c.h.bf16 %v4488_v45 }
 0x7ab   : > { %v4804_v15 = vpop.f32.mrb[61].mxu0 }
 0x7ac   : > { %v8163_v40 = vadd.f32 %v4804_v15, %v4803_v36  ;;  %v4806_v43 = vpop.f32.mrb[62].mxu0  ;;  %v3679_v36 = vmax.f32 %v8157_v11, %v8160_v18  ;;  %v8182_v15 = vadd.f32 %v7742_v24, %v3412_v60  ;;  %v8196_v24 = vadd.f32 %v7760_v57, %v3415_v63  ;;  %v9008_v60 = vld [vmem:[#allocation87_spill] sm:$0xff] }
 0x7ad   : > { %v4807_v28 = vpop.f32.mrb[63].mxu0  ;;  %v8207_v55 = vadd.f32 %v9008_v60, %v3414_v32  ;;  %v9010_v63 = vld [vmem:[#allocation91_spill] sm:$0xff]  ;;  %v9014_v32 = vld [vmem:[#allocation66_spill] sm:$0xff] }
 0x7ae   : > { %v8174_v42 = vadd.f32 %v4807_v28, %v4806_v43  ;;  %v8190_v28 = vadd.f32 %v7727_v8, %v3410_v39  ;;  %v4490_v43 = vld [vmem:[%s6075_s25 + $0x1f8] sm:$0xff]  ;;  %v3688_v54 = vmax.f32 %v8179_v0, %v8182_v15  ;;  %v8204_v8 = vadd.f32 %v7744_v17, %v3413_v16  ;;  %v9012_v16 = vld [vmem:[#allocation85_spill] sm:$0xff]  ;;  %v9017_v60 = vld [vmem:[#allocation63_spill] sm:$0xff]  ;;  %s5878_s25 = smov 8  }
 0x7af   : > { %v3417_v13 = vunpack.c.l.bf16 %v4490_v43  ;;  %v3418_v39 = vunpack.c.h.bf16 %v4490_v43  ;;  %v3694_v57 = vmax.f32 %v8196_v24, %v8199_v22  ;;  %v9015_v43 = vld [vmem:[#allocation86_spill] sm:$0xff] }
 0x7b0   : > { %9007 = vst [vmem:[#allocation59_spill] sm:$0xff] %v8174_v42  ;;  %3677 = vmax.xlane.f32.xlu0 %v3676_v3  ;;  %v3685_v52 = vmax.f32 %v8187_v50, %v8190_v28  ;;  %v3691_v30 = vmax.f32 %v8204_v8, %v8207_v55  ;;  %v9009_v3 = vld [vmem:[#allocation90_spill] sm:$0xff] }
 0x7b1   : > { %v8214_v45 = vadd.f32 %v9009_v3, %v3417_v13 }
 0x7b2   : > { %3680 = vmax.xlane.f32.xlu1 %v3679_v36  ;;  %v8217_v36 = vadd.f32 %v9010_v63, %v3418_v39  ;;  %v3796_v39 = vadd.f32 %v8091_v20, %v8068_v12  ;;  %v3799_v20 = vadd.f32 %v8081_v33, %v8070_v23 }
 0x7b4   : > { %3683 = vmax.xlane.f32.xlu0 %v3682_v7  ;;  %v3697_v17 = vmax.f32 %v8214_v45, %v8217_v36  ;;  %v9013_v7 = vld [vmem:[#allocation84_spill] sm:$0xff] }
 0x7b6   : > { %3689 = vmax.xlane.f32.xlu1 %v3688_v54  ;;  %v9016_v54 = vld [vmem:[#allocation64_spill] sm:$0xff] }
 0x7b8   : > { %3686 = vmax.xlane.f32.xlu0 %v3685_v52 }
 0x7ba   : > { %3695 = vmax.xlane.f32.xlu1 %v3694_v57 }
 0x7bc   : > { %3692 = vmax.xlane.f32.xlu0 %v3691_v30 }
 0x7be   : > { %2365 = vadd.xlane.f32.xlu1 %v9011_v9 }
 0x7c0   : > { %3698 = vmax.xlane.f32.xlu0 %v3697_v17 }
 0x7c2   : > { %2371 = vadd.xlane.f32.xlu1 %v9012_v16  ;;  %v9018_v16 = vld [vmem:[#allocation49_spill] sm:$0xff] }
 0x7c4   : > { %2368 = vadd.xlane.f32.xlu0 %v9013_v7 }
 0x7c6   : > { %3081 = vadd.xlane.f32.xlu1 %v9014_v32 }
 0x7c8   : > { %2374 = vadd.xlane.f32.xlu0 %v9015_v43 }
 0x7ca   : > { %3087 = vadd.xlane.f32.xlu1 %v9016_v54  ;;  %v9019_v54 = vld [vmem:[#allocation88_spill] sm:$0xff] }
 0x7cb   : > { %v3666_v13 = vpop.xlane.xlu0 %3665 }
 0x7cc   : > { %v3708_v52 = vsub.f32 %v8008_v61, %v3666_v13  ;;  %3084 = vadd.xlane.f32.xlu0 %v9017_v60  ;;  %v3709_v63 = vsub.f32 %v8011_v59, %v3666_v13  ;;  %v3802_v61 = vadd.f32 %v8131_v26, %v8129_v35  ;;  %v3805_v13 = vadd.f32 %v8136_v25, %v8133_v31  ;;  %v9020_v60 = vld [vmem:[#allocation92_spill] sm:$0xff] }
 0x7cd   : > { %v3669_v57 = vpop.xlane.xlu1 %3668 }
 0x7ce   : > { %v3748_v30 = vmul.f32 1.442695, %v3708_v52  ;;  %v3710_v3 = vsub.f32 %v8014_v44, %v3669_v57  ;;  %3797 = vadd.xlane.f32.xlu1 %v3796_v39  ;;  %v3750_v44 = vmul.f32 1.442695, %v3709_v63  ;;  %v3711_v59 = vsub.f32 %v8017_v38, %v3669_v57  ;;  %v9022_v57 = vld [vmem:[#allocation50_spill] sm:$0xff] }
 0x7cf   : > { %v3885_v17 = vpop.permute.xlu0 %3884 }
 0x7d0   : > { %v3752_v9 = vmul.f32 1.442695, %v3710_v3  ;;  %3090 = vadd.xlane.f32.xlu0 %v9018_v16  ;;  %4945 = vmatprep.subr.bf16.mxu0 %v3885_v17  ;;  %5498 = vpow2.f32 %v3748_v30  ;;  %v3754_v52 = vmul.f32 1.442695, %v3711_v59  ;;  %v9021_v30 = vld [vmem:[#allocation89_spill] sm:$0xff]  ;;  %v9024_v17 = vld [vmem:[#allocation67_spill] sm:$0xff] }
 0x7d1   : > { %v3869_v7 = vpop.permute.xlu1 %3868  ;;  %v9023_v3 = vld [vmem:[#allocation93_spill] sm:$0xff] }
 0x7d2   : > { %5500 = vpow2.f32 %v3752_v9  ;;  %3803 = vadd.xlane.f32.xlu1 %v3802_v61  ;;  %4946 = vmatpush3.bf16.msra.mxu0 %v3869_v7 }
 0x7d3   : > { %v3887_v32 = vpop.permute.xlu0 %3886  ;;  %5502 = vpow2.f32 %v3750_v44 }
 0x7d4   : > { %3800 = vadd.xlane.f32.xlu0 %v3799_v20  ;;  %4947 = vmatprep.subr.bf16.mxu0 %v3887_v32  ;;  %5504 = vpow2.f32 %v3754_v52 }
 0x7d5   : > { %v3871_v43 = vpop.permute.xlu1 %3870 }
 0x7d6   : > { %2377 = vadd.xlane.f32.xlu1 %v9019_v54  ;;  %4948 = vmatpush3.bf16.msra.mxu0 %v3871_v43 }
 0x7d8   : > { %3806 = vadd.xlane.f32.xlu0 %v3805_v13 }
 0x7da   : > { %2383 = vadd.xlane.f32.xlu1 %v9020_v60  ;;  %v8243_v39 = vpop.eup %5498 }
 0x7dc   : > { %v8245_v33 = vpop.eup %5500  ;;  %2380 = vadd.xlane.f32.xlu0 %v9021_v30 }
 0x7dd   : > { %v8252_v63 = vpop.eup %5502 }
 0x7de   : > { %3093 = vadd.xlane.f32.xlu1 %v9022_v57  ;;  %v3808_v9 = vadd.f32 %v8252_v63, %v8243_v39  ;;  %v8258_v16 = vpop.eup %5504 }
 0x7df   : > { %v3811_v61 = vadd.f32 %v8258_v16, %v8245_v33 }
 0x7e0   : > { %2386 = vadd.xlane.f32.xlu0 %v9023_v3 }
 0x7e2   : > { %3099 = vadd.xlane.f32.xlu1 %v7997_v48 }
 0x7e4   : > { %3096 = vadd.xlane.f32.xlu0 %v9024_v17 }
 0x7e6   : > { %3809 = vadd.xlane.f32.xlu1 %v3808_v9 }
 0x7e8   : > { %3102 = vadd.xlane.f32.xlu0 %v7999_v1 }
 0x7ec   : > { %3812 = vadd.xlane.f32.xlu0 %v3811_v61 }
 0x7f1   : > { %v4857_v7 = vpop.f32.mrb[64].mxu0 }
 0x7f2   : > { %v4858_v20 = vpop.f32.mrb[65].mxu0 }
 0x7f3   : > { %v8263_v44 = vadd.f32 %v4858_v20, %v4857_v7  ;;  %v4860_v32 = vpop.f32.mrb[66].mxu0 }
 0x7f4   : > { %v4861_v48 = vpop.f32.mrb[67].mxu0 }
 0x7f5   : > { %v8265_v59 = vadd.f32 %v4861_v48, %v4860_v32 }
 0x7f9   : > { %v4863_v43 = vpop.f32.mrb[68].mxu0 }
 0x7fa   : > { %v4864_v54 = vpop.f32.mrb[69].mxu0 }
 0x7fb   : > { %v8267_v13 = vadd.f32 %v4864_v54, %v4863_v43  ;;  %v4866_v52 = vpop.f32.mrb[70].mxu0 }
 0x7fc   : > { %v4867_v60 = vpop.f32.mrb[71].mxu0 }
 0x7fd   : > { %v8269_v30 = vadd.f32 %v4867_v60, %v4866_v52 }
 0x801   : > { %v4869_v1 = vpop.f32.mrb[72].mxu0 }
 0x802   : > { %v4870_v57 = vpop.f32.mrb[73].mxu0 }
 0x803   : > { %v8271_v3 = vadd.f32 %v4870_v57, %v4869_v1  ;;  %v4872_v17 = vpop.f32.mrb[74].mxu0 }
 0x804   : > { %v4873_v9 = vpop.f32.mrb[75].mxu0  ;;  %v3672_v61 = vpop.xlane.xlu0 %3671 }
 0x805   : > { %v8273_v7 = vadd.f32 %v4873_v9, %v4872_v17  ;;  %v3712_v20 = vsub.f32 %v8076_v58, %v3672_v61  ;;  %v3713_v32 = vsub.f32 %v8079_v34, %v3672_v61 }
 0x806   : > { %v3675_v48 = vpop.xlane.xlu1 %3674 }
 0x807   : > { %v3756_v43 = vmul.f32 1.442695, %v3712_v20  ;;  %v3758_v54 = vmul.f32 1.442695, %v3713_v32  ;;  %v3714_v38 = vsub.f32 %v8084_v62, %v3675_v48  ;;  %v3715_v52 = vsub.f32 %v8087_v27, %v3675_v48 }
 0x808   : > { %v3889_v60 = vpop.permute.xlu0 %3888  ;;  %v9026_v48 = vpack.c.bf16 %v8136_v25, %v8131_v26  ;;  %v9030_v26 = vld [vmem:[#allocation96_spill] sm:$0xff]  ;;  %v9031_v25 = vld [vmem:[#allocation61_spill] sm:$0xff] }
 0x809   : > { %5506 = vpow2.f32 %v3756_v43  ;;  %v3760_v1 = vmul.f32 1.442695, %v3714_v38  ;;  %v3762_v57 = vmul.f32 1.442695, %v3715_v52  ;;  %v4875_v42 = vpop.f32.mrb[76].mxu0  ;;  %4949 = vmatprep.subr.bf16.mxu0 %v3889_v60  ;;  %v9025_v38 = vpack.c.bf16 %v8070_v23, %v8068_v12  ;;  %v9028_v12 = vld [vmem:[#allocation94_spill] sm:$0xff] }
 0x80a   : > { %5508 = vpow2.f32 %v3758_v54  ;;  %v3873_v17 = vpop.permute.xlu1 %3872  ;;  %v4876_v9 = vpop.f32.mrb[77].mxu0  ;;  %v9029_v23 = vld [vmem:[#allocation95_spill] sm:$0xff] }
 0x80b   : > { %5510 = vpow2.f32 %v3760_v1  ;;  %v8279_v58 = vadd.f32 %v4876_v9, %v4875_v42  ;;  %v4878_v34 = vpop.f32.mrb[78].mxu0  ;;  %4950 = vmatpush3.bf16.msra.mxu0 %v3873_v17  ;;  %v3849_v1 = vpack.c.bf16 %v8258_v16, %v8252_v63  ;;  %v9032_v9 = vpack.c.bf16 %v8245_v33, %v8243_v39 }
 0x80c   : > { %5512 = vpow2.f32 %v3762_v57  ;;  %v4879_v61 = vpop.f32.mrb[79].mxu0  ;;  %v3891_v20 = vpop.permute.xlu0 %3890  ;;  %v9027_v57 = vpack.c.bf16 %v8133_v31, %v8129_v35 }
 0x80d   : > { %v8281_v62 = vadd.f32 %v4879_v61, %v4878_v34  ;;  %4951 = vmatprep.subr.bf16.mxu0 %v3891_v20 }
 0x80e   : > { %v3875_v27 = vpop.permute.xlu1 %3874 }
 0x80f   : > { %4952 = vmatpush3.bf16.msra.mxu0 %v3875_v27 }
 0x812   : > { %3941 = vmatmul.mubr.bf16.vlgmr.msra.gmra.mrb[96].mxu0 %v9025_v38 }
 0x813   : > { %v5507_v32 = vpop.eup %5506  ;;  %3948 = vmatprep.mubr.bf16.mxu0 %v9026_v48 }
 0x814   : > { %v5509_v42 = vpop.eup %5508 }
 0x815   : > { %v5511_v43 = vpop.eup %5510  ;;  %v3814_v54 = vadd.f32 %v5509_v42, %v5507_v32 }
 0x816   : > { %v5513_v52 = vpop.eup %5512  ;;  %v3850_v35 = vpack.c.bf16 %v5511_v43, %v5507_v32 }
 0x817   : > { %3815 = vadd.xlane.f32.xlu1 %v3814_v54  ;;  %v3817_v60 = vadd.f32 %v5513_v52, %v5511_v43  ;;  %v3851_v17 = vpack.c.bf16 %v5513_v52, %v5509_v42 }
 0x819   : > { %3818 = vadd.xlane.f32.xlu0 %v3817_v60 }
 0x81a   : > { %3949 = vmatmul.mubr.bf16.gmra.mrb[100].mxu0 %v9027_v57 }
 0x81b   : > { %2389 = vadd.xlane.f32.xlu1 %v9028_v12  ;;  %3956 = vmatprep.mubr.bf16.mxu0 %v3849_v1 }
 0x81d   : > { %2392 = vadd.xlane.f32.xlu0 %v9029_v23 }
 0x81f   : > { %2395 = vadd.xlane.f32.xlu1 %v9030_v26 }
 0x821   : > { %2398 = vadd.xlane.f32.xlu0 %v9031_v25 }
 0x822   : > { %3957 = vmatmul.mubr.bf16.gmra.mrb[104].mxu0 %v9032_v9 }
 0x823   : > { %3105 = vadd.xlane.f32.xlu1 %v8047_v19  ;;  %3964 = vmatprep.mubr.bf16.mxu0 %v3851_v17 }
 0x825   : > { %3108 = vadd.xlane.f32.xlu0 %v8049_v56 }
 0x827   : > { %3111 = vadd.xlane.f32.xlu1 %v8052_v14 }
 0x829   : > { %3114 = vadd.xlane.f32.xlu0 %v8057_v51 }
 0x82a   : > { %3965 = vmatmul.mubr.bf16.gmra.mrb[108].mxu0 %v3850_v35 }
 0x832   : > { %v4881_v31 = vpop.f32.mrb[80].mxu0 }
 0x833   : > { %v4882_v63 = vpop.f32.mrb[81].mxu0 }
 0x834   : > { %v8305_v16 = vadd.f32 %v4882_v63, %v4881_v31  ;;  %v4884_v34 = vpop.f32.mrb[82].mxu0 }
 0x835   : > { %v4885_v61 = vpop.f32.mrb[83].mxu0 }
 0x836   : > { %v8307_v20 = vadd.f32 %v4885_v61, %v4884_v34 }
 0x83a   : > { %v4887_v39 = vpop.f32.mrb[84].mxu0 }
 0x83b   : > { %v4888_v33 = vpop.f32.mrb[85].mxu0 }
 0x83c   : > { %v8309_v19 = vadd.f32 %v4888_v33, %v4887_v39  ;;  %v4890_v27 = vpop.f32.mrb[86].mxu0 }
 0x83d   : > { %v4891_v56 = vpop.f32.mrb[87].mxu0  ;;  %v3678_v38 = vpop.xlane.xlu0 %3677 }
 0x83e   : > { %v8311_v14 = vadd.f32 %v4891_v56, %v4890_v27  ;;  %v3716_v51 = vsub.f32 %v8150_v4, %v3678_v38  ;;  %v3717_v32 = vsub.f32 %v8153_v53, %v3678_v38 }
 0x83f   : > { %v3681_v48 = vpop.xlane.xlu1 %3680 }
 0x840   : > { %v3764_v42 = vmul.f32 1.442695, %v3716_v51  ;;  %v3766_v43 = vmul.f32 1.442695, %v3717_v32  ;;  %v3718_v54 = vsub.f32 %v8157_v11, %v3681_v48  ;;  %v3719_v52 = vsub.f32 %v8160_v18, %v3681_v48 }
 0x841   : > { %v3684_v60 = vpop.xlane.xlu0 %3683 }
 0x842   : > { %5514 = vpow2.f32 %v3764_v42  ;;  %v3768_v1 = vmul.f32 1.442695, %v3718_v54  ;;  %v3770_v57 = vmul.f32 1.442695, %v3719_v52  ;;  %v4893_v12 = vpop.f32.mrb[88].mxu0  ;;  %v3720_v23 = vsub.f32 %v8168_v49, %v3684_v60 }
 0x843   : > { %5516 = vpow2.f32 %v3766_v43  ;;  %v3721_v26 = vsub.f32 %v8171_v2, %v3684_v60  ;;  %v4894_v4 = vpop.f32.mrb[89].mxu0  ;;  %v3690_v25 = vpop.xlane.xlu1 %3689 }
 0x844   : > { %5518 = vpow2.f32 %v3768_v1  ;;  %v3772_v53 = vmul.f32 1.442695, %v3720_v23  ;;  %v8319_v17 = vadd.f32 %v4894_v4, %v4893_v12  ;;  %v4896_v9 = vpop.f32.mrb[90].mxu0  ;;  %v3725_v31 = vsub.f32 %v8182_v15, %v3690_v25 }
 0x845   : > { %5520 = vpow2.f32 %v3770_v57  ;;  %v3774_v11 = vmul.f32 1.442695, %v3721_v26  ;;  %v4897_v18 = vpop.f32.mrb[91].mxu0  ;;  %v3687_v35 = vpop.xlane.xlu0 %3686  ;;  %v3724_v61 = vsub.f32 %v8179_v0, %v3690_v25 }
 0x846   : > { %5522 = vpow2.f32 %v3772_v53  ;;  %v8322_v63 = vadd.f32 %v4897_v18, %v4896_v9  ;;  %v3722_v49 = vsub.f32 %v8187_v50, %v3687_v35  ;;  %v3723_v2 = vsub.f32 %v8190_v28, %v3687_v35 }
 0x847   : > { %5524 = vpow2.f32 %v3774_v11  ;;  %v3696_v34 = vpop.xlane.xlu1 %3695  ;;  %v3782_v56 = vmul.f32 1.442695, %v3725_v31  ;;  %v3780_v42 = vmul.f32 1.442695, %v3724_v61 }
 0x848   : > { %v3776_v39 = vmul.f32 1.442695, %v3722_v49  ;;  %v3778_v33 = vmul.f32 1.442695, %v3723_v2 }
 0x849   : > { %v3693_v27 = vpop.xlane.xlu0 %3692 }
 0x84a   : > { %5526 = vpow2.f32 %v3776_v39  ;;  %v4899_v38 = vpop.f32.mrb[92].mxu0  ;;  %v3726_v51 = vsub.f32 %v8204_v8, %v3693_v27  ;;  %v3727_v15 = vsub.f32 %v8207_v55, %v3693_v27  ;;  %v3729_v55 = vsub.f32 %v8199_v22, %v3696_v34 }
 0x84b   : > { %5528 = vpow2.f32 %v3778_v33  ;;  %v4900_v32 = vpop.f32.mrb[93].mxu0  ;;  %v2366_v48 = vpop.xlane.xlu1 %2365 }
 0x84c   : > { %v5515_v50 = vpop.eup %5514  ;;  %v8329_v43 = vadd.f32 %v4900_v32, %v4899_v38  ;;  %v4902_v28 = vpop.f32.mrb[94].mxu0  ;;  %v3784_v0 = vmul.f32 1.442695, %v3726_v51  ;;  %v3786_v52 = vmul.f32 1.442695, %v3727_v15  ;;  %5530 = vpow2.f32 %v3782_v56 }
 0x84d   : > { %v5517_v54 = vpop.eup %5516  ;;  %v4903_v60 = vpop.f32.mrb[95].mxu0  ;;  %v3790_v2 = vmul.f32 1.442695, %v3729_v55 }
 0x84e   : > { %v3699_v1 = vpop.xlane.xlu0 %3698  ;;  %v5519_v57 = vpop.eup %5518  ;;  %v8331_v12 = vadd.f32 %v4903_v60, %v4902_v28  ;;  %5532 = vpow2.f32 %v3786_v52  ;;  %v3820_v4 = vadd.f32 %v5517_v54, %v5515_v50  ;;  %v9034_v60 = vld [vmem:[#allocation47_spill] sm:$0xff] }
 0x84f   : > { %v3731_v8 = vsub.f32 %v8217_v36, %v3699_v1  ;;  %v5521_v23 = vpop.eup %5520  ;;  %v2372_v26 = vpop.xlane.xlu1 %2371  ;;  %5534 = vpow2.f32 %v3780_v42  ;;  %v3852_v9 = vpack.c.bf16 %v5519_v57, %v5515_v50  ;;  %v3728_v36 = vsub.f32 %v8196_v24, %v3696_v34 }
 0x850   : > { %v5523_v25 = vpop.eup %5522  ;;  %v3823_v53 = vadd.f32 %v5521_v23, %v5519_v57  ;;  %5536 = vpow2.f32 %v3784_v0  ;;  %3821 = vadd.xlane.f32.xlu1 %v3820_v4  ;;  %v3853_v35 = vpack.c.bf16 %v5521_v23, %v5517_v54  ;;  %v3730_v33 = vsub.f32 %v8214_v45, %v3699_v1  ;;  %v9035_v57 = vld [vmem:[#allocation48_spill] sm:$0xff] }
 0x851   : > { %v5525_v11 = vpop.eup %5524  ;;  %v3794_v18 = vmul.f32 1.442695, %v3731_v8  ;;  %5538 = vrcp.f32 %v2366_v48  ;;  %v3788_v51 = vmul.f32 1.442695, %v3728_v36  ;;  %v9033_v48 = vld [vmem:[#allocation62_spill] sm:$0xff] }
 0x852   : > { %v2369_v31 = vpop.xlane.xlu0 %2368  ;;  %3824 = vadd.xlane.f32.xlu0 %v3823_v53  ;;  %v3826_v49 = vadd.f32 %v5525_v11, %v5523_v25  ;;  %5540 = vrcp.f32 %v2372_v26  ;;  %3972 = vmatprep.mubr.bf16.mxu0 %v3853_v35  ;;  %v3792_v32 = vmul.f32 1.442695, %v3730_v33 }
 0x853   : > { %v3082_v22 = vpop.xlane.xlu1 %3081  ;;  %5542 = vrcp.f32 %v2369_v31  ;;  %3973 = vmatmul.mubr.bf16.gmra.mrb[112].mxu0 %v3852_v9  ;;  %v9036_v9 = vld [vmem:[#allocation65_spill] sm:$0xff] }
 0x854   : > { %v5527_v61 = vpop.eup %5526  ;;  %5544 = vpow2.f32 %v3794_v18  ;;  %3827 = vadd.xlane.f32.xlu1 %v3826_v49 }
 0x855   : > { %v5529_v39 = vpop.eup %5528  ;;  %v3854_v45 = vpack.c.bf16 %v5527_v61, %v5523_v25 }
 0x856   : > { %v2375_v27 = vpop.xlane.xlu0 %2374  ;;  %v3855_v56 = vpack.c.bf16 %v5529_v39, %v5525_v11  ;;  %v3829_v38 = vadd.f32 %v5529_v39, %v5527_v61  ;;  %v5531_v24 = vpop.eup %5530 }
 0x857   : > { %5546 = vrcp.f32 %v2375_v27  ;;  %v3088_v15 = vpop.xlane.xlu1 %3087 }
 0x858   : > { %5548 = vpow2.f32 %v3790_v2  ;;  %3980 = vmatprep.mubr.bf16.mxu0 %v3855_v56  ;;  %3830 = vadd.xlane.f32.xlu0 %v3829_v38  ;;  %v5533_v34 = vpop.eup %5532 }
 0x859   : > { %5550 = vrcp.f32 %v3082_v22  ;;  %2401 = vadd.xlane.f32.xlu1 %v9033_v48  ;;  %v5535_v42 = vpop.eup %5534  ;;  %v3857_v28 = vpack.c.bf16 %v5533_v34, %v5531_v24 }
 0x85a   : > { %v3085_v50 = vpop.xlane.xlu0 %3084  ;;  %v5537_v54 = vpop.eup %5536  ;;  %v3832_v38 = vadd.f32 %v5535_v42, %v5531_v24 }
 0x85b   : > { %5552 = vrcp.f32 %v3085_v50  ;;  %v8338_v0 = vpop.xlane.xlu1 %3797  ;;  %v5539_v52 = vpop.eup %5538  ;;  %3981 = vmatmul.mubr.bf16.gmra.mrb[116].mxu0 %v3854_v45 }
 0x85c   : > { %5554 = vpow2.f32 %v3788_v51  ;;  %2404 = vadd.xlane.f32.xlu0 %v9034_v60  ;;  %v5541_v1 = vpop.eup %5540  ;;  %3988 = vmatprep.mubr.bf16.mxu0 %v3857_v28  ;;  %v8345_v4 = vmul.f32 %v5539_v52, %v8089_v47  ;;  %v9039_v52 = vld [vmem:[#allocation35_spill] sm:$0xff] }
 0x85d   : > { %5556 = vrcp.f32 %v3088_v15  ;;  %2407 = vadd.xlane.f32.xlu1 %v9035_v57  ;;  %v5543_v23 = vpop.eup %5542  ;;  %v8357_v31 = vmul.f32 %v5541_v1, %v8101_v29  ;;  %v9040_v57 = vld [vmem:[#allocation68_spill] sm:$0xff] }
 0x85e   : > { %5558 = vpow2.f32 %v3792_v32  ;;  %v3091_v8 = vpop.xlane.xlu0 %3090  ;;  %v5545_v55 = vpop.eup %5544  ;;  %v8348_v25 = vmul.f32 %v5543_v23, %v8095_v5  ;;  %v3856_v5 = vpack.c.bf16 %v5537_v54, %v5535_v42  ;;  %v3835_v32 = vadd.f32 %v5537_v54, %v5533_v34  ;;  %v9038_v54 = vld [vmem:[#allocation34_spill] sm:$0xff] }
 0x85f   : > { %5560 = vrcp.f32 %v3091_v8  ;;  %v8342_v26 = vpop.xlane.xlu1 %3803 }
 0x860   : > { %2410 = vadd.xlane.f32.xlu0 %v9036_v9  ;;  %v2605_v35 = vpack.c.bf16 %v8348_v25, %v8345_v4  ;;  %v9041_v9 = vld [vmem:[#allocation36_spill] sm:$0xff] }
 0x861   : > { %v5547_v53 = vpop.eup %5546  ;;  %3117 = vadd.xlane.f32.xlu1 %v8054_v6 }
 0x862   : > { %v5549_v11 = vpop.eup %5548  ;;  %v8352_v18 = vpop.xlane.xlu0 %3800  ;;  %v8360_v47 = vmul.f32 %v5547_v53, %v8103_v10 }
 0x863   : > { %v5551_v49 = vpop.eup %5550  ;;  %v2378_v36 = vpop.xlane.xlu1 %2377  ;;  %v3859_v2 = vpack.c.bf16 %v5545_v55, %v5549_v11  ;;  %3989 = vmatmul.mubr.bf16.gmra.mrb[120].mxu0 %v3856_v5 }
 0x864   : > { %v2606_v22 = vpack.c.bf16 %v8360_v47, %v8357_v31  ;;  %3120 = vadd.xlane.f32.xlu0 %v8063_v41  ;;  %v8369_v10 = vmul.f32 %v5551_v49, %v8263_v44  ;;  %5562 = vrcp.f32 %v2378_v36  ;;  %v9043_v49 = vld [vmem:[#allocation51_spill] sm:$0xff]  ;;  %v9044_v36 = vld [vmem:[#allocation52_spill] sm:$0xff]  ;;  %v9056_v47 = vld [vmem:[#allocation53_spill] sm:$0xff] }
 0x865   : > { %v5553_v61 = vpop.eup %5552  ;;  %3123 = vadd.xlane.f32.xlu1 %v8061_v37  ;;  %3996 = vmatprep.mubr.bf16.mxu0 %v3859_v2 }
 0x866   : > { %v5555_v6 = vpop.eup %5554  ;;  %v8366_v29 = vpop.xlane.xlu0 %3806  ;;  %v8372_v39 = vmul.f32 %v5553_v61, %v8265_v59 }
 0x867   : > { %v5557_v33 = vpop.eup %5556  ;;  %v2384_v56 = vpop.xlane.xlu1 %2383  ;;  %v3838_v24 = vadd.f32 %v5555_v6, %v5549_v11  ;;  %v9042_v11 = vld [vmem:[#allocation37_spill] sm:$0xff] }
 0x868   : > { %v5559_v27 = vpop.eup %5558  ;;  %v3321_v51 = vpack.c.bf16 %v8372_v39, %v8369_v10  ;;  %3126 = vadd.xlane.f32.xlu0 %v8066_v21  ;;  %v8378_v15 = vmul.f32 %v5557_v33, %v8267_v13  ;;  %v9045_v33 = vld [vmem:[#allocation38_spill] sm:$0xff] }
 0x869   : > { %v5561_v41 = vpop.eup %5560  ;;  %3833 = vadd.xlane.f32.xlu1 %v3832_v38  ;;  %v3858_v59 = vpack.c.bf16 %v5559_v27, %v5555_v6  ;;  %v3841_v42 = vadd.f32 %v5559_v27, %v5545_v55  ;;  %v9046_v27 = vld [vmem:[#allocation39_spill] sm:$0xff] }
 0x86a   : > { %v2381_v37 = vpop.xlane.xlu0 %2380  ;;  %v8381_v44 = vmul.f32 %v5561_v41, %v8269_v30  ;;  %v9037_v30 = vld [vmem:[#allocation33_spill] sm:$0xff] }
 0x86b   : > { %5564 = vrcp.f32 %v2381_v37  ;;  %v3094_v48 = vpop.xlane.xlu1 %3093  ;;  %3997 = vmatmul.mubr.bf16.gmra.mrb[124].mxu0 %v3858_v59  ;;  %v9048_v59 = vld [vmem:[#allocation16_spill] sm:$0xff] }
 0x86c   : > { %v3322_v50 = vpack.c.bf16 %v8381_v44, %v8378_v15  ;;  %5566 = vrcp.f32 %v2384_v56  ;;  %3836 = vadd.xlane.f32.xlu0 %v3835_v32  ;;  %v9047_v44 = vld [vmem:[#allocation15_spill] sm:$0xff] }
 0x86d   : > { %3839 = vadd.xlane.f32.xlu1 %v3838_v24  ;;  %v9050_v24 = vld [vmem:[#allocation18_spill] sm:$0xff] }
 0x86e   : > { %v2387_v21 = vpop.xlane.xlu0 %2386  ;;  %v5563_v28 = vpop.eup %5562 }
 0x86f   : > { %5568 = vrcp.f32 %v2387_v21  ;;  %v3100_v13 = vpop.xlane.xlu1 %3099  ;;  %v8389_v1 = vmul.f32 %v5563_v28, %v8105_v46  ;;  %v9051_v21 = vld [vmem:[#allocation19_spill] sm:$0xff] }
 0x870   : > { %5570 = vrcp.f32 %v3094_v48  ;;  %3842 = vadd.xlane.f32.xlu0 %v3841_v42  ;;  %v9052_v42 = vld [vmem:[#allocation20_spill] sm:$0xff] }
 0x871   : > { %1674 = vadd.xlane.f32.xlu1 %v9037_v30  ;;  %v9054_v30 = vld [vmem:[#allocation22_spill] sm:$0xff] }
 0x872   : > { %v3097_v45 = vpop.xlane.xlu0 %3096 }
 0x873   : > { %5572 = vrcp.f32 %v3097_v45 }
 0x874   : > { %5574 = vrcp.f32 %v3100_v13  ;;  %1677 = vadd.xlane.f32.xlu0 %v9038_v54  ;;  %v9053_v13 = vld [vmem:[#allocation21_spill] sm:$0xff] }
 0x875   : > { %v5565_v34 = vpop.eup %5564  ;;  %1680 = vadd.xlane.f32.xlu1 %v9039_v52 }
 0x876   : > { %v3103_v60 = vpop.xlane.xlu0 %3102  ;;  %v8392_v8 = vmul.f32 %v5565_v34, %v9040_v57  ;;  %v5567_v23 = vpop.eup %5566 }
 0x877   : > { %5576 = vrcp.f32 %v3103_v60  ;;  %v8399_v5 = vmul.f32 %v5567_v23, %v9043_v49  ;;  %v9057_v60 = vld [vmem:[#allocation54_spill] sm:$0xff] }
 0x878   : > { %v2607_v55 = vpack.c.bf16 %v8392_v8, %v8389_v1  ;;  %1683 = vadd.xlane.f32.xlu0 %v9041_v9 }
 0x879   : > { %v5569_v53 = vpop.eup %5568  ;;  %1686 = vadd.xlane.f32.xlu1 %v9042_v11  ;;  %v9058_v11 = vld [vmem:[#allocation55_spill] sm:$0xff] }
 0x87a   : > { %v8402_v2 = vmul.f32 %v5569_v53, %v9044_v36  ;;  %v5571_v46 = vpop.eup %5570  ;;  %v8439_v45 = vpop.xlane.xlu0 %3812  ;;  %v9059_v36 = vld [vmem:[#allocation56_spill] sm:$0xff] }
 0x87b   : > { %v8409_v56 = vmul.f32 %v5571_v46, %v8271_v3 }
 0x87c   : > { %v2608_v61 = vpack.c.bf16 %v8402_v2, %v8399_v5  ;;  %1689 = vadd.xlane.f32.xlu0 %v9045_v33 }
 0x87d   : > { %v5573_v6 = vpop.eup %5572  ;;  %1692 = vadd.xlane.f32.xlu1 %v9046_v27 }
 0x87e   : > { %v8412_v38 = vmul.f32 %v5573_v6, %v8273_v7  ;;  %v5575_v41 = vpop.eup %5574  ;;  %v9049_v7 = vld [vmem:[#allocation17_spill] sm:$0xff] }
 0x87f   : > { %v8419_v32 = vmul.f32 %v5575_v41, %v8279_v58  ;;  %v9055_v58 = vld [vmem:[#allocation23_spill] sm:$0xff] }
 0x880   : > { %v3323_v37 = vpack.c.bf16 %v8412_v38, %v8409_v56  ;;  %1695 = vadd.xlane.f32.xlu0 %v9047_v44 }
 0x881   : > { %v5577_v15 = vpop.eup %5576  ;;  %1698 = vadd.xlane.f32.xlu1 %v9048_v59 }
 0x882   : > { %v8422_v48 = vmul.f32 %v5577_v15, %v8281_v62  ;;  %v8437_v62 = vpop.xlane.xlu1 %3809 }
 0x884   : > { %v3324_v3 = vpack.c.bf16 %v8422_v48, %v8419_v32  ;;  %1701 = vadd.xlane.f32.xlu0 %v9049_v7 }
 0x885   : > { %1704 = vadd.xlane.f32.xlu1 %v9050_v24 }
 0x888   : > { %1707 = vadd.xlane.f32.xlu0 %v9051_v21 }
 0x889   : > { %1710 = vadd.xlane.f32.xlu1 %v9052_v42 }
 0x88c   : > { %1713 = vadd.xlane.f32.xlu0 %v9053_v13 }
 0x88d   : > { %1716 = vadd.xlane.f32.xlu1 %v9054_v30 }
 0x890   : > { %1719 = vadd.xlane.f32.xlu0 %v9055_v58 }
 0x89e   : > { %2621 = vrot.lane.b32.xlu1 %v2605_v35, %s5878_s25 }
 0x8a2   : > { %3337 = vrot.lane.b32.xlu1 %v3321_v51, %s5879_s14 }
 0x8a4   : > { %v8445_v28 = vpop.xlane.xlu1 %3815 }
 0x8a6   : > { %3339 = vrot.lane.b32.xlu1 %v3322_v50, %s5879_s14  ;;  %2623 = vrot.lane.b32.xlu0 %v2606_v22, %s5878_s25  ;;  %v8452_v4 = vpop.xlane.xlu0 %3818 }
 0x8a8   : > { %v2390_v25 = vpop.xlane.xlu1 %2389 }
 0x8a9   : > { %5578 = vrcp.f32 %v2390_v25  ;;  %v5288_v25 = vld [vmem:[%s8783_s6] sm:$0xff]  }
 0x8aa   : > { %v2393_v35 = vpop.xlane.xlu0 %2392  ;;  %5047 = vmatprep.subr.bf16.mxu1 %v5288_v25 }
 0x8ab   : > { %5580 = vrcp.f32 %v2393_v35  ;;  %5048 = vmatpush3.bf16.msra.mxu1 %v5288_v25 }
 0x8ac   : > { %v2396_v34 = vpop.xlane.xlu1 %2395 }
 0x8ad   : > { %5582 = vrcp.f32 %v2396_v34 }
 0x8ae   : > { %v2399_v54 = vpop.xlane.xlu0 %2398 }
 0x8af   : > { %5584 = vrcp.f32 %v2399_v54 }
 0x8b0   : > { %v3106_v10 = vpop.xlane.xlu1 %3105 }
 0x8b1   : > { %5586 = vrcp.f32 %v3106_v10 }
 0x8b2   : > { %v3109_v39 = vpop.xlane.xlu0 %3108 }
 0x8b3   : > { %v5579_v51 = vpop.eup %5578  ;;  %5588 = vrcp.f32 %v3109_v39 }
 0x8b4   : > { %v3112_v50 = vpop.xlane.xlu1 %3111  ;;  %v8455_v22 = vmul.f32 %v5579_v51, %v9056_v47 }
 0x8b5   : > { %v5581_v52 = vpop.eup %5580  ;;  %5590 = vrcp.f32 %v3112_v50 }
 0x8b6   : > { %v3115_v31 = vpop.xlane.xlu0 %3114  ;;  %v8458_v57 = vmul.f32 %v5581_v52, %v9057_v60 }
 0x8b7   : > { %v5583_v23 = vpop.eup %5582  ;;  %5592 = vrcp.f32 %v3115_v31 }
 0x8b8   : > { %v2609_v53 = vpack.c.bf16 %v8458_v57, %v8455_v22  ;;  %v8463_v49 = vmul.f32 %v5583_v23, %v9058_v11  ;;  %5594 = vrcp.f32 %v8338_v0  ;;  %v5289_v23 = vld [vmem:[%s8783_s6 + $0x8] sm:$0xff]  }
 0x8b9   : > { %v5585_v9 = vpop.eup %5584  ;;  %5596 = vrcp.f32 %v8352_v18  ;;  %5049 = vmatprep.subr.bf16.mxu1 %v5289_v23 }
 0x8ba   : > { %v8466_v46 = vmul.f32 %v5585_v9, %v9059_v36  ;;  %5598 = vrcp.f32 %v8342_v26  ;;  %5050 = vmatpush3.bf16.msra.mxu1 %v5289_v23 }
 0x8bb   : > { %v5587_v6 = vpop.eup %5586  ;;  %5600 = vrcp.f32 %v8366_v29 }
 0x8bc   : > { %v2610_v33 = vpack.c.bf16 %v8466_v46, %v8463_v49  ;;  %v8471_v41 = vmul.f32 %v5587_v6, %v8305_v16  ;;  %v9065_v46 = vld [vmem:[#allocation28_spill] sm:$0xff] }
 0x8bd   : > { %v5589_v27 = vpop.eup %5588 }
 0x8be   : > { %v8474_v15 = vmul.f32 %v5589_v27, %v8307_v20 }
 0x8bf   : > { %v5591_v44 = vpop.eup %5590 }
 0x8c0   : > { %v3325_v59 = vpack.c.bf16 %v8474_v15, %v8471_v41  ;;  %v8479_v24 = vmul.f32 %v5591_v44, %v8309_v19 }
 0x8c1   : > { %v5593_v7 = vpop.eup %5592 }
 0x8c2   : > { %v8482_v21 = vmul.f32 %v5593_v7, %v8311_v14  ;;  %v5595_v34 = vpop.eup %5594 }
 0x8c3   : > { %v5597_v39 = vpop.eup %5596 }
 0x8c4   : > { %v3326_v42 = vpack.c.bf16 %v8482_v21, %v8479_v24  ;;  %v5599_v36 = vpop.eup %5598  ;;  %v9067_v24 = vld [vmem:[#allocation27_spill] sm:$0xff] }
 0x8c5   : > { %v5601_v6 = vpop.eup %5600 }
 0x8dd   : > { %v8486_v13 = vpop.xlane.xlu1 %3821 }
 0x8df   : > { %v8490_v16 = vpop.xlane.xlu0 %3824 }
 0x8e1   : > { %v8492_v20 = vpop.xlane.xlu1 %3827 }
 0x8e5   : > { %v8494_v30 = vpop.xlane.xlu0 %3830  ;;  %v4953_v19 = vpop.f32.mrb[96].mxu0 }
 0x8e6   : > { %v2402_v14 = vpop.xlane.xlu1 %2401  ;;  %v4954_v58 = vpop.f32.mrb[97].mxu0 }
 0x8e7   : > { %v4955_v0 = vadd.f32 %v4954_v58, %v4953_v19  ;;  %v4956_v35 = vpop.f32.mrb[98].mxu0  ;;  %5602 = vrcp.f32 %v2402_v14 }
 0x8e8   : > { %v4957_v18 = vpop.f32.mrb[99].mxu0 }
 0x8e9   : > { %v4958_v54 = vadd.f32 %v4957_v18, %v4956_v35  ;;  %v2405_v10 = vpop.xlane.xlu0 %2404  ;;  %v4021_v26 = vmul.f32 %v5595_v34, %v4955_v0  ;;  %v9060_v34 = vld [vmem:[#allocation57_spill] sm:$0xff] }
 0x8ea   : > { %v2408_v51 = vpop.xlane.xlu1 %2407  ;;  %5604 = vrcp.f32 %v2405_v10  ;;  %v9061_v10 = vld [vmem:[#allocation58_spill] sm:$0xff] }
 0x8eb   : > { %v4022_v50 = vmul.f32 %v5597_v39, %v4958_v54  ;;  %5606 = vrcp.f32 %v2408_v51 }
 0x8ec   : > { %5608 = vrcp.f32 %v8437_v62 }
 0x8ed   : > { %v4037_v52 = vpack.c.bf16 %v4022_v50, %v4021_v26  ;;  %v2411_v31 = vpop.xlane.xlu0 %2410  ;;  %v4959_v29 = vpop.f32.mrb[100].mxu0 }
 0x8ee   : > { %v3118_v47 = vpop.xlane.xlu1 %3117  ;;  %5610 = vrcp.f32 %v2411_v31  ;;  %v4960_v60 = vpop.f32.mrb[101].mxu0 }
 0x8ef   : > { %5612 = vrcp.f32 %v8439_v45  ;;  %v4961_v9 = vadd.f32 %v4960_v60, %v4959_v29  ;;  %v4962_v11 = vpop.f32.mrb[102].mxu0  ;;  %4053 = vrot.lane.b32.xlu0 %v4037_v52, %s5880_s23 }
 0x8f0   : > { %5614 = vrcp.f32 %v3118_v47  ;;  %v4963_v62 = vpop.f32.mrb[103].mxu0 }
 0x8f1   : > { %v4964_v27 = vadd.f32 %v4963_v62, %v4962_v11  ;;  %v3121_v44 = vpop.xlane.xlu0 %3120  ;;  %v5603_v7 = vpop.eup %5602  ;;  %v4023_v14 = vmul.f32 %v5599_v36, %v4961_v9 }
 0x8f2   : > { %v3124_v19 = vpop.xlane.xlu1 %3123  ;;  %5616 = vrcp.f32 %v3121_v44  ;;  %v8512_v54 = vmul.f32 %v5603_v7, %v9060_v34 }
 0x8f3   : > { %v4024_v58 = vmul.f32 %v5601_v6, %v4964_v27  ;;  %2625 = vrot.lane.b32.xlu0 %v2607_v55, %s5878_s25  ;;  %5618 = vrcp.f32 %v3124_v19 }
 0x8f4   : > { %v5605_v45 = vpop.eup %5604 }
 0x8f5   : > { %v5607_v25 = vpop.eup %5606  ;;  %v4038_v0 = vpack.c.bf16 %v4024_v58, %v4023_v14  ;;  %v3127_v35 = vpop.xlane.xlu0 %3126  ;;  %v8515_v39 = vmul.f32 %v5605_v45, %v9061_v10 }
 0x8f6   : > { %v4965_v18 = vpop.f32.mrb[104].mxu0  ;;  %v8517_v51 = vpop.xlane.xlu1 %3833  ;;  %5620 = vrcp.f32 %v3127_v35  ;;  %v8520_v50 = vmul.f32 %v5607_v25, %v8163_v40 }
 0x8f7   : > { %v4966_v26 = vpop.f32.mrb[105].mxu0  ;;  %v5609_v1 = vpop.eup %5608  ;;  %5622 = vrcp.f32 %v8445_v28  ;;  %4055 = vrot.lane.b32.xlu1 %v4038_v0, %s5880_s23  ;;  %3341 = vrot.lane.b32.xlu0 %v3323_v37, %s5879_s14  ;;  %v2611_v52 = vpack.c.bf16 %v8515_v39, %v8512_v54  ;;  %v9062_v28 = vld [vmem:[#allocation59_spill] sm:$0xff] }
 0x8f8   : > { %v4967_v8 = vadd.f32 %v4966_v26, %v4965_v18  ;;  %v4968_v55 = vpop.f32.mrb[106].mxu0  ;;  %v5611_v31 = vpop.eup %5610  ;;  %5624 = vrcp.f32 %v8452_v4 }
 0x8f9   : > { %v4969_v40 = vpop.f32.mrb[107].mxu0  ;;  %v5613_v29 = vpop.eup %5612  ;;  %v8534_v23 = vmul.f32 %v5611_v31, %v9062_v28  ;;  %v9064_v31 = vld [vmem:[#allocation26_spill] sm:$0xff] }
 0x8fa   : > { %v4970_v47 = vadd.f32 %v4969_v40, %v4968_v55  ;;  %v8531_v60 = vpop.xlane.xlu0 %3836  ;;  %v5615_v9 = vpop.eup %5614  ;;  %v4025_v36 = vmul.f32 %v5609_v1, %v4967_v8  ;;  %v9063_v8 = vld [vmem:[#allocation24_spill] sm:$0xff] }
 0x8fb   : > { %v8536_v11 = vpop.xlane.xlu1 %3839  ;;  %2627 = vrot.lane.b32.xlu1 %v2608_v61, %s5878_s25  ;;  %v2612_v38 = vpack.c.bf16 %v8534_v23, %v8520_v50  ;;  %v8547_v27 = vmul.f32 %v5615_v9, %v8319_v17 }
 0x8fc   : > { %v4026_v56 = vmul.f32 %v5613_v29, %v4970_v47  ;;  %v5617_v37 = vpop.eup %5616  ;;  %v9066_v47 = vld [vmem:[#allocation25_spill] sm:$0xff] }
 0x8fd   : > { %v4971_v6 = vpop.f32.mrb[108].mxu0  ;;  %v8550_v44 = vmul.f32 %v5617_v37, %v8322_v63  ;;  %v5619_v7 = vpop.eup %5618 }
 0x8fe   : > { %v4039_v4 = vpack.c.bf16 %v4026_v56, %v4025_v36  ;;  %v8544_v62 = vpop.xlane.xlu0 %3842  ;;  %v4972_v14 = vpop.f32.mrb[109].mxu0  ;;  %v8560_v0 = vmul.f32 %v5619_v7, %v8329_v43 }
 0x8ff   : > { %v1675_v19 = vpop.xlane.xlu1 %1674  ;;  %v4973_v58 = vadd.f32 %v4972_v14, %v4971_v6  ;;  %v4974_v5 = vpop.f32.mrb[110].mxu0  ;;  %3343 = vrot.lane.b32.xlu1 %v3324_v3, %s5879_s14  ;;  %v3327_v2 = vpack.c.bf16 %v8550_v44, %v8547_v27 }
 0x900   : > { %4057 = vrot.lane.b32.xlu0 %v4039_v4, %s5880_s23  ;;  %v5621_v17 = vpop.eup %5620  ;;  %5626 = vrcp.f32 %v1675_v19  ;;  %v4975_v61 = vpop.f32.mrb[111].mxu0 }
 0x901   : > { %v5623_v63 = vpop.eup %5622  ;;  %v4976_v45 = vadd.f32 %v4975_v61, %v4974_v5  ;;  %v8563_v35 = vmul.f32 %v5621_v17, %v8331_v12  ;;  %v9069_v17 = vld [vmem:[#allocation30_spill] sm:$0xff] }
 0x902   : > { %v1678_v25 = vpop.xlane.xlu0 %1677  ;;  %v5625_v18 = vpop.eup %5624  ;;  %v4027_v48 = vmul.f32 %v5623_v63, %v4973_v58  ;;  %v9070_v63 = vld [vmem:[#allocation32_spill] sm:$0xff] }
 0x903   : > { %v1681_v32 = vpop.xlane.xlu1 %1680  ;;  %5628 = vrcp.f32 %v1678_v25  ;;  %v4028_v3 = vmul.f32 %v5625_v18, %v4976_v45  ;;  %v3328_v34 = vpack.c.bf16 %v8563_v35, %v8560_v0 }
 0x904   : > { %2629 = vrot.lane.b32.xlu0 %v2609_v53, %s5878_s25  ;;  %5630 = vrcp.f32 %v1681_v32 }
 0x905   : > { %v4040_v10 = vpack.c.bf16 %v4028_v3, %v4027_v48 }
 0x906   : > { %v1684_v43 = vpop.xlane.xlu0 %1683 }
 0x907   : > { %v1687_v26 = vpop.xlane.xlu1 %1686  ;;  %5632 = vrcp.f32 %v1684_v43  ;;  %4059 = vrot.lane.b32.xlu1 %v4040_v10, %s5880_s23  ;;  %v9071_v10 = vld [vmem:[#allocation31_spill] sm:$0xff] }
 0x908   : > { %3345 = vrot.lane.b32.xlu0 %v3325_v59, %s5879_s14  ;;  %5634 = vrcp.f32 %v1687_v26  ;;  %v9072_v26 = vld [vmem:[#allocation40_spill] sm:$0xff] }
 0x90a   : > { %v1690_v12 = vpop.xlane.xlu0 %1689  ;;  %v5627_v1 = vpop.eup %5626 }
 0x90b   : > { %v1693_v22 = vpop.xlane.xlu1 %1692  ;;  %5636 = vrcp.f32 %v1690_v12  ;;  %2631 = vrot.lane.b32.xlu1 %v2610_v33, %s5878_s25  ;;  %v1898_v55 = vmul.f32 %v5627_v1, %v9063_v8 }
 0x90c   : > { %5638 = vrcp.f32 %v1693_v22 }
 0x90d   : > { %v5629_v57 = vpop.eup %5628 }
 0x90e   : > { %v1696_v53 = vpop.xlane.xlu0 %1695  ;;  %v1899_v40 = vmul.f32 %v5629_v57, %v9064_v31  ;;  %v5631_v29 = vpop.eup %5630 }
 0x90f   : > { %v1699_v41 = vpop.xlane.xlu1 %1698  ;;  %5640 = vrcp.f32 %v1696_v53  ;;  %3347 = vrot.lane.b32.xlu1 %v3326_v42, %s5879_s14  ;;  %v1900_v33 = vmul.f32 %v5631_v29, %v9065_v46  ;;  %v9068_v42 = vld [vmem:[#allocation29_spill] sm:$0xff] }
 0x910   : > { %v1914_v15 = vpack.c.bf16 %v1899_v40, %v1898_v55  ;;  %5642 = vrcp.f32 %v1699_v41  ;;  %v9073_v55 = vld [vmem:[#allocation41_spill] sm:$0xff]  ;;  %v9074_v40 = vld [vmem:[#allocation42_spill] sm:$0xff] }
 0x911   : > { %v5633_v59 = vpop.eup %5632 }
 0x912   : > { %v1702_v49 = vpop.xlane.xlu0 %1701  ;;  %1922 = vst.msk [vmem:[#allocation3] sm:$0xff] %vm1343_vm2, %v1914_v15  ;;  %v1901_v28 = vmul.f32 %v5633_v59, %v9066_v47  ;;  %v5635_v9 = vpop.eup %5634 }
 0x913   : > { %v1705_v36 = vpop.xlane.xlu1 %1704  ;;  %5644 = vrcp.f32 %v1702_v49  ;;  %v1902_v21 = vmul.f32 %v5635_v9, %v9067_v24 }
 0x914   : > { %v1915_v56 = vpack.c.bf16 %v1901_v28, %v1900_v33  ;;  %5646 = vrcp.f32 %v1705_v36  ;;  %v9076_v33 = vld [vmem:[#allocation44_spill] sm:$0xff] }
 0x915   : > { %v5637_v37 = vpop.eup %5636 }
 0x916   : > { %v1708_v4 = vpop.xlane.xlu0 %1707  ;;  %1923 = vst.msk [vmem:[#allocation3 + $0x8] sm:$0xff] %vm1343_vm2, %v1915_v56  ;;  %v1903_v6 = vmul.f32 %v5637_v37, %v9068_v42  ;;  %v5639_v7 = vpop.eup %5638 }
 0x917   : > { %v1711_v19 = vpop.xlane.xlu1 %1710  ;;  %5648 = vrcp.f32 %v1708_v4  ;;  %v1904_v61 = vmul.f32 %v5639_v7, %v9069_v17 }
 0x918   : > { %v1916_v14 = vpack.c.bf16 %v1903_v6, %v1902_v21  ;;  %5650 = vrcp.f32 %v1711_v19  ;;  %v9077_v21 = vld [vmem:[#allocation45_spill] sm:$0xff]  ;;  %v9078_v6 = vld [vmem:[#allocation46_spill] sm:$0xff] }
 0x919   : > { %v5641_v58 = vpop.eup %5640 }
 0x91a   : > { %v1714_v5 = vpop.xlane.xlu0 %1713  ;;  %1924 = vst.msk [vmem:[#allocation3 + $0x10] sm:$0xff] %vm1343_vm2, %v1916_v14  ;;  %v1905_v45 = vmul.f32 %v5641_v58, %v9070_v63  ;;  %v5643_v25 = vpop.eup %5642 }
 0x91b   : > { %v1717_v18 = vpop.xlane.xlu1 %1716  ;;  %5652 = vrcp.f32 %v1714_v5  ;;  %v1906_v43 = vmul.f32 %v5643_v25, %v9071_v10 }
 0x91c   : > { %v1917_v32 = vpack.c.bf16 %v1905_v45, %v1904_v61  ;;  %5654 = vrcp.f32 %v1717_v18 }
 0x91d   : > { %v5645_v48 = vpop.eup %5644 }
 0x91e   : > { %v1720_v3 = vpop.xlane.xlu0 %1719  ;;  %1925 = vst.msk [vmem:[#allocation3 + $0x18] sm:$0xff] %vm1343_vm2, %v1917_v32  ;;  %v1907_v12 = vmul.f32 %v5645_v48, %v9072_v26  ;;  %v5647_v1 = vpop.eup %5646 }
 0x91f   : > { %v2622_v22 = vpop.permute.xlu1 %2621  ;;  %5656 = vrcp.f32 %v1720_v3  ;;  %v1908_v31 = vmul.f32 %v5647_v1, %v9073_v55 }
 0x920   : > { %2646 = vst.msk [vmem:[#allocation3] sm:$0xff] %vm2645_vm3, %v2622_v22  ;;  %v1918_v57 = vpack.c.bf16 %v1907_v12, %v1906_v43  ;;  %5658 = vrcp.f32 %v8486_v13  ;;  %v9075_v13 = vld [vmem:[#allocation43_spill] sm:$0xff] }
 0x921   : > { %v5649_v53 = vpop.eup %5648  ;;  %5660 = vrcp.f32 %v8490_v16 }
 0x922   : > { %v2624_v8 = vpop.permute.xlu0 %2623  ;;  %1926 = vst.msk [vmem:[#allocation3 + $0x20] sm:$0xff] %vm1343_vm2, %v1918_v57  ;;  %v1909_v29 = vmul.f32 %v5649_v53, %v9074_v40  ;;  %v5651_v41 = vpop.eup %5650  ;;  %5662 = vrcp.f32 %v8492_v20 }
 0x923   : > { %v3338_v15 = vpop.permute.xlu1 %3337  ;;  %2647 = vst.msk [vmem:[#allocation3 + $0x8] sm:$0xff] %vm2645_vm3, %v2624_v8  ;;  %v1910_v46 = vmul.f32 %v5651_v41, %v9075_v13  ;;  %5664 = vrcp.f32 %v8494_v30 }
 0x924   : > { %3362 = vst.msk [vmem:[#allocation3] sm:$0xff] %vm3361_vm4, %v3338_v15  ;;  %v1919_v59 = vpack.c.bf16 %v1909_v29, %v1908_v31  ;;  %5666 = vrcp.f32 %v8517_v51 }
 0x925   : > { %v5653_v49 = vpop.eup %5652  ;;  %5668 = vrcp.f32 %v8531_v60 }
 0x926   : > { %1927 = vst.msk [vmem:[#allocation3 + $0x28] sm:$0xff] %vm1343_vm2, %v1919_v59  ;;  %v1911_v47 = vmul.f32 %v5653_v49, %v9076_v33  ;;  %v5655_v28 = vpop.eup %5654  ;;  %v4977_v36 = vpop.f32.mrb[112].mxu0  ;;  %5670 = vrcp.f32 %v8536_v11 }
 0x927   : > { %v3340_v9 = vpop.permute.xlu1 %3339  ;;  %v4978_v37 = vpop.f32.mrb[113].mxu0  ;;  %v1912_v42 = vmul.f32 %v5655_v28, %v9077_v21  ;;  %5672 = vrcp.f32 %v8544_v62 }
 0x928   : > { %3363 = vst.msk [vmem:[#allocation3 + $0x8] sm:$0xff] %vm3361_vm4, %v3340_v9  ;;  %v1920_v56 = vpack.c.bf16 %v1911_v47, %v1910_v46  ;;  %v4979_v4 = vadd.f32 %v4978_v37, %v4977_v36  ;;  %v4980_v24 = vpop.f32.mrb[114].mxu0 }
 0x929   : > { %v5657_v16 = vpop.eup %5656  ;;  %v4981_v14 = vpop.f32.mrb[115].mxu0 }
 0x92a   : > { %1928 = vst.msk [vmem:[#allocation3 + $0x30] sm:$0xff] %vm1343_vm2, %v1920_v56  ;;  %v1913_v7 = vmul.f32 %v5657_v16, %v9078_v6  ;;  %v5659_v19 = vpop.eup %5658  ;;  %v4982_v5 = vadd.f32 %v4981_v14, %v4980_v24 }
 0x92b   : > { %v4029_v58 = vmul.f32 %v5659_v19, %v4979_v4  ;;  %v5661_v61 = vpop.eup %5660 }
 0x92c   : > { %v1921_v17 = vpack.c.bf16 %v1913_v7, %v1912_v42  ;;  %v4030_v63 = vmul.f32 %v5661_v61, %v4982_v5  ;;  %v5663_v48 = vpop.eup %5662  ;;  %v4499_v61 = vld [vmem:[%s8784_s7] ss:$0 sm:$0xff] }
 0x92d   : > { %v5665_v43 = vpop.eup %5664 }
 0x92e   : > { %1929 = vst.msk [vmem:[#allocation3 + $0x38] sm:$0xff] %vm1343_vm2, %v1921_v17  ;;  %v4041_v20 = vpack.c.bf16 %v4030_v63, %v4029_v58  ;;  %v4983_v45 = vpop.f32.mrb[116].mxu0  ;;  %v5667_v53 = vpop.eup %5666 }
 0x92f   : > { %v4984_v25 = vpop.f32.mrb[117].mxu0  ;;  %v5669_v39 = vpop.eup %5668 }
 0x930   : > { %v4985_v18 = vadd.f32 %v4984_v25, %v4983_v45  ;;  %v4986_v32 = vpop.f32.mrb[118].mxu0  ;;  %4061 = vrot.lane.b32.xlu0 %v4041_v20, %s5880_s23  ;;  %v5671_v27 = vpop.eup %5670 }
 0x931   : > { %v4987_v30 = vpop.f32.mrb[119].mxu0 }
 0x932   : > { %v4031_v3 = vmul.f32 %v5663_v48, %v4985_v18  ;;  %v4988_v10 = vadd.f32 %v4987_v30, %v4986_v32 }
 0x934   : > { %v4032_v26 = vmul.f32 %v5665_v43, %v4988_v10  ;;  %2633 = vrot.lane.b32.xlu0 %v2611_v52, %s5878_s25 }
 0x936   : > { %v4042_v12 = vpack.c.bf16 %v4032_v26, %v4031_v3  ;;  %v4989_v1 = vpop.f32.mrb[120].mxu0 }
 0x937   : > { %v4990_v51 = vpop.f32.mrb[121].mxu0 }
 0x938   : > { %v4991_v22 = vadd.f32 %v4990_v51, %v4989_v1  ;;  %v4992_v57 = vpop.f32.mrb[122].mxu0  ;;  %4063 = vrot.lane.b32.xlu1 %v4042_v12, %s5880_s23  ;;  %3349 = vrot.lane.b32.xlu0 %v3327_v2, %s5879_s14  ;;  %v5673_v2 = vpop.eup %5672 }
 0x939   : > { %v4993_v60 = vpop.f32.mrb[123].mxu0 }
 0x93a   : > { %v4994_v54 = vadd.f32 %v4993_v60, %v4992_v57  ;;  %v4033_v52 = vmul.f32 %v5667_v53, %v4991_v22 }
 0x93c   : > { %v4034_v8 = vmul.f32 %v5669_v39, %v4994_v54  ;;  %2635 = vrot.lane.b32.xlu1 %v2612_v38, %s5878_s25 }
 0x93e   : > { %v4043_v11 = vpack.c.bf16 %v4034_v8, %v4033_v52  ;;  %v4995_v55 = vpop.f32.mrb[124].mxu0 }
 0x93f   : > { %v4996_v31 = vpop.f32.mrb[125].mxu0 }
 0x940   : > { %v4997_v40 = vadd.f32 %v4996_v31, %v4995_v55  ;;  %v4998_v29 = vpop.f32.mrb[126].mxu0  ;;  %3351 = vrot.lane.b32.xlu1 %v3328_v34, %s5879_s14  ;;  %4065 = vrot.lane.b32.xlu0 %v4043_v11, %s5880_s23  ;;  %s4512_s14 = sshll.u32 %s5850_s12, 5 }
 0x941   : > { %v4999_v62 = vpop.f32.mrb[127].mxu0  ;;  %s4268_s22 = sadd.s32 %s4512_s14, %s4511_s26  ;;  %s5881_s26 = smov [#allocation7]  }
 0x942   : > { %v5000_v44 = vadd.f32 %v4999_v62, %v4998_v29  ;;  %v4035_v41 = vmul.f32 %v5671_v27, %v4997_v40  ;;  %s4513_s21 = sshll.u32 %s4268_s22, 7  ;;  %s5744_s14 = sshll.u32 %s5881_s26, 4  ;;  %s5745_s14 = int_to_ptr.vmem [resolvable:$false] %s5744_s14 }
 0x943   : > { %s5746_s22 = scalar_lea.vmem %s5745_s14, 4096  ;;  %p5747_p6 = scmp.lt.s32.totalorder %s8700_s24, %s5745_s14 }
 0x944   : > { %v4036_v15 = vmul.f32 %v5673_v2, %v5000_v44  ;;  %p5748_p9 = scmp.lt.s32.totalorder %s5746_s22, %s5740_s17 }
 0x946   : > { %v4044_v50 = vpack.c.bf16 %v4036_v15, %v4035_v41  ;;  %p5749_p3 = por %p5748_p9, %p5747_p6 }
 0x948   : > { %4067 = vrot.lane.b32.xlu1 %v4044_v50, %s5880_s23  ;;  %s8707_s23 = scalar_lea.hbm %s9079_s19, %s4513_s21  ;;  %p5750_p11 = pnand %p5749_p3, %p5743_p1 }
 0x961   : > { %v4054_v23 = vpop.permute.xlu0 %4053 }
 0x962   : > { %4078 = vst.msk [vmem:[#allocation3] sm:$0xff] %vm4077_vm5, %v4054_v23 }
 0x965   : > { %v2626_v38 = vpop.permute.xlu0 %2625 }
 0x966   : > { %2648 = vst.msk [vmem:[#allocation3 + $0x10] sm:$0xff] %vm2645_vm3, %v2626_v38 }
 0x969   : > { %v4056_v0 = vpop.permute.xlu1 %4055  ;;  %v3342_v35 = vpop.permute.xlu0 %3341  ;;  %v4086_v34 = vld [vmem:[#allocation3] sm:$0xff] }
 0x96a   : > { %4079 = vst.msk [vmem:[#allocation3 + $0x8] sm:$0xff] %vm4077_vm5, %v4056_v0  ;;  %5051 = vmatprep.mubr.msk.bf16.mxu1 %vm4117_vm6, %v4086_v34 }
 0x96b   : > { %3364 = vst.msk [vmem:[#allocation3 + $0x10] sm:$0xff] %vm3361_vm4, %v3342_v35 }
 0x96d   : > { %v2628_v59 = vpop.permute.xlu1 %2627 }
 0x96e   : > { %2649 = vst.msk [vmem:[#allocation3 + $0x18] sm:$0xff] %vm2645_vm3, %v2628_v59 }
 0x971   : > { %v3344_v49 = vpop.permute.xlu1 %3343  ;;  %v4087_v46 = vld [vmem:[#allocation3 + $0x8] sm:$0xff] }
 0x972   : > { %v4058_v13 = vpop.permute.xlu0 %4057  ;;  %3365 = vst.msk [vmem:[#allocation3 + $0x18] sm:$0xff] %vm3361_vm4, %v3344_v49  ;;  %5052 = vmatmul.mubr.msk.bf16.vlgmr.msra.gmra.mrb[128].mxu1 %vm4117_vm6, %v4087_v46 }
 0x973   : > { %4080 = vst.msk [vmem:[#allocation3 + $0x10] sm:$0xff] %vm4077_vm5, %v4058_v13 }
 0x976   : > { %v2630_v33 = vpop.permute.xlu0 %2629 }
 0x977   : > { %2650 = vst.msk [vmem:[#allocation3 + $0x20] sm:$0xff] %vm2645_vm3, %v2630_v33 }
 0x979   : > { %v4060_v47 = vpop.permute.xlu1 %4059 }
 0x97a   : > { %v3346_v28 = vpop.permute.xlu0 %3345  ;;  %v4088_v9 = vld [vmem:[#allocation3 + $0x10] sm:$0xff]  ;;  %4081 = vst.msk [vmem:[#allocation3 + $0x18] sm:$0xff] %vm4077_vm5, %v4060_v47 }
 0x97b   : > { %3366 = vst.msk [vmem:[#allocation3 + $0x20] sm:$0xff] %vm3361_vm4, %v3346_v28  ;;  %5055 = vmatprep.mubr.msk.bf16.mxu1 %vm4117_vm6, %v4088_v9 }
 0x97d   : > { %v2632_v36 = vpop.permute.xlu1 %2631 }
 0x97e   : > { %2651 = vst.msk [vmem:[#allocation3 + $0x28] sm:$0xff] %vm2645_vm3, %v2632_v36 }
 0x981   : > { %v3348_v56 = vpop.permute.xlu1 %3347  ;;  %v4089_v16 = vld [vmem:[#allocation3 + $0x18] sm:$0xff] }
 0x982   : > { %3367 = vst.msk [vmem:[#allocation3 + $0x28] sm:$0xff] %vm3361_vm4, %v3348_v56  ;;  %5056 = vmatmul.mubr.msk.bf16.gmra.mrb[132].mxu1 %vm4117_vm6, %v4089_v16 }
 0x9a2   : > { %v4062_v37 = vpop.permute.xlu0 %4061 }
 0x9a3   : > { %4082 = vst.msk [vmem:[#allocation3 + $0x20] sm:$0xff] %vm4077_vm5, %v4062_v37 }
 0x9a6   : > { %v2634_v4 = vpop.permute.xlu0 %2633 }
 0x9a7   : > { %2652 = vst.msk [vmem:[#allocation3 + $0x30] sm:$0xff] %vm2645_vm3, %v2634_v4 }
 0x9aa   : > { %v4064_v24 = vpop.permute.xlu1 %4063  ;;  %v3350_v21 = vpop.permute.xlu0 %3349  ;;  %v4090_v42 = vld [vmem:[#allocation3 + $0x20] sm:$0xff] }
 0x9ab   : > { %4083 = vst.msk [vmem:[#allocation3 + $0x28] sm:$0xff] %vm4077_vm5, %v4064_v24  ;;  %5059 = vmatprep.mubr.msk.bf16.mxu1 %vm4117_vm6, %v4090_v42 }
 0x9ac   : > { %3368 = vst.msk [vmem:[#allocation3 + $0x30] sm:$0xff] %vm3361_vm4, %v3350_v21 }
 0x9ae   : > { %v2636_v6 = vpop.permute.xlu1 %2635 }
 0x9af   : > { %2653 = vst.msk [vmem:[#allocation3 + $0x38] sm:$0xff] %vm2645_vm3, %v2636_v6 }
 0x9b2   : > { %v3352_v7 = vpop.permute.xlu1 %3351  ;;  %v4066_v19 = vpop.permute.xlu0 %4065  ;;  %v4091_v14 = vld [vmem:[#allocation3 + $0x28] sm:$0xff] }
 0x9b3   : > { %3369 = vst.msk [vmem:[#allocation3 + $0x38] sm:$0xff] %vm3361_vm4, %v3352_v7  ;;  %5060 = vmatmul.mubr.msk.bf16.gmra.mrb[136].mxu1 %vm4117_vm6, %v4091_v14 }
 0x9b4   : > { %4084 = vst.msk [vmem:[#allocation3 + $0x30] sm:$0xff] %vm4077_vm5, %v4066_v19 }
 0x9ba   : > { %v4068_v58 = vpop.permute.xlu1 %4067 }
 0x9bb   : > { %v4092_v5 = vld [vmem:[#allocation3 + $0x30] sm:$0xff]  ;;  %4085 = vst.msk [vmem:[#allocation3 + $0x38] sm:$0xff] %vm4077_vm5, %v4068_v58 }
 0x9bc   : > { %5063 = vmatprep.mubr.msk.bf16.mxu1 %vm4117_vm6, %v4092_v5 }
 0x9c2   : > { %v4093_v17 = vld [vmem:[#allocation3 + $0x38] sm:$0xff] }
 0x9c3   : > { %5064 = vmatmul.mubr.msk.bf16.gmra.mrb[140].mxu1 %vm4117_vm6, %v4093_v17 }
 0xa45   : > { %v5053_v63 = vpop.f32.mrb[128].mxu1 }
 0xa46   : > { %v4185_v20 = vadd.f32 %v5053_v63, %v4499_v61  ;;  %v4176_v45 = vpop.f32.mrb[129].mxu1 }
 0xa47   : > { %v4177_v25 = vadd.f32 %v4499_v61, %v4176_v45  ;;  %v5054_v18 = vpop.f32.mrb[130].mxu1 }
 0xa48   : > { %4241 = vst.msk [vmem:[%s6091_s18 + $0x10] sm:$0xff] %vm4117_vm6, %v4185_v20  ;;  %v4188_v32 = vadd.f32 %v5054_v18, %v4499_v61  ;;  %v4179_v48 = vpop.f32.mrb[131].mxu1 }
 0xa49   : > { %4239 = vst.msk [vmem:[%s6091_s18] sm:$0xff] %vm4117_vm6, %v4177_v25  ;;  %v4180_v30 = vadd.f32 %v4499_v61, %v4179_v48 }
 0xa4a   : > { %4242 = vst.msk [vmem:[%s6091_s18 + $0x18] sm:$0xff] %vm4117_vm6, %v4188_v32 }
 0xa4b   : > { %4240 = vst.msk [vmem:[%s6091_s18 + $0x8] sm:$0xff] %vm4117_vm6, %v4180_v30 }
 0xa55   : > { %v5057_v3 = vpop.f32.mrb[132].mxu1 }
 0xa56   : > { %v4201_v10 = vadd.f32 %v5057_v3, %v4499_v61  ;;  %v4192_v43 = vpop.f32.mrb[133].mxu1 }
 0xa57   : > { %v4193_v26 = vadd.f32 %v4499_v61, %v4192_v43  ;;  %v5058_v12 = vpop.f32.mrb[134].mxu1 }
 0xa58   : > { %4245 = vst.msk [vmem:[%s6091_s18 + $0x30] sm:$0xff] %vm4117_vm6, %v4201_v10  ;;  %v4204_v1 = vadd.f32 %v5058_v12, %v4499_v61  ;;  %v4195_v51 = vpop.f32.mrb[135].mxu1 }
 0xa59   : > { %4243 = vst.msk [vmem:[%s6091_s18 + $0x20] sm:$0xff] %vm4117_vm6, %v4193_v26  ;;  %v4196_v22 = vadd.f32 %v4499_v61, %v4195_v51 }
 0xa5a   : > { %4246 = vst.msk [vmem:[%s6091_s18 + $0x38] sm:$0xff] %vm4117_vm6, %v4204_v1 }
 0xa5b   : > { %4244 = vst.msk [vmem:[%s6091_s18 + $0x28] sm:$0xff] %vm4117_vm6, %v4196_v22 }
 0xa86   : > { %v5061_v57 = vpop.f32.mrb[136].mxu1 }
 0xa87   : > { %v4217_v60 = vadd.f32 %v5061_v57, %v4499_v61  ;;  %v4208_v53 = vpop.f32.mrb[137].mxu1 }
 0xa88   : > { %v4209_v54 = vadd.f32 %v4499_v61, %v4208_v53  ;;  %v5062_v39 = vpop.f32.mrb[138].mxu1 }
 0xa89   : > { %4249 = vst.msk [vmem:[%s6091_s18 + $0x50] sm:$0xff] %vm4117_vm6, %v4217_v60  ;;  %v4220_v52 = vadd.f32 %v5062_v39, %v4499_v61  ;;  %v4211_v8 = vpop.f32.mrb[139].mxu1 }
 0xa8a   : > { %4247 = vst.msk [vmem:[%s6091_s18 + $0x40] sm:$0xff] %vm4117_vm6, %v4209_v54  ;;  %v4212_v11 = vadd.f32 %v4499_v61, %v4211_v8 }
 0xa8b   : > { %4250 = vst.msk [vmem:[%s6091_s18 + $0x58] sm:$0xff] %vm4117_vm6, %v4220_v52 }
 0xa8c   : > { %4248 = vst.msk [vmem:[%s6091_s18 + $0x48] sm:$0xff] %vm4117_vm6, %v4212_v11 }
 0xa96   : > { %v5065_v55 = vpop.f32.mrb[140].mxu1 }
 0xa97   : > { %v4233_v31 = vadd.f32 %v5065_v55, %v4499_v61  ;;  %v4224_v40 = vpop.f32.mrb[141].mxu1 }
 0xa98   : > { %v4225_v29 = vadd.f32 %v4499_v61, %v4224_v40  ;;  %v5066_v62 = vpop.f32.mrb[142].mxu1 }
 0xa99   : > { %4253 = vst.msk [vmem:[%s6091_s18 + $0x70] sm:$0xff] %vm4117_vm6, %v4233_v31  ;;  %v4236_v27 = vadd.f32 %v5066_v62, %v4499_v61  ;;  %v4227_v44 = vpop.f32.mrb[143].mxu1 }
 0xa9a   : > { %4251 = vst.msk [vmem:[%s6091_s18 + $0x60] sm:$0xff] %vm4117_vm6, %v4225_v29  ;;  %v4228_v2 = vadd.f32 %v4499_v61, %v4227_v44 }
 0xa9b   : > { %4254 = vst.msk [vmem:[%s6091_s18 + $0x78] sm:$0xff] %vm4117_vm6, %v4236_v27 }
 0xa9c   : > { %4252 = vst.msk [vmem:[%s6091_s18 + $0x68] sm:$0xff] %vm4117_vm6, %v4228_v2 }
 0xa9d   : > { %5753 = shalt.err (!%p5750_p11)
}
 0xa9e   : > { %s5754_s13 = scalar_lea.hbm %s8707_s23, 2048  ;;  %s5758_s11 = scalar_lea.hbm %s9079_s19, 8192 }
 0xa9f   : > { %p5755_p12 = scmp.ne.s32.totalorder %s8707_s23, %s5754_s13  ;;  %p5759_p10 = scmp.lt.u32.totalorder %s8707_s23, %s9079_s19 }
 0xaa0   : > { %p5760_p13 = scmp.lt.u32.totalorder %s5758_s11, %s5754_s13  ;;  %p5762_p8 = scmp.lt.u32.totalorder %s5754_s13, %s8707_s23 }
 0xaa1   : > { %p5756_p5 = pnand %p5755_p12, %p9080_p4 }
 0xaa2   : > { %p5761_p2 = por %p5760_p13, %p5759_p10 }
 0xaa3   : > { %p5757_p7 = pneg %p5756_p5 }
 0xaa4   : > { %p5763_p0 = por %p5762_p8, %p5761_p2 }
 0xaa6   : > { %p5764_p1 = pnand %p5763_p0, %p5757_p7 }
 0xaa8   : > { %5767 = shalt.err (!%p5764_p1)
}
 0xaa9   : > { %s5882_s17 = smov 128  }
 0xaaa   : > { %5105 = dma.vmem_to_hbm [thread:$0]  (%p9080_p4), %s8700_s24, 2048, %s8707_s23, %s8715_s16, %s5882_s17, %s5882_s17, %s5878_s25  }
 0xaab PF: > { %p5116_p6 = scmp.ge.s32.totalorder %s5862_s15, 2  ;;  %s4286_s14 = sand.u32 1, %s5822_s27  }
 0xaac   : > { %p9081_p9 = scmp.ne.s32.totalorder %s8828_s20, 0  ;;  %s4287_s22 = scalar_lea.sflag [#allocation6], %s4286_s14 }
 0xaae   : > { %p5112_p3 = pnand %p5116_p6, %p9081_p9 }
 0xab0   : > { %5817 = dma.done.wait (!%p5112_p3), %s4287_s22, 2048  }
 0xab1   : > { %5819 = vsyncadd (!%p5112_p3), %s4287_s22, 4294965248  ;;  %s24_s15 = sadd.s32 1, %s5862_s15   ;;  %s9082_s8 = sld [smem:[#allocation14_spill]] }
 0xab2   : > { %p21_p11 = scmp.ge.s32.totalorder %s24_s15, 6   ;;  %s9083_s11 = sld [smem:[#allocation10_spill]] }
 0xab3   : > { %s9084_s12 = sld [smem:[#allocation11_spill]]  ;;  %s9085_s13 = sld [smem:[#allocation12_spill]] }
 0xab4   : > { %s9086_s14 = sld [smem:[#allocation13_spill]]  ;;  %s9087_s27 = smov %s5826_s28 }
 0xab5   : > { %s9088_s28 = smov %s5830_s29  ;;  %s9089_s29 = smov %s6016_s30 }
 0xab6   : > { %s9090_s30 = smov %s5838_s9  ;;  %s9091_s9 = smov %s5842_s10 }
 0xab7   : > { %s9092_s10 = smov %s9082_s8  ;;  %23 = sbr.rel (!%p21_p11) target bundleno = 11 (0xb), region = 109 }
 0xabe   :  { %4292 = vsyncpa [#allocation5], 1 }
 0xabf   :  { %4294 = vsyncpa [#allocation5 + $0x1], 1 }
 0xac0   :  { %4295 = vsyncpa [#allocation6], 1 }
 0xac1   :  { %4297 = vsyncpa [#allocation6 + $0x1], 1 }

</bundles_post_ra>
